<compile_context>
chip_gen: v7x
topology: tpu7x:2x2x1
jax: 0.10.0
libtpu: 0.0.40
codegen_flags: <defaults>
</compile_context>

<pallas_src>
import numpy as np
import jax
import jax.numpy as jnp
from jax import lax
from jax.experimental import pallas as pl
from jax.experimental.pallas import tpu as pltpu


def _sigmoid_via_tanh(x):
    # sigmoid(x) == 0.5 * (tanh(x/2) + 1): one EUP op instead of exp + divide.
    return 0.5 * jnp.tanh(0.5 * x) + 0.5


# --------------------------------- kernel -------------------------------------
def _make_lstom_kernel(num_layers, chunk_ts, hidden_size, num_directions):
    L = num_layers
    ND = num_directions
    H = hidden_size
    G = ND * H            # per-gate slab width (both directions interleaved)
    has_rest = L > 1

    def kernel(*refs):
        pos = 0
        xproj_ref = refs[pos]; pos += 1                    # (TS, B, 4G): x @ Wih0 + bias0
        wih_ref = None
        if has_rest:
            wih_ref = refs[pos]; pos += 1                  # (L-1, G, 4G)
        whh_ref = refs[pos]; pos += 1                      # (L, G, 4G) block-diag over dirs
        bias_ref = refs[pos]; pos += 1                     # (L, 1, 4G)  (entry 0 unused)
        fcw_ref = refs[pos]; pos += 1                      # (1, G)
        fcb_ref = refs[pos]; pos += 1                      # (1, 1)
        out_ref = refs[pos]; pos += 1                      # (TS, B)
        h_scr = refs[pos]; pos += 1                        # (L, B, G) carry
        c_scr = refs[pos]; pos += 1                        # (L, B, G) carry
        hall_scr = refs[pos]; pos += 1                     # (TS, B, G) top-layer h per step

        @pl.when(pl.program_id(0) == 0)
        def _():
            h_scr[...] = jnp.zeros_like(h_scr)
            c_scr[...] = jnp.zeros_like(c_scr)

        def cell(pre_gates, l, add_bias):
            """Fused both-direction LSTM cell update for layer l."""
            h_prev = h_scr[l]                              # (B, G) = [h_fwd | h_bwd]
            c_prev = c_scr[l]
            gates = pre_gates + jnp.dot(h_prev, whh_ref[l],
                                        preferred_element_type=jnp.float32)
            if add_bias:
                gates = gates + bias_ref[l]                # (B, 4G)
            act_if = _sigmoid_via_tanh(gates[:, 0:2 * G])  # i|f slab: 2G contiguous lanes
            i_g = act_if[:, 0:G]
            f_g = act_if[:, G:2 * G]
            g_g = jnp.tanh(gates[:, 2 * G:3 * G])
            o_g = _sigmoid_via_tanh(gates[:, 3 * G:4 * G])
            c_new = f_g * c_prev + i_g * g_g
            h_new = o_g * jnp.tanh(c_new)
            h_scr[l] = h_new
            c_scr[l] = c_new
            return h_new                                   # (B, G) == next layer's input

        def step(t):
            # Layer 0: input-side gates + bias were precomputed outside the loop.
            h_new = cell(xproj_ref[t], 0, add_bias=False)
            for l in range(1, L):
                in_gates = jnp.dot(h_new, wih_ref[l - 1],
                                   preferred_element_type=jnp.float32)
                h_new = cell(in_gates, l, add_bias=True)
            hall_scr[t] = h_new

        if chunk_ts <= 32:
            # Static unroll: indices are compile-time constants.
            for t in range(chunk_ts):
                step(t)
        else:
            def body(t, carry):
                step(t)
                return carry
            lax.fori_loop(0, chunk_ts, body, 0)

        # FC head + sigmoid, batched over the whole chunk: VPU multiply + lane
        # reduction (avoids an N=1 MXU matmul and per-step masked 1-lane stores).
        h_all = hall_scr[...]                              # (TS, B, G)
        w_row = fcw_ref[...]                               # (1, G)
        logits = jnp.sum(h_all * w_row[None, :, :], axis=-1) + fcb_ref[...]
        out_ref[...] = _sigmoid_via_tanh(logits)           # (TS, B)

    return kernel


# --------------------------------- wrapper -------------------------------------
def lstom_forward(x, kparams, *, num_layers, hidden_size, num_directions):
    """x: (S, B, D) f32 -> (S, B, 1)  (or (S, 1) when B == 1, matching torch.squeeze)."""
    S, B, D = x.shape
    L = num_layers
    ND = num_directions
    H = hidden_size
    G = ND * H
    FG = 4 * G

    # Hoist the layer-0 input projection (+ its bias) out of the recurrence:
    # one well-shaped (S*B, D) @ (D, 4G) matmul instead of 2*S tiny per-step ones.
    x_proj = (x.reshape(S * B, D) @ kparams["wih0"]
              + kparams["bias"][0]).reshape(S, B, FG)

    # Chunk timesteps: each grid step processes TS steps with an in-kernel loop.
    TS = S if S <= 128 else 128
    n_chunks = int(pl.cdiv(S, TS))
    S_pad = n_chunks * TS
    if S_pad != S:
        x_proj = jnp.pad(x_proj, ((0, S_pad - S), (0, 0), (0, 0)))

    inputs = [x_proj]
    in_specs = [pl.BlockSpec((TS, B, FG), lambda i: (i, 0, 0))]
    if L > 1:
        inputs.append(kparams["wih_rest"])
        in_specs.append(pl.BlockSpec((L - 1, G, FG), lambda i: (0, 0, 0)))
    inputs += [kparams["whh"], kparams["bias"], kparams["fc_w"], kparams["fc_b"]]
    in_specs += [
        pl.BlockSpec((L, G, FG), lambda i: (0, 0, 0)),
        pl.BlockSpec((L, 1, FG), lambda i: (0, 0, 0)),
        pl.BlockSpec((1, G), lambda i: (0, 0)),
        pl.BlockSpec((1, 1), lambda i: (0, 0)),
    ]

    kernel = _make_lstom_kernel(L, TS, H, ND)

    out = pl.pallas_call(
        kernel,
        out_shape=jax.ShapeDtypeStruct((S_pad, B), jnp.float32),
        grid_spec=pltpu.PrefetchScalarGridSpec(
            num_scalar_prefetch=0,
            grid=(n_chunks,),
            in_specs=in_specs,
            out_specs=pl.BlockSpec((TS, B), lambda i: (i, 0)),
            scratch_shapes=[
                pltpu.VMEM((L, B, G), jnp.float32),    # h carry
                pltpu.VMEM((L, B, G), jnp.float32),    # c carry
                pltpu.VMEM((TS, B, G), jnp.float32),   # top-layer h per step
            ],
        ),
        compiler_params=pltpu.CompilerParams(
            dimension_semantics=("arbitrary",)),       # sequential carry over time chunks
    )(*inputs)

    out = out[:S].reshape(S, B, 1)
    if B == 1:
        out = out[:, 0, :]                             # mimic torch.squeeze(out, 1)
    return out


# ----------------------------- parameter handling -------------------------------
def init_lstom_raw_params(key, input_dim, hidden_size, num_layers, num_directions):
    """Raw PyTorch-layout params: per cell (w_ih (4H,in), w_hh (4H,H), b_ih, b_hh)."""
    H = hidden_size
    bound = 1.0 / np.sqrt(H)
    cells = []
    for l in range(num_layers):
        in_l = input_dim if l == 0 else H * num_directions
        for _ in range(num_directions):
            key, k1, k2, k3, k4 = jax.random.split(key, 5)
            w_ih = jax.random.uniform(k1, (4 * H, in_l), jnp.float32, -bound, bound)
            w_hh = jax.random.uniform(k2, (4 * H, H), jnp.float32, -bound, bound)
            b_ih = jax.random.uniform(k3, (4 * H,), jnp.float32, -bound, bound)
            b_hh = jax.random.uniform(k4, (4 * H,), jnp.float32, -bound, bound)
            cells.append((w_ih, w_hh, b_ih, b_hh))
    fc_in = H * num_directions
    fc_bound = 1.0 / np.sqrt(fc_in)
    key, kf1, kf2 = jax.random.split(key, 3)
    fc_w = jax.random.uniform(kf1, (1, fc_in), jnp.float32, -fc_bound, fc_bound)
    fc_b = jax.random.uniform(kf2, (1,), jnp.float32, -fc_bound, fc_bound)
    return {"cells": cells, "fc_w": fc_w, "fc_b": fc_b}


def pack_lstom_params(raw, input_dim, hidden_size, num_layers, num_directions):
    """Fuse/reorder weights for the kernel.

    Gate-column layout (width 4G, G = num_directions*H):
        [ i_fwd i_bwd | f_fwd f_bwd | g_fwd g_bwd | o_fwd o_bwd ]
    h/c state per layer is (B, G) = [h_fwd | h_bwd], which is also the next
    layer's input layout and the FC head's input layout.
    """
    H = hidden_size
    ND = num_directions
    L = num_layers
    G = ND * H
    FG = 4 * G

    def fuse_ih(mats_t):  # mats_t: per-direction (in, 4H) -> (in, FG)
        cols = []
        for gi in range(4):
            for d in range(ND):
                cols.append(mats_t[d][:, gi * H:(gi + 1) * H])
        return np.concatenate(cols, axis=1).astype(np.float32)

    wih_list, whh_list, bias_list = [], [], []
    for l in range(L):
        w_ih_t, w_hh_t, b_sum = [], [], []
        for d in range(ND):
            w_ih, w_hh, b_ih, b_hh = raw["cells"][l * ND + d]
            w_ih_t.append(np.asarray(w_ih).T)                       # (in_l, 4H)
            w_hh_t.append(np.asarray(w_hh).T)                       # (H, 4H)
            b_sum.append(np.asarray(b_ih) + np.asarray(b_hh))       # (4H,)
        wih_list.append(fuse_ih(w_ih_t))                            # (in_l, FG)
        # Block-diagonal recurrent matrix: [h_fwd | h_bwd] @ whh_blk only hits
        # its own direction's columns inside each gate slab.
        whh_blk = np.zeros((G, FG), np.float32)
        bias = np.zeros((1, FG), np.float32)
        for gi in range(4):
            for d in range(ND):
                col0 = gi * G + d * H
                whh_blk[d * H:(d + 1) * H, col0:col0 + H] = \
                    w_hh_t[d][:, gi * H:(gi + 1) * H]
                bias[0, col0:col0 + H] = b_sum[d][gi * H:(gi + 1) * H]
        whh_list.append(whh_blk)
        bias_list.append(bias)

    kparams = {
        "wih0": jnp.asarray(wih_list[0]),                           # (D, FG)
        "whh": jnp.asarray(np.stack(whh_list, 0)),                  # (L, G, FG)
        "bias": jnp.asarray(np.stack(bias_list, 0)),                # (L, 1, FG)
        "fc_w": jnp.asarray(np.asarray(raw["fc_w"], np.float32)),   # (1, G)
        "fc_b": jnp.asarray(np.asarray(raw["fc_b"], np.float32).reshape(1, 1)),
    }
    if L > 1:
        kparams["wih_rest"] = jnp.asarray(np.stack(wih_list[1:], 0))  # (L-1, G, FG)
    return kparams


# ----------------------------- pure-JAX reference --------------------------------
def lstom_reference(x, raw, *, num_layers, hidden_size, num_directions):
    """Direct translation of the PyTorch module (per-step LSTM calls)."""
    S, B, _ = x.shape
    H = hidden_size
    ND = num_directions
    ncells = num_layers * ND
    h = [jnp.zeros((B, H), jnp.float32) for _ in range(ncells)]
    c = [jnp.zeros((B, H), jnp.float32) for _ in range(ncells)]
    outs = []
    for t in range(S):
        layer_in = x[t]
        for l in range(num_layers):
            dir_outs = []
            for d in range(ND):
                idx = l * ND + d
                w_ih, w_hh, b_ih, b_hh = raw["cells"][idx]
                gates = layer_in @ w_ih.T + h[idx] @ w_hh.T + b_ih + b_hh
                i_g = jax.nn.sigmoid(gates[:, 0 * H:1 * H])
                f_g = jax.nn.sigmoid(gates[:, 1 * H:2 * H])
                g_g = jnp.tanh(gates[:, 2 * H:3 * H])
                o_g = jax.nn.sigmoid(gates[:, 3 * H:4 * H])
                c[idx] = f_g * c[idx] + i_g * g_g
                h[idx] = o_g * jnp.tanh(c[idx])
                dir_outs.append(h[idx])
            layer_in = (jnp.concatenate(dir_outs, -1) if ND == 2 else dir_outs[0])
        outs.append(jax.nn.sigmoid(layer_in @ raw["fc_w"].T + raw["fc_b"]))
    out = jnp.stack(outs, 0)                 # (S, B, 1)
    if B == 1:
        out = out[:, 0, :]
    return out


# ------------------------------------ main ---------------------------------------
if __name__ == "__main__":
    seq_len, batch, input_dim = 8, 2, 4
    hidden_size, num_layers, bilstm = 32, 2, True
    num_directions = 2 if bilstm else 1

    key = jax.random.PRNGKey(0)
    key, kx, kp = jax.random.split(key, 3)
    x = jax.random.normal(kx, (seq_len, batch, input_dim), jnp.float32)
    raw = init_lstom_raw_params(kp, input_dim, hidden_size, num_layers, num_directions)
    kparams = pack_lstom_params(raw, input_dim, hidden_size, num_layers, num_directions)

    out = lstom_forward(x, kparams, num_layers=num_layers,
                        hidden_size=hidden_size, num_directions=num_directions)
    out = jax.block_until_ready(out)

    ref = lstom_reference(x, raw, num_layers=num_layers,
                          hidden_size=hidden_size, num_directions=num_directions)
    ref = jax.block_until_ready(ref)

    assert out.shape == (seq_len, batch, 1), out.shape
    np.testing.assert_allclose(np.asarray(out), np.asarray(ref),
                               rtol=5e-3, atol=5e-3)
    print("KERNEL_OK")
</pallas_src>

<mosaic_0001>
module attributes {stable_mosaic.version = 11 : i64} {
  func.func @kernel(%arg0: i32, %arg1: memref<8x2x256xf32, #tpu.memory_space<vmem>>, %arg2: memref<1x64x256xf32, #tpu.memory_space<vmem>>, %arg3: memref<2x64x256xf32, #tpu.memory_space<vmem>>, %arg4: memref<2x1x256xf32, #tpu.memory_space<vmem>>, %arg5: memref<1x64xf32, #tpu.memory_space<vmem>>, %arg6: memref<1x1xf32, #tpu.memory_space<vmem>>, %arg7: memref<8x2xf32, #tpu.memory_space<vmem>>, %arg8: memref<2x2x64xf32, #tpu.memory_space<vmem>>, %arg9: memref<2x2x64xf32, #tpu.memory_space<vmem>>, %arg10: memref<8x2x64xf32, #tpu.memory_space<vmem>>) attributes {dimension_semantics = [#tpu.dimension_semantics<arbitrary>], iteration_bounds = array<i64: 1>, scalar_prefetch = 0 : i64, scratch_operands = 3 : i64, tpu.core_type = #tpu.core_type<tc>, window_params = [{transform_indices = @transform_0, window_bounds = array<i64: 8, 2, 256>}, {pipeline_mode = #tpu.pipeline_mode<synchronous>, transform_indices = @transform_1, window_bounds = array<i64: 1, 64, 256>}, {pipeline_mode = #tpu.pipeline_mode<synchronous>, transform_indices = @transform_2, window_bounds = array<i64: 2, 64, 256>}, {pipeline_mode = #tpu.pipeline_mode<synchronous>, transform_indices = @transform_3, window_bounds = array<i64: 2, 1, 256>}, {pipeline_mode = #tpu.pipeline_mode<synchronous>, transform_indices = @transform_4, window_bounds = array<i64: 1, 64>}, {pipeline_mode = #tpu.pipeline_mode<synchronous>, transform_indices = @transform_5, window_bounds = array<i64: 1, 1>}, {transform_indices = @transform_6, window_bounds = array<i64: 8, 2>}]} {
    %c0_i32 = arith.constant 0 : i32
    %0 = arith.cmpi eq, %arg0, %c0_i32 : i32
    %1 = arith.extui %0 : i1 to i32
    %c0_i32_0 = arith.constant 0 : i32
    %2 = arith.cmpi ne, %1, %c0_i32_0 : i32
    scf.if %2 {
      %cst_461 = arith.constant 0.000000e+00 : f32
      %740 = vector.broadcast %cst_461 : f32 to vector<2x2x64xf32>
      %c0_462 = arith.constant 0 : index
      %c0_463 = arith.constant 0 : index
      %c0_464 = arith.constant 0 : index
      %741 = vector.load %arg8[%c0_462, %c0_463, %c0_464] : memref<2x2x64xf32, #tpu.memory_space<vmem>>, vector<2x2x64xf32>
      tpu.vector_store %arg8[%c0_462, %c0_463, %c0_464], %740 {strides = array<i32>} : memref<2x2x64xf32, #tpu.memory_space<vmem>>, vector<2x2x64xf32>,
      %cst_465 = arith.constant 0.000000e+00 : f32
      %742 = vector.broadcast %cst_465 : f32 to vector<2x2x64xf32>
      %c0_466 = arith.constant 0 : index
      %c0_467 = arith.constant 0 : index
      %c0_468 = arith.constant 0 : index
      %743 = vector.load %arg9[%c0_466, %c0_467, %c0_468] : memref<2x2x64xf32, #tpu.memory_space<vmem>>, vector<2x2x64xf32>
      tpu.vector_store %arg9[%c0_466, %c0_467, %c0_468], %742 {strides = array<i32>} : memref<2x2x64xf32, #tpu.memory_space<vmem>>, vector<2x2x64xf32>,
    } else {
    }
    %c0 = arith.constant 0 : index
    %c0_1 = arith.constant 0 : index
    %c0_2 = arith.constant 0 : index
    %3 = vector.load %arg1[%c0, %c0_1, %c0_2] : memref<8x2x256xf32, #tpu.memory_space<vmem>>, vector<1x2x256xf32>
    %4 = vector.shape_cast %3 : vector<1x2x256xf32> to vector<2x256xf32>
    %c0_3 = arith.constant 0 : index
    %c0_4 = arith.constant 0 : index
    %c0_5 = arith.constant 0 : index
    %5 = vector.load %arg8[%c0_3, %c0_4, %c0_5] : memref<2x2x64xf32, #tpu.memory_space<vmem>>, vector<1x2x64xf32>
    %6 = vector.shape_cast %5 : vector<1x2x64xf32> to vector<2x64xf32>
    %c0_6 = arith.constant 0 : index
    %c0_7 = arith.constant 0 : index
    %c0_8 = arith.constant 0 : index
    %7 = vector.load %arg9[%c0_6, %c0_7, %c0_8] : memref<2x2x64xf32, #tpu.memory_space<vmem>>, vector<1x2x64xf32>
    %8 = vector.shape_cast %7 : vector<1x2x64xf32> to vector<2x64xf32>
    %c0_9 = arith.constant 0 : index
    %c0_10 = arith.constant 0 : index
    %c0_11 = arith.constant 0 : index
    %9 = vector.load %arg3[%c0_9, %c0_10, %c0_11] : memref<2x64x256xf32, #tpu.memory_space<vmem>>, vector<1x64x256xf32>
    %10 = vector.shape_cast %9 : vector<1x64x256xf32> to vector<64x256xf32>
    %cst = arith.constant dense<0.000000e+00> : vector<2x256xf32>
    %11 = tpu.matmul %6, %10, %cst {dimension_numbers = #tpu.dot_dimension_numbers<[1], [0], [0], [1], [0, 0, 1, 1], [], []>} : vector<2x64xf32>, vector<64x256xf32>, vector<2x256xf32> -> vector<2x256xf32>
    %12 = arith.addf %4, %11 : vector<2x256xf32>
    %13 = vector.extract_strided_slice %12 {offsets = [0, 0], sizes = [2, 128], strides = [1, 1]} : vector<2x256xf32> to vector<2x128xf32>
    %cst_12 = arith.constant 5.000000e-01 : f32
    %14 = vector.broadcast %cst_12 : f32 to vector<2x128xf32>
    %15 = arith.mulf %14, %13 : vector<2x128xf32>
    %16 = math.tanh %15 : vector<2x128xf32>
    %cst_13 = arith.constant 5.000000e-01 : f32
    %17 = vector.broadcast %cst_13 : f32 to vector<2x128xf32>
    %18 = arith.mulf %17, %16 : vector<2x128xf32>
    %cst_14 = arith.constant 5.000000e-01 : f32
    %19 = vector.broadcast %cst_14 : f32 to vector<2x128xf32>
    %20 = arith.addf %18, %19 : vector<2x128xf32>
    %21 = vector.extract_strided_slice %20 {offsets = [0, 0], sizes = [2, 64], strides = [1, 1]} : vector<2x128xf32> to vector<2x64xf32>
    %22 = vector.extract_strided_slice %20 {offsets = [0, 64], sizes = [2, 64], strides = [1, 1]} : vector<2x128xf32> to vector<2x64xf32>
    %23 = vector.extract_strided_slice %12 {offsets = [0, 128], sizes = [2, 64], strides = [1, 1]} : vector<2x256xf32> to vector<2x64xf32>
    %24 = math.tanh %23 : vector<2x64xf32>
    %25 = vector.extract_strided_slice %12 {offsets = [0, 192], sizes = [2, 64], strides = [1, 1]} : vector<2x256xf32> to vector<2x64xf32>
    %cst_15 = arith.constant 5.000000e-01 : f32
    %26 = vector.broadcast %cst_15 : f32 to vector<2x64xf32>
    %27 = arith.mulf %26, %25 : vector<2x64xf32>
    %28 = math.tanh %27 : vector<2x64xf32>
    %cst_16 = arith.constant 5.000000e-01 : f32
    %29 = vector.broadcast %cst_16 : f32 to vector<2x64xf32>
    %30 = arith.mulf %29, %28 : vector<2x64xf32>
    %cst_17 = arith.constant 5.000000e-01 : f32
    %31 = vector.broadcast %cst_17 : f32 to vector<2x64xf32>
    %32 = arith.addf %30, %31 : vector<2x64xf32>
    %33 = arith.mulf %22, %8 : vector<2x64xf32>
    %34 = arith.mulf %21, %24 : vector<2x64xf32>
    %35 = arith.addf %33, %34 : vector<2x64xf32>
    %36 = math.tanh %35 : vector<2x64xf32>
    %37 = arith.mulf %32, %36 : vector<2x64xf32>
    %c0_18 = arith.constant 0 : index
    %c0_19 = arith.constant 0 : index
    %c0_20 = arith.constant 0 : index
    %38 = vector.load %arg8[%c0_18, %c0_19, %c0_20] : memref<2x2x64xf32, #tpu.memory_space<vmem>>, vector<1x2x64xf32>
    %39 = vector.shape_cast %38 : vector<1x2x64xf32> to vector<2x64xf32>
    %40 = vector.shape_cast %37 : vector<2x64xf32> to vector<1x2x64xf32>
    tpu.vector_store %arg8[%c0_18, %c0_19, %c0_20], %40 {strides = array<i32>} : memref<2x2x64xf32, #tpu.memory_space<vmem>>, vector<1x2x64xf32>,
    %c0_21 = arith.constant 0 : index
    %c0_22 = arith.constant 0 : index
    %c0_23 = arith.constant 0 : index
    %41 = vector.load %arg9[%c0_21, %c0_22, %c0_23] : memref<2x2x64xf32, #tpu.memory_space<vmem>>, vector<1x2x64xf32>
    %42 = vector.shape_cast %41 : vector<1x2x64xf32> to vector<2x64xf32>
    %43 = vector.shape_cast %35 : vector<2x64xf32> to vector<1x2x64xf32>
    tpu.vector_store %arg9[%c0_21, %c0_22, %c0_23], %43 {strides = array<i32>} : memref<2x2x64xf32, #tpu.memory_space<vmem>>, vector<1x2x64xf32>,
    %c0_24 = arith.constant 0 : index
    %c0_25 = arith.constant 0 : index
    %c0_26 = arith.constant 0 : index
    %44 = vector.load %arg2[%c0_24, %c0_25, %c0_26] : memref<1x64x256xf32, #tpu.memory_space<vmem>>, vector<1x64x256xf32>
    %45 = vector.shape_cast %44 : vector<1x64x256xf32> to vector<64x256xf32>
    %cst_27 = arith.constant dense<0.000000e+00> : vector<2x256xf32>
    %46 = tpu.matmul %37, %45, %cst_27 {dimension_numbers = #tpu.dot_dimension_numbers<[1], [0], [0], [1], [0, 0, 1, 1], [], []>} : vector<2x64xf32>, vector<64x256xf32>, vector<2x256xf32> -> vector<2x256xf32>
    %c1 = arith.constant 1 : index
    %c0_28 = arith.constant 0 : index
    %c0_29 = arith.constant 0 : index
    %47 = vector.load %arg8[%c1, %c0_28, %c0_29] : memref<2x2x64xf32, #tpu.memory_space<vmem>>, vector<1x2x64xf32>
    %48 = vector.shape_cast %47 : vector<1x2x64xf32> to vector<2x64xf32>
    %c1_30 = arith.constant 1 : index
    %c0_31 = arith.constant 0 : index
    %c0_32 = arith.constant 0 : index
    %49 = vector.load %arg9[%c1_30, %c0_31, %c0_32] : memref<2x2x64xf32, #tpu.memory_space<vmem>>, vector<1x2x64xf32>
    %50 = vector.shape_cast %49 : vector<1x2x64xf32> to vector<2x64xf32>
    %c1_33 = arith.constant 1 : index
    %c0_34 = arith.constant 0 : index
    %c0_35 = arith.constant 0 : index
    %51 = vector.load %arg3[%c1_33, %c0_34, %c0_35] : memref<2x64x256xf32, #tpu.memory_space<vmem>>, vector<1x64x256xf32>
    %52 = vector.shape_cast %51 : vector<1x64x256xf32> to vector<64x256xf32>
    %cst_36 = arith.constant dense<0.000000e+00> : vector<2x256xf32>
    %53 = tpu.matmul %48, %52, %cst_36 {dimension_numbers = #tpu.dot_dimension_numbers<[1], [0], [0], [1], [0, 0, 1, 1], [], []>} : vector<2x64xf32>, vector<64x256xf32>, vector<2x256xf32> -> vector<2x256xf32>
    %54 = arith.addf %46, %53 : vector<2x256xf32>
    %c1_37 = arith.constant 1 : index
    %c0_38 = arith.constant 0 : index
    %c0_39 = arith.constant 0 : index
    %55 = vector.load %arg4[%c1_37, %c0_38, %c0_39] : memref<2x1x256xf32, #tpu.memory_space<vmem>>, vector<1x1x256xf32>
    %56 = vector.shape_cast %55 : vector<1x1x256xf32> to vector<1x256xf32>
    %57 = vector.broadcast %56 : vector<1x256xf32> to vector<2x256xf32>
    %58 = arith.addf %54, %57 : vector<2x256xf32>
    %59 = vector.extract_strided_slice %58 {offsets = [0, 0], sizes = [2, 128], strides = [1, 1]} : vector<2x256xf32> to vector<2x128xf32>
    %cst_40 = arith.constant 5.000000e-01 : f32
    %60 = vector.broadcast %cst_40 : f32 to vector<2x128xf32>
    %61 = arith.mulf %60, %59 : vector<2x128xf32>
    %62 = math.tanh %61 : vector<2x128xf32>
    %cst_41 = arith.constant 5.000000e-01 : f32
    %63 = vector.broadcast %cst_41 : f32 to vector<2x128xf32>
    %64 = arith.mulf %63, %62 : vector<2x128xf32>
    %cst_42 = arith.constant 5.000000e-01 : f32
    %65 = vector.broadcast %cst_42 : f32 to vector<2x128xf32>
    %66 = arith.addf %64, %65 : vector<2x128xf32>
    %67 = vector.extract_strided_slice %66 {offsets = [0, 0], sizes = [2, 64], strides = [1, 1]} : vector<2x128xf32> to vector<2x64xf32>
    %68 = vector.extract_strided_slice %66 {offsets = [0, 64], sizes = [2, 64], strides = [1, 1]} : vector<2x128xf32> to vector<2x64xf32>
    %69 = vector.extract_strided_slice %58 {offsets = [0, 128], sizes = [2, 64], strides = [1, 1]} : vector<2x256xf32> to vector<2x64xf32>
    %70 = math.tanh %69 : vector<2x64xf32>
    %71 = vector.extract_strided_slice %58 {offsets = [0, 192], sizes = [2, 64], strides = [1, 1]} : vector<2x256xf32> to vector<2x64xf32>
    %cst_43 = arith.constant 5.000000e-01 : f32
    %72 = vector.broadcast %cst_43 : f32 to vector<2x64xf32>
    %73 = arith.mulf %72, %71 : vector<2x64xf32>
    %74 = math.tanh %73 : vector<2x64xf32>
    %cst_44 = arith.constant 5.000000e-01 : f32
    %75 = vector.broadcast %cst_44 : f32 to vector<2x64xf32>
    %76 = arith.mulf %75, %74 : vector<2x64xf32>
    %cst_45 = arith.constant 5.000000e-01 : f32
    %77 = vector.broadcast %cst_45 : f32 to vector<2x64xf32>
    %78 = arith.addf %76, %77 : vector<2x64xf32>
    %79 = arith.mulf %68, %50 : vector<2x64xf32>
    %80 = arith.mulf %67, %70 : vector<2x64xf32>
    %81 = arith.addf %79, %80 : vector<2x64xf32>
    %82 = math.tanh %81 : vector<2x64xf32>
    %83 = arith.mulf %78, %82 : vector<2x64xf32>
    %c1_46 = arith.constant 1 : index
    %c0_47 = arith.constant 0 : index
    %c0_48 = arith.constant 0 : index
    %84 = vector.load %arg8[%c1_46, %c0_47, %c0_48] : memref<2x2x64xf32, #tpu.memory_space<vmem>>, vector<1x2x64xf32>
    %85 = vector.shape_cast %84 : vector<1x2x64xf32> to vector<2x64xf32>
    %86 = vector.shape_cast %83 : vector<2x64xf32> to vector<1x2x64xf32>
    tpu.vector_store %arg8[%c1_46, %c0_47, %c0_48], %86 {strides = array<i32>} : memref<2x2x64xf32, #tpu.memory_space<vmem>>, vector<1x2x64xf32>,
    %c1_49 = arith.constant 1 : index
    %c0_50 = arith.constant 0 : index
    %c0_51 = arith.constant 0 : index
    %87 = vector.load %arg9[%c1_49, %c0_50, %c0_51] : memref<2x2x64xf32, #tpu.memory_space<vmem>>, vector<1x2x64xf32>
    %88 = vector.shape_cast %87 : vector<1x2x64xf32> to vector<2x64xf32>
    %89 = vector.shape_cast %81 : vector<2x64xf32> to vector<1x2x64xf32>
    tpu.vector_store %arg9[%c1_49, %c0_50, %c0_51], %89 {strides = array<i32>} : memref<2x2x64xf32, #tpu.memory_space<vmem>>, vector<1x2x64xf32>,
    %c0_52 = arith.constant 0 : index
    %c0_53 = arith.constant 0 : index
    %c0_54 = arith.constant 0 : index
    %90 = vector.load %arg10[%c0_52, %c0_53, %c0_54] : memref<8x2x64xf32, #tpu.memory_space<vmem>>, vector<1x2x64xf32>
    %91 = vector.shape_cast %90 : vector<1x2x64xf32> to vector<2x64xf32>
    %92 = vector.shape_cast %83 : vector<2x64xf32> to vector<1x2x64xf32>
    tpu.vector_store %arg10[%c0_52, %c0_53, %c0_54], %92 {strides = array<i32>} : memref<8x2x64xf32, #tpu.memory_space<vmem>>, vector<1x2x64xf32>,
    %c1_55 = arith.constant 1 : index
    %c0_56 = arith.constant 0 : index
    %c0_57 = arith.constant 0 : index
    %93 = vector.load %arg1[%c1_55, %c0_56, %c0_57] : memref<8x2x256xf32, #tpu.memory_space<vmem>>, vector<1x2x256xf32>
    %94 = vector.shape_cast %93 : vector<1x2x256xf32> to vector<2x256xf32>
    %c0_58 = arith.constant 0 : index
    %c0_59 = arith.constant 0 : index
    %c0_60 = arith.constant 0 : index
    %95 = vector.load %arg8[%c0_58, %c0_59, %c0_60] : memref<2x2x64xf32, #tpu.memory_space<vmem>>, vector<1x2x64xf32>
    %96 = vector.shape_cast %95 : vector<1x2x64xf32> to vector<2x64xf32>
    %c0_61 = arith.constant 0 : index
    %c0_62 = arith.constant 0 : index
    %c0_63 = arith.constant 0 : index
    %97 = vector.load %arg9[%c0_61, %c0_62, %c0_63] : memref<2x2x64xf32, #tpu.memory_space<vmem>>, vector<1x2x64xf32>
    %98 = vector.shape_cast %97 : vector<1x2x64xf32> to vector<2x64xf32>
    %c0_64 = arith.constant 0 : index
    %c0_65 = arith.constant 0 : index
    %c0_66 = arith.constant 0 : index
    %99 = vector.load %arg3[%c0_64, %c0_65, %c0_66] : memref<2x64x256xf32, #tpu.memory_space<vmem>>, vector<1x64x256xf32>
    %100 = vector.shape_cast %99 : vector<1x64x256xf32> to vector<64x256xf32>
    %cst_67 = arith.constant dense<0.000000e+00> : vector<2x256xf32>
    %101 = tpu.matmul %96, %100, %cst_67 {dimension_numbers = #tpu.dot_dimension_numbers<[1], [0], [0], [1], [0, 0, 1, 1], [], []>} : vector<2x64xf32>, vector<64x256xf32>, vector<2x256xf32> -> vector<2x256xf32>
    %102 = arith.addf %94, %101 : vector<2x256xf32>
    %103 = vector.extract_strided_slice %102 {offsets = [0, 0], sizes = [2, 128], strides = [1, 1]} : vector<2x256xf32> to vector<2x128xf32>
    %cst_68 = arith.constant 5.000000e-01 : f32
    %104 = vector.broadcast %cst_68 : f32 to vector<2x128xf32>
    %105 = arith.mulf %104, %103 : vector<2x128xf32>
    %106 = math.tanh %105 : vector<2x128xf32>
    %cst_69 = arith.constant 5.000000e-01 : f32
    %107 = vector.broadcast %cst_69 : f32 to vector<2x128xf32>
    %108 = arith.mulf %107, %106 : vector<2x128xf32>
    %cst_70 = arith.constant 5.000000e-01 : f32
    %109 = vector.broadcast %cst_70 : f32 to vector<2x128xf32>
    %110 = arith.addf %108, %109 : vector<2x128xf32>
    %111 = vector.extract_strided_slice %110 {offsets = [0, 0], sizes = [2, 64], strides = [1, 1]} : vector<2x128xf32> to vector<2x64xf32>
    %112 = vector.extract_strided_slice %110 {offsets = [0, 64], sizes = [2, 64], strides = [1, 1]} : vector<2x128xf32> to vector<2x64xf32>
    %113 = vector.extract_strided_slice %102 {offsets = [0, 128], sizes = [2, 64], strides = [1, 1]} : vector<2x256xf32> to vector<2x64xf32>
    %114 = math.tanh %113 : vector<2x64xf32>
    %115 = vector.extract_strided_slice %102 {offsets = [0, 192], sizes = [2, 64], strides = [1, 1]} : vector<2x256xf32> to vector<2x64xf32>
    %cst_71 = arith.constant 5.000000e-01 : f32
    %116 = vector.broadcast %cst_71 : f32 to vector<2x64xf32>
    %117 = arith.mulf %116, %115 : vector<2x64xf32>
    %118 = math.tanh %117 : vector<2x64xf32>
    %cst_72 = arith.constant 5.000000e-01 : f32
    %119 = vector.broadcast %cst_72 : f32 to vector<2x64xf32>
    %120 = arith.mulf %119, %118 : vector<2x64xf32>
    %cst_73 = arith.constant 5.000000e-01 : f32
    %121 = vector.broadcast %cst_73 : f32 to vector<2x64xf32>
    %122 = arith.addf %120, %121 : vector<2x64xf32>
    %123 = arith.mulf %112, %98 : vector<2x64xf32>
    %124 = arith.mulf %111, %114 : vector<2x64xf32>
    %125 = arith.addf %123, %124 : vector<2x64xf32>
    %126 = math.tanh %125 : vector<2x64xf32>
    %127 = arith.mulf %122, %126 : vector<2x64xf32>
    %c0_74 = arith.constant 0 : index
    %c0_75 = arith.constant 0 : index
    %c0_76 = arith.constant 0 : index
    %128 = vector.load %arg8[%c0_74, %c0_75, %c0_76] : memref<2x2x64xf32, #tpu.memory_space<vmem>>, vector<1x2x64xf32>
    %129 = vector.shape_cast %128 : vector<1x2x64xf32> to vector<2x64xf32>
    %130 = vector.shape_cast %127 : vector<2x64xf32> to vector<1x2x64xf32>
    tpu.vector_store %arg8[%c0_74, %c0_75, %c0_76], %130 {strides = array<i32>} : memref<2x2x64xf32, #tpu.memory_space<vmem>>, vector<1x2x64xf32>,
    %c0_77 = arith.constant 0 : index
    %c0_78 = arith.constant 0 : index
    %c0_79 = arith.constant 0 : index
    %131 = vector.load %arg9[%c0_77, %c0_78, %c0_79] : memref<2x2x64xf32, #tpu.memory_space<vmem>>, vector<1x2x64xf32>
    %132 = vector.shape_cast %131 : vector<1x2x64xf32> to vector<2x64xf32>
    %133 = vector.shape_cast %125 : vector<2x64xf32> to vector<1x2x64xf32>
    tpu.vector_store %arg9[%c0_77, %c0_78, %c0_79], %133 {strides = array<i32>} : memref<2x2x64xf32, #tpu.memory_space<vmem>>, vector<1x2x64xf32>,
    %c0_80 = arith.constant 0 : index
    %c0_81 = arith.constant 0 : index
    %c0_82 = arith.constant 0 : index
    %134 = vector.load %arg2[%c0_80, %c0_81, %c0_82] : memref<1x64x256xf32, #tpu.memory_space<vmem>>, vector<1x64x256xf32>
    %135 = vector.shape_cast %134 : vector<1x64x256xf32> to vector<64x256xf32>
    %cst_83 = arith.constant dense<0.000000e+00> : vector<2x256xf32>
    %136 = tpu.matmul %127, %135, %cst_83 {dimension_numbers = #tpu.dot_dimension_numbers<[1], [0], [0], [1], [0, 0, 1, 1], [], []>} : vector<2x64xf32>, vector<64x256xf32>, vector<2x256xf32> -> vector<2x256xf32>
    %c1_84 = arith.constant 1 : index
    %c0_85 = arith.constant 0 : index
    %c0_86 = arith.constant 0 : index
    %137 = vector.load %arg8[%c1_84, %c0_85, %c0_86] : memref<2x2x64xf32, #tpu.memory_space<vmem>>, vector<1x2x64xf32>
    %138 = vector.shape_cast %137 : vector<1x2x64xf32> to vector<2x64xf32>
    %c1_87 = arith.constant 1 : index
    %c0_88 = arith.constant 0 : index
    %c0_89 = arith.constant 0 : index
    %139 = vector.load %arg9[%c1_87, %c0_88, %c0_89] : memref<2x2x64xf32, #tpu.memory_space<vmem>>, vector<1x2x64xf32>
    %140 = vector.shape_cast %139 : vector<1x2x64xf32> to vector<2x64xf32>
    %c1_90 = arith.constant 1 : index
    %c0_91 = arith.constant 0 : index
    %c0_92 = arith.constant 0 : index
    %141 = vector.load %arg3[%c1_90, %c0_91, %c0_92] : memref<2x64x256xf32, #tpu.memory_space<vmem>>, vector<1x64x256xf32>
    %142 = vector.shape_cast %141 : vector<1x64x256xf32> to vector<64x256xf32>
    %cst_93 = arith.constant dense<0.000000e+00> : vector<2x256xf32>
    %143 = tpu.matmul %138, %142, %cst_93 {dimension_numbers = #tpu.dot_dimension_numbers<[1], [0], [0], [1], [0, 0, 1, 1], [], []>} : vector<2x64xf32>, vector<64x256xf32>, vector<2x256xf32> -> vector<2x256xf32>
    %144 = arith.addf %136, %143 : vector<2x256xf32>
    %c1_94 = arith.constant 1 : index
    %c0_95 = arith.constant 0 : index
    %c0_96 = arith.constant 0 : index
    %145 = vector.load %arg4[%c1_94, %c0_95, %c0_96] : memref<2x1x256xf32, #tpu.memory_space<vmem>>, vector<1x1x256xf32>
    %146 = vector.shape_cast %145 : vector<1x1x256xf32> to vector<1x256xf32>
    %147 = vector.broadcast %146 : vector<1x256xf32> to vector<2x256xf32>
    %148 = arith.addf %144, %147 : vector<2x256xf32>
    %149 = vector.extract_strided_slice %148 {offsets = [0, 0], sizes = [2, 128], strides = [1, 1]} : vector<2x256xf32> to vector<2x128xf32>
    %cst_97 = arith.constant 5.000000e-01 : f32
    %150 = vector.broadcast %cst_97 : f32 to vector<2x128xf32>
    %151 = arith.mulf %150, %149 : vector<2x128xf32>
    %152 = math.tanh %151 : vector<2x128xf32>
    %cst_98 = arith.constant 5.000000e-01 : f32
    %153 = vector.broadcast %cst_98 : f32 to vector<2x128xf32>
    %154 = arith.mulf %153, %152 : vector<2x128xf32>
    %cst_99 = arith.constant 5.000000e-01 : f32
    %155 = vector.broadcast %cst_99 : f32 to vector<2x128xf32>
    %156 = arith.addf %154, %155 : vector<2x128xf32>
    %157 = vector.extract_strided_slice %156 {offsets = [0, 0], sizes = [2, 64], strides = [1, 1]} : vector<2x128xf32> to vector<2x64xf32>
    %158 = vector.extract_strided_slice %156 {offsets = [0, 64], sizes = [2, 64], strides = [1, 1]} : vector<2x128xf32> to vector<2x64xf32>
    %159 = vector.extract_strided_slice %148 {offsets = [0, 128], sizes = [2, 64], strides = [1, 1]} : vector<2x256xf32> to vector<2x64xf32>
    %160 = math.tanh %159 : vector<2x64xf32>
    %161 = vector.extract_strided_slice %148 {offsets = [0, 192], sizes = [2, 64], strides = [1, 1]} : vector<2x256xf32> to vector<2x64xf32>
    %cst_100 = arith.constant 5.000000e-01 : f32
    %162 = vector.broadcast %cst_100 : f32 to vector<2x64xf32>
    %163 = arith.mulf %162, %161 : vector<2x64xf32>
    %164 = math.tanh %163 : vector<2x64xf32>
    %cst_101 = arith.constant 5.000000e-01 : f32
    %165 = vector.broadcast %cst_101 : f32 to vector<2x64xf32>
    %166 = arith.mulf %165, %164 : vector<2x64xf32>
    %cst_102 = arith.constant 5.000000e-01 : f32
    %167 = vector.broadcast %cst_102 : f32 to vector<2x64xf32>
    %168 = arith.addf %166, %167 : vector<2x64xf32>
    %169 = arith.mulf %158, %140 : vector<2x64xf32>
    %170 = arith.mulf %157, %160 : vector<2x64xf32>
    %171 = arith.addf %169, %170 : vector<2x64xf32>
    %172 = math.tanh %171 : vector<2x64xf32>
    %173 = arith.mulf %168, %172 : vector<2x64xf32>
    %c1_103 = arith.constant 1 : index
    %c0_104 = arith.constant 0 : index
    %c0_105 = arith.constant 0 : index
    %174 = vector.load %arg8[%c1_103, %c0_104, %c0_105] : memref<2x2x64xf32, #tpu.memory_space<vmem>>, vector<1x2x64xf32>
    %175 = vector.shape_cast %174 : vector<1x2x64xf32> to vector<2x64xf32>
    %176 = vector.shape_cast %173 : vector<2x64xf32> to vector<1x2x64xf32>
    tpu.vector_store %arg8[%c1_103, %c0_104, %c0_105], %176 {strides = array<i32>} : memref<2x2x64xf32, #tpu.memory_space<vmem>>, vector<1x2x64xf32>,
    %c1_106 = arith.constant 1 : index
    %c0_107 = arith.constant 0 : index
    %c0_108 = arith.constant 0 : index
    %177 = vector.load %arg9[%c1_106, %c0_107, %c0_108] : memref<2x2x64xf32, #tpu.memory_space<vmem>>, vector<1x2x64xf32>
    %178 = vector.shape_cast %177 : vector<1x2x64xf32> to vector<2x64xf32>
    %179 = vector.shape_cast %171 : vector<2x64xf32> to vector<1x2x64xf32>
    tpu.vector_store %arg9[%c1_106, %c0_107, %c0_108], %179 {strides = array<i32>} : memref<2x2x64xf32, #tpu.memory_space<vmem>>, vector<1x2x64xf32>,
    %c1_109 = arith.constant 1 : index
    %c0_110 = arith.constant 0 : index
    %c0_111 = arith.constant 0 : index
    %180 = vector.load %arg10[%c1_109, %c0_110, %c0_111] : memref<8x2x64xf32, #tpu.memory_space<vmem>>, vector<1x2x64xf32>
    %181 = vector.shape_cast %180 : vector<1x2x64xf32> to vector<2x64xf32>
    %182 = vector.shape_cast %173 : vector<2x64xf32> to vector<1x2x64xf32>
    tpu.vector_store %arg10[%c1_109, %c0_110, %c0_111], %182 {strides = array<i32>} : memref<8x2x64xf32, #tpu.memory_space<vmem>>, vector<1x2x64xf32>,
    %c2 = arith.constant 2 : index
    %c0_112 = arith.constant 0 : index
    %c0_113 = arith.constant 0 : index
    %183 = vector.load %arg1[%c2, %c0_112, %c0_113] : memref<8x2x256xf32, #tpu.memory_space<vmem>>, vector<1x2x256xf32>
    %184 = vector.shape_cast %183 : vector<1x2x256xf32> to vector<2x256xf32>
    %c0_114 = arith.constant 0 : index
    %c0_115 = arith.constant 0 : index
    %c0_116 = arith.constant 0 : index
    %185 = vector.load %arg8[%c0_114, %c0_115, %c0_116] : memref<2x2x64xf32, #tpu.memory_space<vmem>>, vector<1x2x64xf32>
    %186 = vector.shape_cast %185 : vector<1x2x64xf32> to vector<2x64xf32>
    %c0_117 = arith.constant 0 : index
    %c0_118 = arith.constant 0 : index
    %c0_119 = arith.constant 0 : index
    %187 = vector.load %arg9[%c0_117, %c0_118, %c0_119] : memref<2x2x64xf32, #tpu.memory_space<vmem>>, vector<1x2x64xf32>
    %188 = vector.shape_cast %187 : vector<1x2x64xf32> to vector<2x64xf32>
    %c0_120 = arith.constant 0 : index
    %c0_121 = arith.constant 0 : index
    %c0_122 = arith.constant 0 : index
    %189 = vector.load %arg3[%c0_120, %c0_121, %c0_122] : memref<2x64x256xf32, #tpu.memory_space<vmem>>, vector<1x64x256xf32>
    %190 = vector.shape_cast %189 : vector<1x64x256xf32> to vector<64x256xf32>
    %cst_123 = arith.constant dense<0.000000e+00> : vector<2x256xf32>
    %191 = tpu.matmul %186, %190, %cst_123 {dimension_numbers = #tpu.dot_dimension_numbers<[1], [0], [0], [1], [0, 0, 1, 1], [], []>} : vector<2x64xf32>, vector<64x256xf32>, vector<2x256xf32> -> vector<2x256xf32>
    %192 = arith.addf %184, %191 : vector<2x256xf32>
    %193 = vector.extract_strided_slice %192 {offsets = [0, 0], sizes = [2, 128], strides = [1, 1]} : vector<2x256xf32> to vector<2x128xf32>
    %cst_124 = arith.constant 5.000000e-01 : f32
    %194 = vector.broadcast %cst_124 : f32 to vector<2x128xf32>
    %195 = arith.mulf %194, %193 : vector<2x128xf32>
    %196 = math.tanh %195 : vector<2x128xf32>
    %cst_125 = arith.constant 5.000000e-01 : f32
    %197 = vector.broadcast %cst_125 : f32 to vector<2x128xf32>
    %198 = arith.mulf %197, %196 : vector<2x128xf32>
    %cst_126 = arith.constant 5.000000e-01 : f32
    %199 = vector.broadcast %cst_126 : f32 to vector<2x128xf32>
    %200 = arith.addf %198, %199 : vector<2x128xf32>
    %201 = vector.extract_strided_slice %200 {offsets = [0, 0], sizes = [2, 64], strides = [1, 1]} : vector<2x128xf32> to vector<2x64xf32>
    %202 = vector.extract_strided_slice %200 {offsets = [0, 64], sizes = [2, 64], strides = [1, 1]} : vector<2x128xf32> to vector<2x64xf32>
    %203 = vector.extract_strided_slice %192 {offsets = [0, 128], sizes = [2, 64], strides = [1, 1]} : vector<2x256xf32> to vector<2x64xf32>
    %204 = math.tanh %203 : vector<2x64xf32>
    %205 = vector.extract_strided_slice %192 {offsets = [0, 192], sizes = [2, 64], strides = [1, 1]} : vector<2x256xf32> to vector<2x64xf32>
    %cst_127 = arith.constant 5.000000e-01 : f32
    %206 = vector.broadcast %cst_127 : f32 to vector<2x64xf32>
    %207 = arith.mulf %206, %205 : vector<2x64xf32>
    %208 = math.tanh %207 : vector<2x64xf32>
    %cst_128 = arith.constant 5.000000e-01 : f32
    %209 = vector.broadcast %cst_128 : f32 to vector<2x64xf32>
    %210 = arith.mulf %209, %208 : vector<2x64xf32>
    %cst_129 = arith.constant 5.000000e-01 : f32
    %211 = vector.broadcast %cst_129 : f32 to vector<2x64xf32>
    %212 = arith.addf %210, %211 : vector<2x64xf32>
    %213 = arith.mulf %202, %188 : vector<2x64xf32>
    %214 = arith.mulf %201, %204 : vector<2x64xf32>
    %215 = arith.addf %213, %214 : vector<2x64xf32>
    %216 = math.tanh %215 : vector<2x64xf32>
    %217 = arith.mulf %212, %216 : vector<2x64xf32>
    %c0_130 = arith.constant 0 : index
    %c0_131 = arith.constant 0 : index
    %c0_132 = arith.constant 0 : index
    %218 = vector.load %arg8[%c0_130, %c0_131, %c0_132] : memref<2x2x64xf32, #tpu.memory_space<vmem>>, vector<1x2x64xf32>
    %219 = vector.shape_cast %218 : vector<1x2x64xf32> to vector<2x64xf32>
    %220 = vector.shape_cast %217 : vector<2x64xf32> to vector<1x2x64xf32>
    tpu.vector_store %arg8[%c0_130, %c0_131, %c0_132], %220 {strides = array<i32>} : memref<2x2x64xf32, #tpu.memory_space<vmem>>, vector<1x2x64xf32>,
    %c0_133 = arith.constant 0 : index
    %c0_134 = arith.constant 0 : index
    %c0_135 = arith.constant 0 : index
    %221 = vector.load %arg9[%c0_133, %c0_134, %c0_135] : memref<2x2x64xf32, #tpu.memory_space<vmem>>, vector<1x2x64xf32>
    %222 = vector.shape_cast %221 : vector<1x2x64xf32> to vector<2x64xf32>
    %223 = vector.shape_cast %215 : vector<2x64xf32> to vector<1x2x64xf32>
    tpu.vector_store %arg9[%c0_133, %c0_134, %c0_135], %223 {strides = array<i32>} : memref<2x2x64xf32, #tpu.memory_space<vmem>>, vector<1x2x64xf32>,
    %c0_136 = arith.constant 0 : index
    %c0_137 = arith.constant 0 : index
    %c0_138 = arith.constant 0 : index
    %224 = vector.load %arg2[%c0_136, %c0_137, %c0_138] : memref<1x64x256xf32, #tpu.memory_space<vmem>>, vector<1x64x256xf32>
    %225 = vector.shape_cast %224 : vector<1x64x256xf32> to vector<64x256xf32>
    %cst_139 = arith.constant dense<0.000000e+00> : vector<2x256xf32>
    %226 = tpu.matmul %217, %225, %cst_139 {dimension_numbers = #tpu.dot_dimension_numbers<[1], [0], [0], [1], [0, 0, 1, 1], [], []>} : vector<2x64xf32>, vector<64x256xf32>, vector<2x256xf32> -> vector<2x256xf32>
    %c1_140 = arith.constant 1 : index
    %c0_141 = arith.constant 0 : index
    %c0_142 = arith.constant 0 : index
    %227 = vector.load %arg8[%c1_140, %c0_141, %c0_142] : memref<2x2x64xf32, #tpu.memory_space<vmem>>, vector<1x2x64xf32>
    %228 = vector.shape_cast %227 : vector<1x2x64xf32> to vector<2x64xf32>
    %c1_143 = arith.constant 1 : index
    %c0_144 = arith.constant 0 : index
    %c0_145 = arith.constant 0 : index
    %229 = vector.load %arg9[%c1_143, %c0_144, %c0_145] : memref<2x2x64xf32, #tpu.memory_space<vmem>>, vector<1x2x64xf32>
    %230 = vector.shape_cast %229 : vector<1x2x64xf32> to vector<2x64xf32>
    %c1_146 = arith.constant 1 : index
    %c0_147 = arith.constant 0 : index
    %c0_148 = arith.constant 0 : index
    %231 = vector.load %arg3[%c1_146, %c0_147, %c0_148] : memref<2x64x256xf32, #tpu.memory_space<vmem>>, vector<1x64x256xf32>
    %232 = vector.shape_cast %231 : vector<1x64x256xf32> to vector<64x256xf32>
    %cst_149 = arith.constant dense<0.000000e+00> : vector<2x256xf32>
    %233 = tpu.matmul %228, %232, %cst_149 {dimension_numbers = #tpu.dot_dimension_numbers<[1], [0], [0], [1], [0, 0, 1, 1], [], []>} : vector<2x64xf32>, vector<64x256xf32>, vector<2x256xf32> -> vector<2x256xf32>
    %234 = arith.addf %226, %233 : vector<2x256xf32>
    %c1_150 = arith.constant 1 : index
    %c0_151 = arith.constant 0 : index
    %c0_152 = arith.constant 0 : index
    %235 = vector.load %arg4[%c1_150, %c0_151, %c0_152] : memref<2x1x256xf32, #tpu.memory_space<vmem>>, vector<1x1x256xf32>
    %236 = vector.shape_cast %235 : vector<1x1x256xf32> to vector<1x256xf32>
    %237 = vector.broadcast %236 : vector<1x256xf32> to vector<2x256xf32>
    %238 = arith.addf %234, %237 : vector<2x256xf32>
    %239 = vector.extract_strided_slice %238 {offsets = [0, 0], sizes = [2, 128], strides = [1, 1]} : vector<2x256xf32> to vector<2x128xf32>
    %cst_153 = arith.constant 5.000000e-01 : f32
    %240 = vector.broadcast %cst_153 : f32 to vector<2x128xf32>
    %241 = arith.mulf %240, %239 : vector<2x128xf32>
    %242 = math.tanh %241 : vector<2x128xf32>
    %cst_154 = arith.constant 5.000000e-01 : f32
    %243 = vector.broadcast %cst_154 : f32 to vector<2x128xf32>
    %244 = arith.mulf %243, %242 : vector<2x128xf32>
    %cst_155 = arith.constant 5.000000e-01 : f32
    %245 = vector.broadcast %cst_155 : f32 to vector<2x128xf32>
    %246 = arith.addf %244, %245 : vector<2x128xf32>
    %247 = vector.extract_strided_slice %246 {offsets = [0, 0], sizes = [2, 64], strides = [1, 1]} : vector<2x128xf32> to vector<2x64xf32>
    %248 = vector.extract_strided_slice %246 {offsets = [0, 64], sizes = [2, 64], strides = [1, 1]} : vector<2x128xf32> to vector<2x64xf32>
    %249 = vector.extract_strided_slice %238 {offsets = [0, 128], sizes = [2, 64], strides = [1, 1]} : vector<2x256xf32> to vector<2x64xf32>
    %250 = math.tanh %249 : vector<2x64xf32>
    %251 = vector.extract_strided_slice %238 {offsets = [0, 192], sizes = [2, 64], strides = [1, 1]} : vector<2x256xf32> to vector<2x64xf32>
    %cst_156 = arith.constant 5.000000e-01 : f32
    %252 = vector.broadcast %cst_156 : f32 to vector<2x64xf32>
    %253 = arith.mulf %252, %251 : vector<2x64xf32>
    %254 = math.tanh %253 : vector<2x64xf32>
    %cst_157 = arith.constant 5.000000e-01 : f32
    %255 = vector.broadcast %cst_157 : f32 to vector<2x64xf32>
    %256 = arith.mulf %255, %254 : vector<2x64xf32>
    %cst_158 = arith.constant 5.000000e-01 : f32
    %257 = vector.broadcast %cst_158 : f32 to vector<2x64xf32>
    %258 = arith.addf %256, %257 : vector<2x64xf32>
    %259 = arith.mulf %248, %230 : vector<2x64xf32>
    %260 = arith.mulf %247, %250 : vector<2x64xf32>
    %261 = arith.addf %259, %260 : vector<2x64xf32>
    %262 = math.tanh %261 : vector<2x64xf32>
    %263 = arith.mulf %258, %262 : vector<2x64xf32>
    %c1_159 = arith.constant 1 : index
    %c0_160 = arith.constant 0 : index
    %c0_161 = arith.constant 0 : index
    %264 = vector.load %arg8[%c1_159, %c0_160, %c0_161] : memref<2x2x64xf32, #tpu.memory_space<vmem>>, vector<1x2x64xf32>
    %265 = vector.shape_cast %264 : vector<1x2x64xf32> to vector<2x64xf32>
    %266 = vector.shape_cast %263 : vector<2x64xf32> to vector<1x2x64xf32>
    tpu.vector_store %arg8[%c1_159, %c0_160, %c0_161], %266 {strides = array<i32>} : memref<2x2x64xf32, #tpu.memory_space<vmem>>, vector<1x2x64xf32>,
    %c1_162 = arith.constant 1 : index
    %c0_163 = arith.constant 0 : index
    %c0_164 = arith.constant 0 : index
    %267 = vector.load %arg9[%c1_162, %c0_163, %c0_164] : memref<2x2x64xf32, #tpu.memory_space<vmem>>, vector<1x2x64xf32>
    %268 = vector.shape_cast %267 : vector<1x2x64xf32> to vector<2x64xf32>
    %269 = vector.shape_cast %261 : vector<2x64xf32> to vector<1x2x64xf32>
    tpu.vector_store %arg9[%c1_162, %c0_163, %c0_164], %269 {strides = array<i32>} : memref<2x2x64xf32, #tpu.memory_space<vmem>>, vector<1x2x64xf32>,
    %c2_165 = arith.constant 2 : index
    %c0_166 = arith.constant 0 : index
    %c0_167 = arith.constant 0 : index
    %270 = vector.load %arg10[%c2_165, %c0_166, %c0_167] : memref<8x2x64xf32, #tpu.memory_space<vmem>>, vector<1x2x64xf32>
    %271 = vector.shape_cast %270 : vector<1x2x64xf32> to vector<2x64xf32>
    %272 = vector.shape_cast %263 : vector<2x64xf32> to vector<1x2x64xf32>
    tpu.vector_store %arg10[%c2_165, %c0_166, %c0_167], %272 {strides = array<i32>} : memref<8x2x64xf32, #tpu.memory_space<vmem>>, vector<1x2x64xf32>,
    %c3 = arith.constant 3 : index
    %c0_168 = arith.constant 0 : index
    %c0_169 = arith.constant 0 : index
    %273 = vector.load %arg1[%c3, %c0_168, %c0_169] : memref<8x2x256xf32, #tpu.memory_space<vmem>>, vector<1x2x256xf32>
    %274 = vector.shape_cast %273 : vector<1x2x256xf32> to vector<2x256xf32>
    %c0_170 = arith.constant 0 : index
    %c0_171 = arith.constant 0 : index
    %c0_172 = arith.constant 0 : index
    %275 = vector.load %arg8[%c0_170, %c0_171, %c0_172] : memref<2x2x64xf32, #tpu.memory_space<vmem>>, vector<1x2x64xf32>
    %276 = vector.shape_cast %275 : vector<1x2x64xf32> to vector<2x64xf32>
    %c0_173 = arith.constant 0 : index
    %c0_174 = arith.constant 0 : index
    %c0_175 = arith.constant 0 : index
    %277 = vector.load %arg9[%c0_173, %c0_174, %c0_175] : memref<2x2x64xf32, #tpu.memory_space<vmem>>, vector<1x2x64xf32>
    %278 = vector.shape_cast %277 : vector<1x2x64xf32> to vector<2x64xf32>
    %c0_176 = arith.constant 0 : index
    %c0_177 = arith.constant 0 : index
    %c0_178 = arith.constant 0 : index
    %279 = vector.load %arg3[%c0_176, %c0_177, %c0_178] : memref<2x64x256xf32, #tpu.memory_space<vmem>>, vector<1x64x256xf32>
    %280 = vector.shape_cast %279 : vector<1x64x256xf32> to vector<64x256xf32>
    %cst_179 = arith.constant dense<0.000000e+00> : vector<2x256xf32>
    %281 = tpu.matmul %276, %280, %cst_179 {dimension_numbers = #tpu.dot_dimension_numbers<[1], [0], [0], [1], [0, 0, 1, 1], [], []>} : vector<2x64xf32>, vector<64x256xf32>, vector<2x256xf32> -> vector<2x256xf32>
    %282 = arith.addf %274, %281 : vector<2x256xf32>
    %283 = vector.extract_strided_slice %282 {offsets = [0, 0], sizes = [2, 128], strides = [1, 1]} : vector<2x256xf32> to vector<2x128xf32>
    %cst_180 = arith.constant 5.000000e-01 : f32
    %284 = vector.broadcast %cst_180 : f32 to vector<2x128xf32>
    %285 = arith.mulf %284, %283 : vector<2x128xf32>
    %286 = math.tanh %285 : vector<2x128xf32>
    %cst_181 = arith.constant 5.000000e-01 : f32
    %287 = vector.broadcast %cst_181 : f32 to vector<2x128xf32>
    %288 = arith.mulf %287, %286 : vector<2x128xf32>
    %cst_182 = arith.constant 5.000000e-01 : f32
    %289 = vector.broadcast %cst_182 : f32 to vector<2x128xf32>
    %290 = arith.addf %288, %289 : vector<2x128xf32>
    %291 = vector.extract_strided_slice %290 {offsets = [0, 0], sizes = [2, 64], strides = [1, 1]} : vector<2x128xf32> to vector<2x64xf32>
    %292 = vector.extract_strided_slice %290 {offsets = [0, 64], sizes = [2, 64], strides = [1, 1]} : vector<2x128xf32> to vector<2x64xf32>
    %293 = vector.extract_strided_slice %282 {offsets = [0, 128], sizes = [2, 64], strides = [1, 1]} : vector<2x256xf32> to vector<2x64xf32>
    %294 = math.tanh %293 : vector<2x64xf32>
    %295 = vector.extract_strided_slice %282 {offsets = [0, 192], sizes = [2, 64], strides = [1, 1]} : vector<2x256xf32> to vector<2x64xf32>
    %cst_183 = arith.constant 5.000000e-01 : f32
    %296 = vector.broadcast %cst_183 : f32 to vector<2x64xf32>
    %297 = arith.mulf %296, %295 : vector<2x64xf32>
    %298 = math.tanh %297 : vector<2x64xf32>
    %cst_184 = arith.constant 5.000000e-01 : f32
    %299 = vector.broadcast %cst_184 : f32 to vector<2x64xf32>
    %300 = arith.mulf %299, %298 : vector<2x64xf32>
    %cst_185 = arith.constant 5.000000e-01 : f32
    %301 = vector.broadcast %cst_185 : f32 to vector<2x64xf32>
    %302 = arith.addf %300, %301 : vector<2x64xf32>
    %303 = arith.mulf %292, %278 : vector<2x64xf32>
    %304 = arith.mulf %291, %294 : vector<2x64xf32>
    %305 = arith.addf %303, %304 : vector<2x64xf32>
    %306 = math.tanh %305 : vector<2x64xf32>
    %307 = arith.mulf %302, %306 : vector<2x64xf32>
    %c0_186 = arith.constant 0 : index
    %c0_187 = arith.constant 0 : index
    %c0_188 = arith.constant 0 : index
    %308 = vector.load %arg8[%c0_186, %c0_187, %c0_188] : memref<2x2x64xf32, #tpu.memory_space<vmem>>, vector<1x2x64xf32>
    %309 = vector.shape_cast %308 : vector<1x2x64xf32> to vector<2x64xf32>
    %310 = vector.shape_cast %307 : vector<2x64xf32> to vector<1x2x64xf32>
    tpu.vector_store %arg8[%c0_186, %c0_187, %c0_188], %310 {strides = array<i32>} : memref<2x2x64xf32, #tpu.memory_space<vmem>>, vector<1x2x64xf32>,
    %c0_189 = arith.constant 0 : index
    %c0_190 = arith.constant 0 : index
    %c0_191 = arith.constant 0 : index
    %311 = vector.load %arg9[%c0_189, %c0_190, %c0_191] : memref<2x2x64xf32, #tpu.memory_space<vmem>>, vector<1x2x64xf32>
    %312 = vector.shape_cast %311 : vector<1x2x64xf32> to vector<2x64xf32>
    %313 = vector.shape_cast %305 : vector<2x64xf32> to vector<1x2x64xf32>
    tpu.vector_store %arg9[%c0_189, %c0_190, %c0_191], %313 {strides = array<i32>} : memref<2x2x64xf32, #tpu.memory_space<vmem>>, vector<1x2x64xf32>,
    %c0_192 = arith.constant 0 : index
    %c0_193 = arith.constant 0 : index
    %c0_194 = arith.constant 0 : index
    %314 = vector.load %arg2[%c0_192, %c0_193, %c0_194] : memref<1x64x256xf32, #tpu.memory_space<vmem>>, vector<1x64x256xf32>
    %315 = vector.shape_cast %314 : vector<1x64x256xf32> to vector<64x256xf32>
    %cst_195 = arith.constant dense<0.000000e+00> : vector<2x256xf32>
    %316 = tpu.matmul %307, %315, %cst_195 {dimension_numbers = #tpu.dot_dimension_numbers<[1], [0], [0], [1], [0, 0, 1, 1], [], []>} : vector<2x64xf32>, vector<64x256xf32>, vector<2x256xf32> -> vector<2x256xf32>
    %c1_196 = arith.constant 1 : index
    %c0_197 = arith.constant 0 : index
    %c0_198 = arith.constant 0 : index
    %317 = vector.load %arg8[%c1_196, %c0_197, %c0_198] : memref<2x2x64xf32, #tpu.memory_space<vmem>>, vector<1x2x64xf32>
    %318 = vector.shape_cast %317 : vector<1x2x64xf32> to vector<2x64xf32>
    %c1_199 = arith.constant 1 : index
    %c0_200 = arith.constant 0 : index
    %c0_201 = arith.constant 0 : index
    %319 = vector.load %arg9[%c1_199, %c0_200, %c0_201] : memref<2x2x64xf32, #tpu.memory_space<vmem>>, vector<1x2x64xf32>
    %320 = vector.shape_cast %319 : vector<1x2x64xf32> to vector<2x64xf32>
    %c1_202 = arith.constant 1 : index
    %c0_203 = arith.constant 0 : index
    %c0_204 = arith.constant 0 : index
    %321 = vector.load %arg3[%c1_202, %c0_203, %c0_204] : memref<2x64x256xf32, #tpu.memory_space<vmem>>, vector<1x64x256xf32>
    %322 = vector.shape_cast %321 : vector<1x64x256xf32> to vector<64x256xf32>
    %cst_205 = arith.constant dense<0.000000e+00> : vector<2x256xf32>
    %323 = tpu.matmul %318, %322, %cst_205 {dimension_numbers = #tpu.dot_dimension_numbers<[1], [0], [0], [1], [0, 0, 1, 1], [], []>} : vector<2x64xf32>, vector<64x256xf32>, vector<2x256xf32> -> vector<2x256xf32>
    %324 = arith.addf %316, %323 : vector<2x256xf32>
    %c1_206 = arith.constant 1 : index
    %c0_207 = arith.constant 0 : index
    %c0_208 = arith.constant 0 : index
    %325 = vector.load %arg4[%c1_206, %c0_207, %c0_208] : memref<2x1x256xf32, #tpu.memory_space<vmem>>, vector<1x1x256xf32>
    %326 = vector.shape_cast %325 : vector<1x1x256xf32> to vector<1x256xf32>
    %327 = vector.broadcast %326 : vector<1x256xf32> to vector<2x256xf32>
    %328 = arith.addf %324, %327 : vector<2x256xf32>
    %329 = vector.extract_strided_slice %328 {offsets = [0, 0], sizes = [2, 128], strides = [1, 1]} : vector<2x256xf32> to vector<2x128xf32>
    %cst_209 = arith.constant 5.000000e-01 : f32
    %330 = vector.broadcast %cst_209 : f32 to vector<2x128xf32>
    %331 = arith.mulf %330, %329 : vector<2x128xf32>
    %332 = math.tanh %331 : vector<2x128xf32>
    %cst_210 = arith.constant 5.000000e-01 : f32
    %333 = vector.broadcast %cst_210 : f32 to vector<2x128xf32>
    %334 = arith.mulf %333, %332 : vector<2x128xf32>
    %cst_211 = arith.constant 5.000000e-01 : f32
    %335 = vector.broadcast %cst_211 : f32 to vector<2x128xf32>
    %336 = arith.addf %334, %335 : vector<2x128xf32>
    %337 = vector.extract_strided_slice %336 {offsets = [0, 0], sizes = [2, 64], strides = [1, 1]} : vector<2x128xf32> to vector<2x64xf32>
    %338 = vector.extract_strided_slice %336 {offsets = [0, 64], sizes = [2, 64], strides = [1, 1]} : vector<2x128xf32> to vector<2x64xf32>
    %339 = vector.extract_strided_slice %328 {offsets = [0, 128], sizes = [2, 64], strides = [1, 1]} : vector<2x256xf32> to vector<2x64xf32>
    %340 = math.tanh %339 : vector<2x64xf32>
    %341 = vector.extract_strided_slice %328 {offsets = [0, 192], sizes = [2, 64], strides = [1, 1]} : vector<2x256xf32> to vector<2x64xf32>
    %cst_212 = arith.constant 5.000000e-01 : f32
    %342 = vector.broadcast %cst_212 : f32 to vector<2x64xf32>
    %343 = arith.mulf %342, %341 : vector<2x64xf32>
    %344 = math.tanh %343 : vector<2x64xf32>
    %cst_213 = arith.constant 5.000000e-01 : f32
    %345 = vector.broadcast %cst_213 : f32 to vector<2x64xf32>
    %346 = arith.mulf %345, %344 : vector<2x64xf32>
    %cst_214 = arith.constant 5.000000e-01 : f32
    %347 = vector.broadcast %cst_214 : f32 to vector<2x64xf32>
    %348 = arith.addf %346, %347 : vector<2x64xf32>
    %349 = arith.mulf %338, %320 : vector<2x64xf32>
    %350 = arith.mulf %337, %340 : vector<2x64xf32>
    %351 = arith.addf %349, %350 : vector<2x64xf32>
    %352 = math.tanh %351 : vector<2x64xf32>
    %353 = arith.mulf %348, %352 : vector<2x64xf32>
    %c1_215 = arith.constant 1 : index
    %c0_216 = arith.constant 0 : index
    %c0_217 = arith.constant 0 : index
    %354 = vector.load %arg8[%c1_215, %c0_216, %c0_217] : memref<2x2x64xf32, #tpu.memory_space<vmem>>, vector<1x2x64xf32>
    %355 = vector.shape_cast %354 : vector<1x2x64xf32> to vector<2x64xf32>
    %356 = vector.shape_cast %353 : vector<2x64xf32> to vector<1x2x64xf32>
    tpu.vector_store %arg8[%c1_215, %c0_216, %c0_217], %356 {strides = array<i32>} : memref<2x2x64xf32, #tpu.memory_space<vmem>>, vector<1x2x64xf32>,
    %c1_218 = arith.constant 1 : index
    %c0_219 = arith.constant 0 : index
    %c0_220 = arith.constant 0 : index
    %357 = vector.load %arg9[%c1_218, %c0_219, %c0_220] : memref<2x2x64xf32, #tpu.memory_space<vmem>>, vector<1x2x64xf32>
    %358 = vector.shape_cast %357 : vector<1x2x64xf32> to vector<2x64xf32>
    %359 = vector.shape_cast %351 : vector<2x64xf32> to vector<1x2x64xf32>
    tpu.vector_store %arg9[%c1_218, %c0_219, %c0_220], %359 {strides = array<i32>} : memref<2x2x64xf32, #tpu.memory_space<vmem>>, vector<1x2x64xf32>,
    %c3_221 = arith.constant 3 : index
    %c0_222 = arith.constant 0 : index
    %c0_223 = arith.constant 0 : index
    %360 = vector.load %arg10[%c3_221, %c0_222, %c0_223] : memref<8x2x64xf32, #tpu.memory_space<vmem>>, vector<1x2x64xf32>
    %361 = vector.shape_cast %360 : vector<1x2x64xf32> to vector<2x64xf32>
    %362 = vector.shape_cast %353 : vector<2x64xf32> to vector<1x2x64xf32>
    tpu.vector_store %arg10[%c3_221, %c0_222, %c0_223], %362 {strides = array<i32>} : memref<8x2x64xf32, #tpu.memory_space<vmem>>, vector<1x2x64xf32>,
    %c4 = arith.constant 4 : index
    %c0_224 = arith.constant 0 : index
    %c0_225 = arith.constant 0 : index
    %363 = vector.load %arg1[%c4, %c0_224, %c0_225] : memref<8x2x256xf32, #tpu.memory_space<vmem>>, vector<1x2x256xf32>
    %364 = vector.shape_cast %363 : vector<1x2x256xf32> to vector<2x256xf32>
    %c0_226 = arith.constant 0 : index
    %c0_227 = arith.constant 0 : index
    %c0_228 = arith.constant 0 : index
    %365 = vector.load %arg8[%c0_226, %c0_227, %c0_228] : memref<2x2x64xf32, #tpu.memory_space<vmem>>, vector<1x2x64xf32>
    %366 = vector.shape_cast %365 : vector<1x2x64xf32> to vector<2x64xf32>
    %c0_229 = arith.constant 0 : index
    %c0_230 = arith.constant 0 : index
    %c0_231 = arith.constant 0 : index
    %367 = vector.load %arg9[%c0_229, %c0_230, %c0_231] : memref<2x2x64xf32, #tpu.memory_space<vmem>>, vector<1x2x64xf32>
    %368 = vector.shape_cast %367 : vector<1x2x64xf32> to vector<2x64xf32>
    %c0_232 = arith.constant 0 : index
    %c0_233 = arith.constant 0 : index
    %c0_234 = arith.constant 0 : index
    %369 = vector.load %arg3[%c0_232, %c0_233, %c0_234] : memref<2x64x256xf32, #tpu.memory_space<vmem>>, vector<1x64x256xf32>
    %370 = vector.shape_cast %369 : vector<1x64x256xf32> to vector<64x256xf32>
    %cst_235 = arith.constant dense<0.000000e+00> : vector<2x256xf32>
    %371 = tpu.matmul %366, %370, %cst_235 {dimension_numbers = #tpu.dot_dimension_numbers<[1], [0], [0], [1], [0, 0, 1, 1], [], []>} : vector<2x64xf32>, vector<64x256xf32>, vector<2x256xf32> -> vector<2x256xf32>
    %372 = arith.addf %364, %371 : vector<2x256xf32>
    %373 = vector.extract_strided_slice %372 {offsets = [0, 0], sizes = [2, 128], strides = [1, 1]} : vector<2x256xf32> to vector<2x128xf32>
    %cst_236 = arith.constant 5.000000e-01 : f32
    %374 = vector.broadcast %cst_236 : f32 to vector<2x128xf32>
    %375 = arith.mulf %374, %373 : vector<2x128xf32>
    %376 = math.tanh %375 : vector<2x128xf32>
    %cst_237 = arith.constant 5.000000e-01 : f32
    %377 = vector.broadcast %cst_237 : f32 to vector<2x128xf32>
    %378 = arith.mulf %377, %376 : vector<2x128xf32>
    %cst_238 = arith.constant 5.000000e-01 : f32
    %379 = vector.broadcast %cst_238 : f32 to vector<2x128xf32>
    %380 = arith.addf %378, %379 : vector<2x128xf32>
    %381 = vector.extract_strided_slice %380 {offsets = [0, 0], sizes = [2, 64], strides = [1, 1]} : vector<2x128xf32> to vector<2x64xf32>
    %382 = vector.extract_strided_slice %380 {offsets = [0, 64], sizes = [2, 64], strides = [1, 1]} : vector<2x128xf32> to vector<2x64xf32>
    %383 = vector.extract_strided_slice %372 {offsets = [0, 128], sizes = [2, 64], strides = [1, 1]} : vector<2x256xf32> to vector<2x64xf32>
    %384 = math.tanh %383 : vector<2x64xf32>
    %385 = vector.extract_strided_slice %372 {offsets = [0, 192], sizes = [2, 64], strides = [1, 1]} : vector<2x256xf32> to vector<2x64xf32>
    %cst_239 = arith.constant 5.000000e-01 : f32
    %386 = vector.broadcast %cst_239 : f32 to vector<2x64xf32>
    %387 = arith.mulf %386, %385 : vector<2x64xf32>
    %388 = math.tanh %387 : vector<2x64xf32>
    %cst_240 = arith.constant 5.000000e-01 : f32
    %389 = vector.broadcast %cst_240 : f32 to vector<2x64xf32>
    %390 = arith.mulf %389, %388 : vector<2x64xf32>
    %cst_241 = arith.constant 5.000000e-01 : f32
    %391 = vector.broadcast %cst_241 : f32 to vector<2x64xf32>
    %392 = arith.addf %390, %391 : vector<2x64xf32>
    %393 = arith.mulf %382, %368 : vector<2x64xf32>
    %394 = arith.mulf %381, %384 : vector<2x64xf32>
    %395 = arith.addf %393, %394 : vector<2x64xf32>
    %396 = math.tanh %395 : vector<2x64xf32>
    %397 = arith.mulf %392, %396 : vector<2x64xf32>
    %c0_242 = arith.constant 0 : index
    %c0_243 = arith.constant 0 : index
    %c0_244 = arith.constant 0 : index
    %398 = vector.load %arg8[%c0_242, %c0_243, %c0_244] : memref<2x2x64xf32, #tpu.memory_space<vmem>>, vector<1x2x64xf32>
    %399 = vector.shape_cast %398 : vector<1x2x64xf32> to vector<2x64xf32>
    %400 = vector.shape_cast %397 : vector<2x64xf32> to vector<1x2x64xf32>
    tpu.vector_store %arg8[%c0_242, %c0_243, %c0_244], %400 {strides = array<i32>} : memref<2x2x64xf32, #tpu.memory_space<vmem>>, vector<1x2x64xf32>,
    %c0_245 = arith.constant 0 : index
    %c0_246 = arith.constant 0 : index
    %c0_247 = arith.constant 0 : index
    %401 = vector.load %arg9[%c0_245, %c0_246, %c0_247] : memref<2x2x64xf32, #tpu.memory_space<vmem>>, vector<1x2x64xf32>
    %402 = vector.shape_cast %401 : vector<1x2x64xf32> to vector<2x64xf32>
    %403 = vector.shape_cast %395 : vector<2x64xf32> to vector<1x2x64xf32>
    tpu.vector_store %arg9[%c0_245, %c0_246, %c0_247], %403 {strides = array<i32>} : memref<2x2x64xf32, #tpu.memory_space<vmem>>, vector<1x2x64xf32>,
    %c0_248 = arith.constant 0 : index
    %c0_249 = arith.constant 0 : index
    %c0_250 = arith.constant 0 : index
    %404 = vector.load %arg2[%c0_248, %c0_249, %c0_250] : memref<1x64x256xf32, #tpu.memory_space<vmem>>, vector<1x64x256xf32>
    %405 = vector.shape_cast %404 : vector<1x64x256xf32> to vector<64x256xf32>
    %cst_251 = arith.constant dense<0.000000e+00> : vector<2x256xf32>
    %406 = tpu.matmul %397, %405, %cst_251 {dimension_numbers = #tpu.dot_dimension_numbers<[1], [0], [0], [1], [0, 0, 1, 1], [], []>} : vector<2x64xf32>, vector<64x256xf32>, vector<2x256xf32> -> vector<2x256xf32>
    %c1_252 = arith.constant 1 : index
    %c0_253 = arith.constant 0 : index
    %c0_254 = arith.constant 0 : index
    %407 = vector.load %arg8[%c1_252, %c0_253, %c0_254] : memref<2x2x64xf32, #tpu.memory_space<vmem>>, vector<1x2x64xf32>
    %408 = vector.shape_cast %407 : vector<1x2x64xf32> to vector<2x64xf32>
    %c1_255 = arith.constant 1 : index
    %c0_256 = arith.constant 0 : index
    %c0_257 = arith.constant 0 : index
    %409 = vector.load %arg9[%c1_255, %c0_256, %c0_257] : memref<2x2x64xf32, #tpu.memory_space<vmem>>, vector<1x2x64xf32>
    %410 = vector.shape_cast %409 : vector<1x2x64xf32> to vector<2x64xf32>
    %c1_258 = arith.constant 1 : index
    %c0_259 = arith.constant 0 : index
    %c0_260 = arith.constant 0 : index
    %411 = vector.load %arg3[%c1_258, %c0_259, %c0_260] : memref<2x64x256xf32, #tpu.memory_space<vmem>>, vector<1x64x256xf32>
    %412 = vector.shape_cast %411 : vector<1x64x256xf32> to vector<64x256xf32>
    %cst_261 = arith.constant dense<0.000000e+00> : vector<2x256xf32>
    %413 = tpu.matmul %408, %412, %cst_261 {dimension_numbers = #tpu.dot_dimension_numbers<[1], [0], [0], [1], [0, 0, 1, 1], [], []>} : vector<2x64xf32>, vector<64x256xf32>, vector<2x256xf32> -> vector<2x256xf32>
    %414 = arith.addf %406, %413 : vector<2x256xf32>
    %c1_262 = arith.constant 1 : index
    %c0_263 = arith.constant 0 : index
    %c0_264 = arith.constant 0 : index
    %415 = vector.load %arg4[%c1_262, %c0_263, %c0_264] : memref<2x1x256xf32, #tpu.memory_space<vmem>>, vector<1x1x256xf32>
    %416 = vector.shape_cast %415 : vector<1x1x256xf32> to vector<1x256xf32>
    %417 = vector.broadcast %416 : vector<1x256xf32> to vector<2x256xf32>
    %418 = arith.addf %414, %417 : vector<2x256xf32>
    %419 = vector.extract_strided_slice %418 {offsets = [0, 0], sizes = [2, 128], strides = [1, 1]} : vector<2x256xf32> to vector<2x128xf32>
    %cst_265 = arith.constant 5.000000e-01 : f32
    %420 = vector.broadcast %cst_265 : f32 to vector<2x128xf32>
    %421 = arith.mulf %420, %419 : vector<2x128xf32>
    %422 = math.tanh %421 : vector<2x128xf32>
    %cst_266 = arith.constant 5.000000e-01 : f32
    %423 = vector.broadcast %cst_266 : f32 to vector<2x128xf32>
    %424 = arith.mulf %423, %422 : vector<2x128xf32>
    %cst_267 = arith.constant 5.000000e-01 : f32
    %425 = vector.broadcast %cst_267 : f32 to vector<2x128xf32>
    %426 = arith.addf %424, %425 : vector<2x128xf32>
    %427 = vector.extract_strided_slice %426 {offsets = [0, 0], sizes = [2, 64], strides = [1, 1]} : vector<2x128xf32> to vector<2x64xf32>
    %428 = vector.extract_strided_slice %426 {offsets = [0, 64], sizes = [2, 64], strides = [1, 1]} : vector<2x128xf32> to vector<2x64xf32>
    %429 = vector.extract_strided_slice %418 {offsets = [0, 128], sizes = [2, 64], strides = [1, 1]} : vector<2x256xf32> to vector<2x64xf32>
    %430 = math.tanh %429 : vector<2x64xf32>
    %431 = vector.extract_strided_slice %418 {offsets = [0, 192], sizes = [2, 64], strides = [1, 1]} : vector<2x256xf32> to vector<2x64xf32>
    %cst_268 = arith.constant 5.000000e-01 : f32
    %432 = vector.broadcast %cst_268 : f32 to vector<2x64xf32>
    %433 = arith.mulf %432, %431 : vector<2x64xf32>
    %434 = math.tanh %433 : vector<2x64xf32>
    %cst_269 = arith.constant 5.000000e-01 : f32
    %435 = vector.broadcast %cst_269 : f32 to vector<2x64xf32>
    %436 = arith.mulf %435, %434 : vector<2x64xf32>
    %cst_270 = arith.constant 5.000000e-01 : f32
    %437 = vector.broadcast %cst_270 : f32 to vector<2x64xf32>
    %438 = arith.addf %436, %437 : vector<2x64xf32>
    %439 = arith.mulf %428, %410 : vector<2x64xf32>
    %440 = arith.mulf %427, %430 : vector<2x64xf32>
    %441 = arith.addf %439, %440 : vector<2x64xf32>
    %442 = math.tanh %441 : vector<2x64xf32>
    %443 = arith.mulf %438, %442 : vector<2x64xf32>
    %c1_271 = arith.constant 1 : index
    %c0_272 = arith.constant 0 : index
    %c0_273 = arith.constant 0 : index
    %444 = vector.load %arg8[%c1_271, %c0_272, %c0_273] : memref<2x2x64xf32, #tpu.memory_space<vmem>>, vector<1x2x64xf32>
    %445 = vector.shape_cast %444 : vector<1x2x64xf32> to vector<2x64xf32>
    %446 = vector.shape_cast %443 : vector<2x64xf32> to vector<1x2x64xf32>
    tpu.vector_store %arg8[%c1_271, %c0_272, %c0_273], %446 {strides = array<i32>} : memref<2x2x64xf32, #tpu.memory_space<vmem>>, vector<1x2x64xf32>,
    %c1_274 = arith.constant 1 : index
    %c0_275 = arith.constant 0 : index
    %c0_276 = arith.constant 0 : index
    %447 = vector.load %arg9[%c1_274, %c0_275, %c0_276] : memref<2x2x64xf32, #tpu.memory_space<vmem>>, vector<1x2x64xf32>
    %448 = vector.shape_cast %447 : vector<1x2x64xf32> to vector<2x64xf32>
    %449 = vector.shape_cast %441 : vector<2x64xf32> to vector<1x2x64xf32>
    tpu.vector_store %arg9[%c1_274, %c0_275, %c0_276], %449 {strides = array<i32>} : memref<2x2x64xf32, #tpu.memory_space<vmem>>, vector<1x2x64xf32>,
    %c4_277 = arith.constant 4 : index
    %c0_278 = arith.constant 0 : index
    %c0_279 = arith.constant 0 : index
    %450 = vector.load %arg10[%c4_277, %c0_278, %c0_279] : memref<8x2x64xf32, #tpu.memory_space<vmem>>, vector<1x2x64xf32>
    %451 = vector.shape_cast %450 : vector<1x2x64xf32> to vector<2x64xf32>
    %452 = vector.shape_cast %443 : vector<2x64xf32> to vector<1x2x64xf32>
    tpu.vector_store %arg10[%c4_277, %c0_278, %c0_279], %452 {strides = array<i32>} : memref<8x2x64xf32, #tpu.memory_space<vmem>>, vector<1x2x64xf32>,
    %c5 = arith.constant 5 : index
    %c0_280 = arith.constant 0 : index
    %c0_281 = arith.constant 0 : index
    %453 = vector.load %arg1[%c5, %c0_280, %c0_281] : memref<8x2x256xf32, #tpu.memory_space<vmem>>, vector<1x2x256xf32>
    %454 = vector.shape_cast %453 : vector<1x2x256xf32> to vector<2x256xf32>
    %c0_282 = arith.constant 0 : index
    %c0_283 = arith.constant 0 : index
    %c0_284 = arith.constant 0 : index
    %455 = vector.load %arg8[%c0_282, %c0_283, %c0_284] : memref<2x2x64xf32, #tpu.memory_space<vmem>>, vector<1x2x64xf32>
    %456 = vector.shape_cast %455 : vector<1x2x64xf32> to vector<2x64xf32>
    %c0_285 = arith.constant 0 : index
    %c0_286 = arith.constant 0 : index
    %c0_287 = arith.constant 0 : index
    %457 = vector.load %arg9[%c0_285, %c0_286, %c0_287] : memref<2x2x64xf32, #tpu.memory_space<vmem>>, vector<1x2x64xf32>
    %458 = vector.shape_cast %457 : vector<1x2x64xf32> to vector<2x64xf32>
    %c0_288 = arith.constant 0 : index
    %c0_289 = arith.constant 0 : index
    %c0_290 = arith.constant 0 : index
    %459 = vector.load %arg3[%c0_288, %c0_289, %c0_290] : memref<2x64x256xf32, #tpu.memory_space<vmem>>, vector<1x64x256xf32>
    %460 = vector.shape_cast %459 : vector<1x64x256xf32> to vector<64x256xf32>
    %cst_291 = arith.constant dense<0.000000e+00> : vector<2x256xf32>
    %461 = tpu.matmul %456, %460, %cst_291 {dimension_numbers = #tpu.dot_dimension_numbers<[1], [0], [0], [1], [0, 0, 1, 1], [], []>} : vector<2x64xf32>, vector<64x256xf32>, vector<2x256xf32> -> vector<2x256xf32>
    %462 = arith.addf %454, %461 : vector<2x256xf32>
    %463 = vector.extract_strided_slice %462 {offsets = [0, 0], sizes = [2, 128], strides = [1, 1]} : vector<2x256xf32> to vector<2x128xf32>
    %cst_292 = arith.constant 5.000000e-01 : f32
    %464 = vector.broadcast %cst_292 : f32 to vector<2x128xf32>
    %465 = arith.mulf %464, %463 : vector<2x128xf32>
    %466 = math.tanh %465 : vector<2x128xf32>
    %cst_293 = arith.constant 5.000000e-01 : f32
    %467 = vector.broadcast %cst_293 : f32 to vector<2x128xf32>
    %468 = arith.mulf %467, %466 : vector<2x128xf32>
    %cst_294 = arith.constant 5.000000e-01 : f32
    %469 = vector.broadcast %cst_294 : f32 to vector<2x128xf32>
    %470 = arith.addf %468, %469 : vector<2x128xf32>
    %471 = vector.extract_strided_slice %470 {offsets = [0, 0], sizes = [2, 64], strides = [1, 1]} : vector<2x128xf32> to vector<2x64xf32>
    %472 = vector.extract_strided_slice %470 {offsets = [0, 64], sizes = [2, 64], strides = [1, 1]} : vector<2x128xf32> to vector<2x64xf32>
    %473 = vector.extract_strided_slice %462 {offsets = [0, 128], sizes = [2, 64], strides = [1, 1]} : vector<2x256xf32> to vector<2x64xf32>
    %474 = math.tanh %473 : vector<2x64xf32>
    %475 = vector.extract_strided_slice %462 {offsets = [0, 192], sizes = [2, 64], strides = [1, 1]} : vector<2x256xf32> to vector<2x64xf32>
    %cst_295 = arith.constant 5.000000e-01 : f32
    %476 = vector.broadcast %cst_295 : f32 to vector<2x64xf32>
    %477 = arith.mulf %476, %475 : vector<2x64xf32>
    %478 = math.tanh %477 : vector<2x64xf32>
    %cst_296 = arith.constant 5.000000e-01 : f32
    %479 = vector.broadcast %cst_296 : f32 to vector<2x64xf32>
    %480 = arith.mulf %479, %478 : vector<2x64xf32>
    %cst_297 = arith.constant 5.000000e-01 : f32
    %481 = vector.broadcast %cst_297 : f32 to vector<2x64xf32>
    %482 = arith.addf %480, %481 : vector<2x64xf32>
    %483 = arith.mulf %472, %458 : vector<2x64xf32>
    %484 = arith.mulf %471, %474 : vector<2x64xf32>
    %485 = arith.addf %483, %484 : vector<2x64xf32>
    %486 = math.tanh %485 : vector<2x64xf32>
    %487 = arith.mulf %482, %486 : vector<2x64xf32>
    %c0_298 = arith.constant 0 : index
    %c0_299 = arith.constant 0 : index
    %c0_300 = arith.constant 0 : index
    %488 = vector.load %arg8[%c0_298, %c0_299, %c0_300] : memref<2x2x64xf32, #tpu.memory_space<vmem>>, vector<1x2x64xf32>
    %489 = vector.shape_cast %488 : vector<1x2x64xf32> to vector<2x64xf32>
    %490 = vector.shape_cast %487 : vector<2x64xf32> to vector<1x2x64xf32>
    tpu.vector_store %arg8[%c0_298, %c0_299, %c0_300], %490 {strides = array<i32>} : memref<2x2x64xf32, #tpu.memory_space<vmem>>, vector<1x2x64xf32>,
    %c0_301 = arith.constant 0 : index
    %c0_302 = arith.constant 0 : index
    %c0_303 = arith.constant 0 : index
    %491 = vector.load %arg9[%c0_301, %c0_302, %c0_303] : memref<2x2x64xf32, #tpu.memory_space<vmem>>, vector<1x2x64xf32>
    %492 = vector.shape_cast %491 : vector<1x2x64xf32> to vector<2x64xf32>
    %493 = vector.shape_cast %485 : vector<2x64xf32> to vector<1x2x64xf32>
    tpu.vector_store %arg9[%c0_301, %c0_302, %c0_303], %493 {strides = array<i32>} : memref<2x2x64xf32, #tpu.memory_space<vmem>>, vector<1x2x64xf32>,
    %c0_304 = arith.constant 0 : index
    %c0_305 = arith.constant 0 : index
    %c0_306 = arith.constant 0 : index
    %494 = vector.load %arg2[%c0_304, %c0_305, %c0_306] : memref<1x64x256xf32, #tpu.memory_space<vmem>>, vector<1x64x256xf32>
    %495 = vector.shape_cast %494 : vector<1x64x256xf32> to vector<64x256xf32>
    %cst_307 = arith.constant dense<0.000000e+00> : vector<2x256xf32>
    %496 = tpu.matmul %487, %495, %cst_307 {dimension_numbers = #tpu.dot_dimension_numbers<[1], [0], [0], [1], [0, 0, 1, 1], [], []>} : vector<2x64xf32>, vector<64x256xf32>, vector<2x256xf32> -> vector<2x256xf32>
    %c1_308 = arith.constant 1 : index
    %c0_309 = arith.constant 0 : index
    %c0_310 = arith.constant 0 : index
    %497 = vector.load %arg8[%c1_308, %c0_309, %c0_310] : memref<2x2x64xf32, #tpu.memory_space<vmem>>, vector<1x2x64xf32>
    %498 = vector.shape_cast %497 : vector<1x2x64xf32> to vector<2x64xf32>
    %c1_311 = arith.constant 1 : index
    %c0_312 = arith.constant 0 : index
    %c0_313 = arith.constant 0 : index
    %499 = vector.load %arg9[%c1_311, %c0_312, %c0_313] : memref<2x2x64xf32, #tpu.memory_space<vmem>>, vector<1x2x64xf32>
    %500 = vector.shape_cast %499 : vector<1x2x64xf32> to vector<2x64xf32>
    %c1_314 = arith.constant 1 : index
    %c0_315 = arith.constant 0 : index
    %c0_316 = arith.constant 0 : index
    %501 = vector.load %arg3[%c1_314, %c0_315, %c0_316] : memref<2x64x256xf32, #tpu.memory_space<vmem>>, vector<1x64x256xf32>
    %502 = vector.shape_cast %501 : vector<1x64x256xf32> to vector<64x256xf32>
    %cst_317 = arith.constant dense<0.000000e+00> : vector<2x256xf32>
    %503 = tpu.matmul %498, %502, %cst_317 {dimension_numbers = #tpu.dot_dimension_numbers<[1], [0], [0], [1], [0, 0, 1, 1], [], []>} : vector<2x64xf32>, vector<64x256xf32>, vector<2x256xf32> -> vector<2x256xf32>
    %504 = arith.addf %496, %503 : vector<2x256xf32>
    %c1_318 = arith.constant 1 : index
    %c0_319 = arith.constant 0 : index
    %c0_320 = arith.constant 0 : index
    %505 = vector.load %arg4[%c1_318, %c0_319, %c0_320] : memref<2x1x256xf32, #tpu.memory_space<vmem>>, vector<1x1x256xf32>
    %506 = vector.shape_cast %505 : vector<1x1x256xf32> to vector<1x256xf32>
    %507 = vector.broadcast %506 : vector<1x256xf32> to vector<2x256xf32>
    %508 = arith.addf %504, %507 : vector<2x256xf32>
    %509 = vector.extract_strided_slice %508 {offsets = [0, 0], sizes = [2, 128], strides = [1, 1]} : vector<2x256xf32> to vector<2x128xf32>
    %cst_321 = arith.constant 5.000000e-01 : f32
    %510 = vector.broadcast %cst_321 : f32 to vector<2x128xf32>
    %511 = arith.mulf %510, %509 : vector<2x128xf32>
    %512 = math.tanh %511 : vector<2x128xf32>
    %cst_322 = arith.constant 5.000000e-01 : f32
    %513 = vector.broadcast %cst_322 : f32 to vector<2x128xf32>
    %514 = arith.mulf %513, %512 : vector<2x128xf32>
    %cst_323 = arith.constant 5.000000e-01 : f32
    %515 = vector.broadcast %cst_323 : f32 to vector<2x128xf32>
    %516 = arith.addf %514, %515 : vector<2x128xf32>
    %517 = vector.extract_strided_slice %516 {offsets = [0, 0], sizes = [2, 64], strides = [1, 1]} : vector<2x128xf32> to vector<2x64xf32>
    %518 = vector.extract_strided_slice %516 {offsets = [0, 64], sizes = [2, 64], strides = [1, 1]} : vector<2x128xf32> to vector<2x64xf32>
    %519 = vector.extract_strided_slice %508 {offsets = [0, 128], sizes = [2, 64], strides = [1, 1]} : vector<2x256xf32> to vector<2x64xf32>
    %520 = math.tanh %519 : vector<2x64xf32>
    %521 = vector.extract_strided_slice %508 {offsets = [0, 192], sizes = [2, 64], strides = [1, 1]} : vector<2x256xf32> to vector<2x64xf32>
    %cst_324 = arith.constant 5.000000e-01 : f32
    %522 = vector.broadcast %cst_324 : f32 to vector<2x64xf32>
    %523 = arith.mulf %522, %521 : vector<2x64xf32>
    %524 = math.tanh %523 : vector<2x64xf32>
    %cst_325 = arith.constant 5.000000e-01 : f32
    %525 = vector.broadcast %cst_325 : f32 to vector<2x64xf32>
    %526 = arith.mulf %525, %524 : vector<2x64xf32>
    %cst_326 = arith.constant 5.000000e-01 : f32
    %527 = vector.broadcast %cst_326 : f32 to vector<2x64xf32>
    %528 = arith.addf %526, %527 : vector<2x64xf32>
    %529 = arith.mulf %518, %500 : vector<2x64xf32>
    %530 = arith.mulf %517, %520 : vector<2x64xf32>
    %531 = arith.addf %529, %530 : vector<2x64xf32>
    %532 = math.tanh %531 : vector<2x64xf32>
    %533 = arith.mulf %528, %532 : vector<2x64xf32>
    %c1_327 = arith.constant 1 : index
    %c0_328 = arith.constant 0 : index
    %c0_329 = arith.constant 0 : index
    %534 = vector.load %arg8[%c1_327, %c0_328, %c0_329] : memref<2x2x64xf32, #tpu.memory_space<vmem>>, vector<1x2x64xf32>
    %535 = vector.shape_cast %534 : vector<1x2x64xf32> to vector<2x64xf32>
    %536 = vector.shape_cast %533 : vector<2x64xf32> to vector<1x2x64xf32>
    tpu.vector_store %arg8[%c1_327, %c0_328, %c0_329], %536 {strides = array<i32>} : memref<2x2x64xf32, #tpu.memory_space<vmem>>, vector<1x2x64xf32>,
    %c1_330 = arith.constant 1 : index
    %c0_331 = arith.constant 0 : index
    %c0_332 = arith.constant 0 : index
    %537 = vector.load %arg9[%c1_330, %c0_331, %c0_332] : memref<2x2x64xf32, #tpu.memory_space<vmem>>, vector<1x2x64xf32>
    %538 = vector.shape_cast %537 : vector<1x2x64xf32> to vector<2x64xf32>
    %539 = vector.shape_cast %531 : vector<2x64xf32> to vector<1x2x64xf32>
    tpu.vector_store %arg9[%c1_330, %c0_331, %c0_332], %539 {strides = array<i32>} : memref<2x2x64xf32, #tpu.memory_space<vmem>>, vector<1x2x64xf32>,
    %c5_333 = arith.constant 5 : index
    %c0_334 = arith.constant 0 : index
    %c0_335 = arith.constant 0 : index
    %540 = vector.load %arg10[%c5_333, %c0_334, %c0_335] : memref<8x2x64xf32, #tpu.memory_space<vmem>>, vector<1x2x64xf32>
    %541 = vector.shape_cast %540 : vector<1x2x64xf32> to vector<2x64xf32>
    %542 = vector.shape_cast %533 : vector<2x64xf32> to vector<1x2x64xf32>
    tpu.vector_store %arg10[%c5_333, %c0_334, %c0_335], %542 {strides = array<i32>} : memref<8x2x64xf32, #tpu.memory_space<vmem>>, vector<1x2x64xf32>,
    %c6 = arith.constant 6 : index
    %c0_336 = arith.constant 0 : index
    %c0_337 = arith.constant 0 : index
    %543 = vector.load %arg1[%c6, %c0_336, %c0_337] : memref<8x2x256xf32, #tpu.memory_space<vmem>>, vector<1x2x256xf32>
    %544 = vector.shape_cast %543 : vector<1x2x256xf32> to vector<2x256xf32>
    %c0_338 = arith.constant 0 : index
    %c0_339 = arith.constant 0 : index
    %c0_340 = arith.constant 0 : index
    %545 = vector.load %arg8[%c0_338, %c0_339, %c0_340] : memref<2x2x64xf32, #tpu.memory_space<vmem>>, vector<1x2x64xf32>
    %546 = vector.shape_cast %545 : vector<1x2x64xf32> to vector<2x64xf32>
    %c0_341 = arith.constant 0 : index
    %c0_342 = arith.constant 0 : index
    %c0_343 = arith.constant 0 : index
    %547 = vector.load %arg9[%c0_341, %c0_342, %c0_343] : memref<2x2x64xf32, #tpu.memory_space<vmem>>, vector<1x2x64xf32>
    %548 = vector.shape_cast %547 : vector<1x2x64xf32> to vector<2x64xf32>
    %c0_344 = arith.constant 0 : index
    %c0_345 = arith.constant 0 : index
    %c0_346 = arith.constant 0 : index
    %549 = vector.load %arg3[%c0_344, %c0_345, %c0_346] : memref<2x64x256xf32, #tpu.memory_space<vmem>>, vector<1x64x256xf32>
    %550 = vector.shape_cast %549 : vector<1x64x256xf32> to vector<64x256xf32>
    %cst_347 = arith.constant dense<0.000000e+00> : vector<2x256xf32>
    %551 = tpu.matmul %546, %550, %cst_347 {dimension_numbers = #tpu.dot_dimension_numbers<[1], [0], [0], [1], [0, 0, 1, 1], [], []>} : vector<2x64xf32>, vector<64x256xf32>, vector<2x256xf32> -> vector<2x256xf32>
    %552 = arith.addf %544, %551 : vector<2x256xf32>
    %553 = vector.extract_strided_slice %552 {offsets = [0, 0], sizes = [2, 128], strides = [1, 1]} : vector<2x256xf32> to vector<2x128xf32>
    %cst_348 = arith.constant 5.000000e-01 : f32
    %554 = vector.broadcast %cst_348 : f32 to vector<2x128xf32>
    %555 = arith.mulf %554, %553 : vector<2x128xf32>
    %556 = math.tanh %555 : vector<2x128xf32>
    %cst_349 = arith.constant 5.000000e-01 : f32
    %557 = vector.broadcast %cst_349 : f32 to vector<2x128xf32>
    %558 = arith.mulf %557, %556 : vector<2x128xf32>
    %cst_350 = arith.constant 5.000000e-01 : f32
    %559 = vector.broadcast %cst_350 : f32 to vector<2x128xf32>
    %560 = arith.addf %558, %559 : vector<2x128xf32>
    %561 = vector.extract_strided_slice %560 {offsets = [0, 0], sizes = [2, 64], strides = [1, 1]} : vector<2x128xf32> to vector<2x64xf32>
    %562 = vector.extract_strided_slice %560 {offsets = [0, 64], sizes = [2, 64], strides = [1, 1]} : vector<2x128xf32> to vector<2x64xf32>
    %563 = vector.extract_strided_slice %552 {offsets = [0, 128], sizes = [2, 64], strides = [1, 1]} : vector<2x256xf32> to vector<2x64xf32>
    %564 = math.tanh %563 : vector<2x64xf32>
    %565 = vector.extract_strided_slice %552 {offsets = [0, 192], sizes = [2, 64], strides = [1, 1]} : vector<2x256xf32> to vector<2x64xf32>
    %cst_351 = arith.constant 5.000000e-01 : f32
    %566 = vector.broadcast %cst_351 : f32 to vector<2x64xf32>
    %567 = arith.mulf %566, %565 : vector<2x64xf32>
    %568 = math.tanh %567 : vector<2x64xf32>
    %cst_352 = arith.constant 5.000000e-01 : f32
    %569 = vector.broadcast %cst_352 : f32 to vector<2x64xf32>
    %570 = arith.mulf %569, %568 : vector<2x64xf32>
    %cst_353 = arith.constant 5.000000e-01 : f32
    %571 = vector.broadcast %cst_353 : f32 to vector<2x64xf32>
    %572 = arith.addf %570, %571 : vector<2x64xf32>
    %573 = arith.mulf %562, %548 : vector<2x64xf32>
    %574 = arith.mulf %561, %564 : vector<2x64xf32>
    %575 = arith.addf %573, %574 : vector<2x64xf32>
    %576 = math.tanh %575 : vector<2x64xf32>
    %577 = arith.mulf %572, %576 : vector<2x64xf32>
    %c0_354 = arith.constant 0 : index
    %c0_355 = arith.constant 0 : index
    %c0_356 = arith.constant 0 : index
    %578 = vector.load %arg8[%c0_354, %c0_355, %c0_356] : memref<2x2x64xf32, #tpu.memory_space<vmem>>, vector<1x2x64xf32>
    %579 = vector.shape_cast %578 : vector<1x2x64xf32> to vector<2x64xf32>
    %580 = vector.shape_cast %577 : vector<2x64xf32> to vector<1x2x64xf32>
    tpu.vector_store %arg8[%c0_354, %c0_355, %c0_356], %580 {strides = array<i32>} : memref<2x2x64xf32, #tpu.memory_space<vmem>>, vector<1x2x64xf32>,
    %c0_357 = arith.constant 0 : index
    %c0_358 = arith.constant 0 : index
    %c0_359 = arith.constant 0 : index
    %581 = vector.load %arg9[%c0_357, %c0_358, %c0_359] : memref<2x2x64xf32, #tpu.memory_space<vmem>>, vector<1x2x64xf32>
    %582 = vector.shape_cast %581 : vector<1x2x64xf32> to vector<2x64xf32>
    %583 = vector.shape_cast %575 : vector<2x64xf32> to vector<1x2x64xf32>
    tpu.vector_store %arg9[%c0_357, %c0_358, %c0_359], %583 {strides = array<i32>} : memref<2x2x64xf32, #tpu.memory_space<vmem>>, vector<1x2x64xf32>,
    %c0_360 = arith.constant 0 : index
    %c0_361 = arith.constant 0 : index
    %c0_362 = arith.constant 0 : index
    %584 = vector.load %arg2[%c0_360, %c0_361, %c0_362] : memref<1x64x256xf32, #tpu.memory_space<vmem>>, vector<1x64x256xf32>
    %585 = vector.shape_cast %584 : vector<1x64x256xf32> to vector<64x256xf32>
    %cst_363 = arith.constant dense<0.000000e+00> : vector<2x256xf32>
    %586 = tpu.matmul %577, %585, %cst_363 {dimension_numbers = #tpu.dot_dimension_numbers<[1], [0], [0], [1], [0, 0, 1, 1], [], []>} : vector<2x64xf32>, vector<64x256xf32>, vector<2x256xf32> -> vector<2x256xf32>
    %c1_364 = arith.constant 1 : index
    %c0_365 = arith.constant 0 : index
    %c0_366 = arith.constant 0 : index
    %587 = vector.load %arg8[%c1_364, %c0_365, %c0_366] : memref<2x2x64xf32, #tpu.memory_space<vmem>>, vector<1x2x64xf32>
    %588 = vector.shape_cast %587 : vector<1x2x64xf32> to vector<2x64xf32>
    %c1_367 = arith.constant 1 : index
    %c0_368 = arith.constant 0 : index
    %c0_369 = arith.constant 0 : index
    %589 = vector.load %arg9[%c1_367, %c0_368, %c0_369] : memref<2x2x64xf32, #tpu.memory_space<vmem>>, vector<1x2x64xf32>
    %590 = vector.shape_cast %589 : vector<1x2x64xf32> to vector<2x64xf32>
    %c1_370 = arith.constant 1 : index
    %c0_371 = arith.constant 0 : index
    %c0_372 = arith.constant 0 : index
    %591 = vector.load %arg3[%c1_370, %c0_371, %c0_372] : memref<2x64x256xf32, #tpu.memory_space<vmem>>, vector<1x64x256xf32>
    %592 = vector.shape_cast %591 : vector<1x64x256xf32> to vector<64x256xf32>
    %cst_373 = arith.constant dense<0.000000e+00> : vector<2x256xf32>
    %593 = tpu.matmul %588, %592, %cst_373 {dimension_numbers = #tpu.dot_dimension_numbers<[1], [0], [0], [1], [0, 0, 1, 1], [], []>} : vector<2x64xf32>, vector<64x256xf32>, vector<2x256xf32> -> vector<2x256xf32>
    %594 = arith.addf %586, %593 : vector<2x256xf32>
    %c1_374 = arith.constant 1 : index
    %c0_375 = arith.constant 0 : index
    %c0_376 = arith.constant 0 : index
    %595 = vector.load %arg4[%c1_374, %c0_375, %c0_376] : memref<2x1x256xf32, #tpu.memory_space<vmem>>, vector<1x1x256xf32>
    %596 = vector.shape_cast %595 : vector<1x1x256xf32> to vector<1x256xf32>
    %597 = vector.broadcast %596 : vector<1x256xf32> to vector<2x256xf32>
    %598 = arith.addf %594, %597 : vector<2x256xf32>
    %599 = vector.extract_strided_slice %598 {offsets = [0, 0], sizes = [2, 128], strides = [1, 1]} : vector<2x256xf32> to vector<2x128xf32>
    %cst_377 = arith.constant 5.000000e-01 : f32
    %600 = vector.broadcast %cst_377 : f32 to vector<2x128xf32>
    %601 = arith.mulf %600, %599 : vector<2x128xf32>
    %602 = math.tanh %601 : vector<2x128xf32>
    %cst_378 = arith.constant 5.000000e-01 : f32
    %603 = vector.broadcast %cst_378 : f32 to vector<2x128xf32>
    %604 = arith.mulf %603, %602 : vector<2x128xf32>
    %cst_379 = arith.constant 5.000000e-01 : f32
    %605 = vector.broadcast %cst_379 : f32 to vector<2x128xf32>
    %606 = arith.addf %604, %605 : vector<2x128xf32>
    %607 = vector.extract_strided_slice %606 {offsets = [0, 0], sizes = [2, 64], strides = [1, 1]} : vector<2x128xf32> to vector<2x64xf32>
    %608 = vector.extract_strided_slice %606 {offsets = [0, 64], sizes = [2, 64], strides = [1, 1]} : vector<2x128xf32> to vector<2x64xf32>
    %609 = vector.extract_strided_slice %598 {offsets = [0, 128], sizes = [2, 64], strides = [1, 1]} : vector<2x256xf32> to vector<2x64xf32>
    %610 = math.tanh %609 : vector<2x64xf32>
    %611 = vector.extract_strided_slice %598 {offsets = [0, 192], sizes = [2, 64], strides = [1, 1]} : vector<2x256xf32> to vector<2x64xf32>
    %cst_380 = arith.constant 5.000000e-01 : f32
    %612 = vector.broadcast %cst_380 : f32 to vector<2x64xf32>
    %613 = arith.mulf %612, %611 : vector<2x64xf32>
    %614 = math.tanh %613 : vector<2x64xf32>
    %cst_381 = arith.constant 5.000000e-01 : f32
    %615 = vector.broadcast %cst_381 : f32 to vector<2x64xf32>
    %616 = arith.mulf %615, %614 : vector<2x64xf32>
    %cst_382 = arith.constant 5.000000e-01 : f32
    %617 = vector.broadcast %cst_382 : f32 to vector<2x64xf32>
    %618 = arith.addf %616, %617 : vector<2x64xf32>
    %619 = arith.mulf %608, %590 : vector<2x64xf32>
    %620 = arith.mulf %607, %610 : vector<2x64xf32>
    %621 = arith.addf %619, %620 : vector<2x64xf32>
    %622 = math.tanh %621 : vector<2x64xf32>
    %623 = arith.mulf %618, %622 : vector<2x64xf32>
    %c1_383 = arith.constant 1 : index
    %c0_384 = arith.constant 0 : index
    %c0_385 = arith.constant 0 : index
    %624 = vector.load %arg8[%c1_383, %c0_384, %c0_385] : memref<2x2x64xf32, #tpu.memory_space<vmem>>, vector<1x2x64xf32>
    %625 = vector.shape_cast %624 : vector<1x2x64xf32> to vector<2x64xf32>
    %626 = vector.shape_cast %623 : vector<2x64xf32> to vector<1x2x64xf32>
    tpu.vector_store %arg8[%c1_383, %c0_384, %c0_385], %626 {strides = array<i32>} : memref<2x2x64xf32, #tpu.memory_space<vmem>>, vector<1x2x64xf32>,
    %c1_386 = arith.constant 1 : index
    %c0_387 = arith.constant 0 : index
    %c0_388 = arith.constant 0 : index
    %627 = vector.load %arg9[%c1_386, %c0_387, %c0_388] : memref<2x2x64xf32, #tpu.memory_space<vmem>>, vector<1x2x64xf32>
    %628 = vector.shape_cast %627 : vector<1x2x64xf32> to vector<2x64xf32>
    %629 = vector.shape_cast %621 : vector<2x64xf32> to vector<1x2x64xf32>
    tpu.vector_store %arg9[%c1_386, %c0_387, %c0_388], %629 {strides = array<i32>} : memref<2x2x64xf32, #tpu.memory_space<vmem>>, vector<1x2x64xf32>,
    %c6_389 = arith.constant 6 : index
    %c0_390 = arith.constant 0 : index
    %c0_391 = arith.constant 0 : index
    %630 = vector.load %arg10[%c6_389, %c0_390, %c0_391] : memref<8x2x64xf32, #tpu.memory_space<vmem>>, vector<1x2x64xf32>
    %631 = vector.shape_cast %630 : vector<1x2x64xf32> to vector<2x64xf32>
    %632 = vector.shape_cast %623 : vector<2x64xf32> to vector<1x2x64xf32>
    tpu.vector_store %arg10[%c6_389, %c0_390, %c0_391], %632 {strides = array<i32>} : memref<8x2x64xf32, #tpu.memory_space<vmem>>, vector<1x2x64xf32>,
    %c7 = arith.constant 7 : index
    %c0_392 = arith.constant 0 : index
    %c0_393 = arith.constant 0 : index
    %633 = vector.load %arg1[%c7, %c0_392, %c0_393] : memref<8x2x256xf32, #tpu.memory_space<vmem>>, vector<1x2x256xf32>
    %634 = vector.shape_cast %633 : vector<1x2x256xf32> to vector<2x256xf32>
    %c0_394 = arith.constant 0 : index
    %c0_395 = arith.constant 0 : index
    %c0_396 = arith.constant 0 : index
    %635 = vector.load %arg8[%c0_394, %c0_395, %c0_396] : memref<2x2x64xf32, #tpu.memory_space<vmem>>, vector<1x2x64xf32>
    %636 = vector.shape_cast %635 : vector<1x2x64xf32> to vector<2x64xf32>
    %c0_397 = arith.constant 0 : index
    %c0_398 = arith.constant 0 : index
    %c0_399 = arith.constant 0 : index
    %637 = vector.load %arg9[%c0_397, %c0_398, %c0_399] : memref<2x2x64xf32, #tpu.memory_space<vmem>>, vector<1x2x64xf32>
    %638 = vector.shape_cast %637 : vector<1x2x64xf32> to vector<2x64xf32>
    %c0_400 = arith.constant 0 : index
    %c0_401 = arith.constant 0 : index
    %c0_402 = arith.constant 0 : index
    %639 = vector.load %arg3[%c0_400, %c0_401, %c0_402] : memref<2x64x256xf32, #tpu.memory_space<vmem>>, vector<1x64x256xf32>
    %640 = vector.shape_cast %639 : vector<1x64x256xf32> to vector<64x256xf32>
    %cst_403 = arith.constant dense<0.000000e+00> : vector<2x256xf32>
    %641 = tpu.matmul %636, %640, %cst_403 {dimension_numbers = #tpu.dot_dimension_numbers<[1], [0], [0], [1], [0, 0, 1, 1], [], []>} : vector<2x64xf32>, vector<64x256xf32>, vector<2x256xf32> -> vector<2x256xf32>
    %642 = arith.addf %634, %641 : vector<2x256xf32>
    %643 = vector.extract_strided_slice %642 {offsets = [0, 0], sizes = [2, 128], strides = [1, 1]} : vector<2x256xf32> to vector<2x128xf32>
    %cst_404 = arith.constant 5.000000e-01 : f32
    %644 = vector.broadcast %cst_404 : f32 to vector<2x128xf32>
    %645 = arith.mulf %644, %643 : vector<2x128xf32>
    %646 = math.tanh %645 : vector<2x128xf32>
    %cst_405 = arith.constant 5.000000e-01 : f32
    %647 = vector.broadcast %cst_405 : f32 to vector<2x128xf32>
    %648 = arith.mulf %647, %646 : vector<2x128xf32>
    %cst_406 = arith.constant 5.000000e-01 : f32
    %649 = vector.broadcast %cst_406 : f32 to vector<2x128xf32>
    %650 = arith.addf %648, %649 : vector<2x128xf32>
    %651 = vector.extract_strided_slice %650 {offsets = [0, 0], sizes = [2, 64], strides = [1, 1]} : vector<2x128xf32> to vector<2x64xf32>
    %652 = vector.extract_strided_slice %650 {offsets = [0, 64], sizes = [2, 64], strides = [1, 1]} : vector<2x128xf32> to vector<2x64xf32>
    %653 = vector.extract_strided_slice %642 {offsets = [0, 128], sizes = [2, 64], strides = [1, 1]} : vector<2x256xf32> to vector<2x64xf32>
    %654 = math.tanh %653 : vector<2x64xf32>
    %655 = vector.extract_strided_slice %642 {offsets = [0, 192], sizes = [2, 64], strides = [1, 1]} : vector<2x256xf32> to vector<2x64xf32>
    %cst_407 = arith.constant 5.000000e-01 : f32
    %656 = vector.broadcast %cst_407 : f32 to vector<2x64xf32>
    %657 = arith.mulf %656, %655 : vector<2x64xf32>
    %658 = math.tanh %657 : vector<2x64xf32>
    %cst_408 = arith.constant 5.000000e-01 : f32
    %659 = vector.broadcast %cst_408 : f32 to vector<2x64xf32>
    %660 = arith.mulf %659, %658 : vector<2x64xf32>
    %cst_409 = arith.constant 5.000000e-01 : f32
    %661 = vector.broadcast %cst_409 : f32 to vector<2x64xf32>
    %662 = arith.addf %660, %661 : vector<2x64xf32>
    %663 = arith.mulf %652, %638 : vector<2x64xf32>
    %664 = arith.mulf %651, %654 : vector<2x64xf32>
    %665 = arith.addf %663, %664 : vector<2x64xf32>
    %666 = math.tanh %665 : vector<2x64xf32>
    %667 = arith.mulf %662, %666 : vector<2x64xf32>
    %c0_410 = arith.constant 0 : index
    %c0_411 = arith.constant 0 : index
    %c0_412 = arith.constant 0 : index
    %668 = vector.load %arg8[%c0_410, %c0_411, %c0_412] : memref<2x2x64xf32, #tpu.memory_space<vmem>>, vector<1x2x64xf32>
    %669 = vector.shape_cast %668 : vector<1x2x64xf32> to vector<2x64xf32>
    %670 = vector.shape_cast %667 : vector<2x64xf32> to vector<1x2x64xf32>
    tpu.vector_store %arg8[%c0_410, %c0_411, %c0_412], %670 {strides = array<i32>} : memref<2x2x64xf32, #tpu.memory_space<vmem>>, vector<1x2x64xf32>,
    %c0_413 = arith.constant 0 : index
    %c0_414 = arith.constant 0 : index
    %c0_415 = arith.constant 0 : index
    %671 = vector.load %arg9[%c0_413, %c0_414, %c0_415] : memref<2x2x64xf32, #tpu.memory_space<vmem>>, vector<1x2x64xf32>
    %672 = vector.shape_cast %671 : vector<1x2x64xf32> to vector<2x64xf32>
    %673 = vector.shape_cast %665 : vector<2x64xf32> to vector<1x2x64xf32>
    tpu.vector_store %arg9[%c0_413, %c0_414, %c0_415], %673 {strides = array<i32>} : memref<2x2x64xf32, #tpu.memory_space<vmem>>, vector<1x2x64xf32>,
    %c0_416 = arith.constant 0 : index
    %c0_417 = arith.constant 0 : index
    %c0_418 = arith.constant 0 : index
    %674 = vector.load %arg2[%c0_416, %c0_417, %c0_418] : memref<1x64x256xf32, #tpu.memory_space<vmem>>, vector<1x64x256xf32>
    %675 = vector.shape_cast %674 : vector<1x64x256xf32> to vector<64x256xf32>
    %cst_419 = arith.constant dense<0.000000e+00> : vector<2x256xf32>
    %676 = tpu.matmul %667, %675, %cst_419 {dimension_numbers = #tpu.dot_dimension_numbers<[1], [0], [0], [1], [0, 0, 1, 1], [], []>} : vector<2x64xf32>, vector<64x256xf32>, vector<2x256xf32> -> vector<2x256xf32>
    %c1_420 = arith.constant 1 : index
    %c0_421 = arith.constant 0 : index
    %c0_422 = arith.constant 0 : index
    %677 = vector.load %arg8[%c1_420, %c0_421, %c0_422] : memref<2x2x64xf32, #tpu.memory_space<vmem>>, vector<1x2x64xf32>
    %678 = vector.shape_cast %677 : vector<1x2x64xf32> to vector<2x64xf32>
    %c1_423 = arith.constant 1 : index
    %c0_424 = arith.constant 0 : index
    %c0_425 = arith.constant 0 : index
    %679 = vector.load %arg9[%c1_423, %c0_424, %c0_425] : memref<2x2x64xf32, #tpu.memory_space<vmem>>, vector<1x2x64xf32>
    %680 = vector.shape_cast %679 : vector<1x2x64xf32> to vector<2x64xf32>
    %c1_426 = arith.constant 1 : index
    %c0_427 = arith.constant 0 : index
    %c0_428 = arith.constant 0 : index
    %681 = vector.load %arg3[%c1_426, %c0_427, %c0_428] : memref<2x64x256xf32, #tpu.memory_space<vmem>>, vector<1x64x256xf32>
    %682 = vector.shape_cast %681 : vector<1x64x256xf32> to vector<64x256xf32>
    %cst_429 = arith.constant dense<0.000000e+00> : vector<2x256xf32>
    %683 = tpu.matmul %678, %682, %cst_429 {dimension_numbers = #tpu.dot_dimension_numbers<[1], [0], [0], [1], [0, 0, 1, 1], [], []>} : vector<2x64xf32>, vector<64x256xf32>, vector<2x256xf32> -> vector<2x256xf32>
    %684 = arith.addf %676, %683 : vector<2x256xf32>
    %c1_430 = arith.constant 1 : index
    %c0_431 = arith.constant 0 : index
    %c0_432 = arith.constant 0 : index
    %685 = vector.load %arg4[%c1_430, %c0_431, %c0_432] : memref<2x1x256xf32, #tpu.memory_space<vmem>>, vector<1x1x256xf32>
    %686 = vector.shape_cast %685 : vector<1x1x256xf32> to vector<1x256xf32>
    %687 = vector.broadcast %686 : vector<1x256xf32> to vector<2x256xf32>
    %688 = arith.addf %684, %687 : vector<2x256xf32>
    %689 = vector.extract_strided_slice %688 {offsets = [0, 0], sizes = [2, 128], strides = [1, 1]} : vector<2x256xf32> to vector<2x128xf32>
    %cst_433 = arith.constant 5.000000e-01 : f32
    %690 = vector.broadcast %cst_433 : f32 to vector<2x128xf32>
    %691 = arith.mulf %690, %689 : vector<2x128xf32>
    %692 = math.tanh %691 : vector<2x128xf32>
    %cst_434 = arith.constant 5.000000e-01 : f32
    %693 = vector.broadcast %cst_434 : f32 to vector<2x128xf32>
    %694 = arith.mulf %693, %692 : vector<2x128xf32>
    %cst_435 = arith.constant 5.000000e-01 : f32
    %695 = vector.broadcast %cst_435 : f32 to vector<2x128xf32>
    %696 = arith.addf %694, %695 : vector<2x128xf32>
    %697 = vector.extract_strided_slice %696 {offsets = [0, 0], sizes = [2, 64], strides = [1, 1]} : vector<2x128xf32> to vector<2x64xf32>
    %698 = vector.extract_strided_slice %696 {offsets = [0, 64], sizes = [2, 64], strides = [1, 1]} : vector<2x128xf32> to vector<2x64xf32>
    %699 = vector.extract_strided_slice %688 {offsets = [0, 128], sizes = [2, 64], strides = [1, 1]} : vector<2x256xf32> to vector<2x64xf32>
    %700 = math.tanh %699 : vector<2x64xf32>
    %701 = vector.extract_strided_slice %688 {offsets = [0, 192], sizes = [2, 64], strides = [1, 1]} : vector<2x256xf32> to vector<2x64xf32>
    %cst_436 = arith.constant 5.000000e-01 : f32
    %702 = vector.broadcast %cst_436 : f32 to vector<2x64xf32>
    %703 = arith.mulf %702, %701 : vector<2x64xf32>
    %704 = math.tanh %703 : vector<2x64xf32>
    %cst_437 = arith.constant 5.000000e-01 : f32
    %705 = vector.broadcast %cst_437 : f32 to vector<2x64xf32>
    %706 = arith.mulf %705, %704 : vector<2x64xf32>
    %cst_438 = arith.constant 5.000000e-01 : f32
    %707 = vector.broadcast %cst_438 : f32 to vector<2x64xf32>
    %708 = arith.addf %706, %707 : vector<2x64xf32>
    %709 = arith.mulf %698, %680 : vector<2x64xf32>
    %710 = arith.mulf %697, %700 : vector<2x64xf32>
    %711 = arith.addf %709, %710 : vector<2x64xf32>
    %712 = math.tanh %711 : vector<2x64xf32>
    %713 = arith.mulf %708, %712 : vector<2x64xf32>
    %c1_439 = arith.constant 1 : index
    %c0_440 = arith.constant 0 : index
    %c0_441 = arith.constant 0 : index
    %714 = vector.load %arg8[%c1_439, %c0_440, %c0_441] : memref<2x2x64xf32, #tpu.memory_space<vmem>>, vector<1x2x64xf32>
    %715 = vector.shape_cast %714 : vector<1x2x64xf32> to vector<2x64xf32>
    %716 = vector.shape_cast %713 : vector<2x64xf32> to vector<1x2x64xf32>
    tpu.vector_store %arg8[%c1_439, %c0_440, %c0_441], %716 {strides = array<i32>} : memref<2x2x64xf32, #tpu.memory_space<vmem>>, vector<1x2x64xf32>,
    %c1_442 = arith.constant 1 : index
    %c0_443 = arith.constant 0 : index
    %c0_444 = arith.constant 0 : index
    %717 = vector.load %arg9[%c1_442, %c0_443, %c0_444] : memref<2x2x64xf32, #tpu.memory_space<vmem>>, vector<1x2x64xf32>
    %718 = vector.shape_cast %717 : vector<1x2x64xf32> to vector<2x64xf32>
    %719 = vector.shape_cast %711 : vector<2x64xf32> to vector<1x2x64xf32>
    tpu.vector_store %arg9[%c1_442, %c0_443, %c0_444], %719 {strides = array<i32>} : memref<2x2x64xf32, #tpu.memory_space<vmem>>, vector<1x2x64xf32>,
    %c7_445 = arith.constant 7 : index
    %c0_446 = arith.constant 0 : index
    %c0_447 = arith.constant 0 : index
    %720 = vector.load %arg10[%c7_445, %c0_446, %c0_447] : memref<8x2x64xf32, #tpu.memory_space<vmem>>, vector<1x2x64xf32>
    %721 = vector.shape_cast %720 : vector<1x2x64xf32> to vector<2x64xf32>
    %722 = vector.shape_cast %713 : vector<2x64xf32> to vector<1x2x64xf32>
    tpu.vector_store %arg10[%c7_445, %c0_446, %c0_447], %722 {strides = array<i32>} : memref<8x2x64xf32, #tpu.memory_space<vmem>>, vector<1x2x64xf32>,
    %c0_448 = arith.constant 0 : index
    %c0_449 = arith.constant 0 : index
    %c0_450 = arith.constant 0 : index
    %723 = vector.load %arg10[%c0_448, %c0_449, %c0_450] : memref<8x2x64xf32, #tpu.memory_space<vmem>>, vector<8x2x64xf32>
    %c0_451 = arith.constant 0 : index
    %c0_452 = arith.constant 0 : index
    %724 = vector.load %arg5[%c0_451, %c0_452] : memref<1x64xf32, #tpu.memory_space<vmem>>, vector<1x64xf32>
    %725 = vector.shape_cast %724 : vector<1x64xf32> to vector<1x1x64xf32>
    %726 = vector.broadcast %725 : vector<1x1x64xf32> to vector<8x2x64xf32>
    %727 = arith.mulf %723, %726 : vector<8x2x64xf32>
    %cst_453 = arith.constant dense<0.000000e+00> : vector<8x2xf32>
    %728 = vector.multi_reduction <add>, %727, %cst_453 [2] : vector<8x2x64xf32> to vector<8x2xf32>
    %c0_454 = arith.constant 0 : index
    %c0_455 = arith.constant 0 : index
    %729 = vector.load %arg6[%c0_454, %c0_455] : memref<1x1xf32, #tpu.memory_space<vmem>>, vector<1x1xf32>
    %730 = vector.broadcast %729 : vector<1x1xf32> to vector<8x2xf32>
    %731 = arith.addf %728, %730 : vector<8x2xf32>
    %cst_456 = arith.constant 5.000000e-01 : f32
    %732 = vector.broadcast %cst_456 : f32 to vector<8x2xf32>
    %733 = arith.mulf %732, %731 : vector<8x2xf32>
    %734 = math.tanh %733 : vector<8x2xf32>
    %cst_457 = arith.constant 5.000000e-01 : f32
    %735 = vector.broadcast %cst_457 : f32 to vector<8x2xf32>
    %736 = arith.mulf %735, %734 : vector<8x2xf32>
    %cst_458 = arith.constant 5.000000e-01 : f32
    %737 = vector.broadcast %cst_458 : f32 to vector<8x2xf32>
    %738 = arith.addf %736, %737 : vector<8x2xf32>
    %c0_459 = arith.constant 0 : index
    %c0_460 = arith.constant 0 : index
    %739 = vector.load %arg7[%c0_459, %c0_460] : memref<8x2xf32, #tpu.memory_space<vmem>>, vector<8x2xf32>
    tpu.vector_store %arg7[%c0_459, %c0_460], %738 {strides = array<i32>} : memref<8x2xf32, #tpu.memory_space<vmem>>, vector<8x2xf32>,
    return
  }
  func.func @transform_0(%arg0: i32) -> (i32, i32, i32) {
    %c0_i32 = arith.constant 0 : i32
    %c0_i32_0 = arith.constant 0 : i32
    %c0_i32_1 = arith.constant 0 : i32
    return %arg0, %c0_i32, %c0_i32_0 : i32, i32, i32
  }
  func.func @transform_1(%arg0: i32) -> (i32, i32, i32) {
    %c0_i32 = arith.constant 0 : i32
    %c0_i32_0 = arith.constant 0 : i32
    %c0_i32_1 = arith.constant 0 : i32
    %c0_i32_2 = arith.constant 0 : i32
    return %c0_i32, %c0_i32_0, %c0_i32_1 : i32, i32, i32
  }
  func.func @transform_2(%arg0: i32) -> (i32, i32, i32) {
    %c0_i32 = arith.constant 0 : i32
    %c0_i32_0 = arith.constant 0 : i32
    %c0_i32_1 = arith.constant 0 : i32
    %c0_i32_2 = arith.constant 0 : i32
    return %c0_i32, %c0_i32_0, %c0_i32_1 : i32, i32, i32
  }
  func.func @transform_3(%arg0: i32) -> (i32, i32, i32) {
    %c0_i32 = arith.constant 0 : i32
    %c0_i32_0 = arith.constant 0 : i32
    %c0_i32_1 = arith.constant 0 : i32
    %c0_i32_2 = arith.constant 0 : i32
    return %c0_i32, %c0_i32_0, %c0_i32_1 : i32, i32, i32
  }
  func.func @transform_4(%arg0: i32) -> (i32, i32) {
    %c0_i32 = arith.constant 0 : i32
    %c0_i32_0 = arith.constant 0 : i32
    %c0_i32_1 = arith.constant 0 : i32
    return %c0_i32, %c0_i32_0 : i32, i32
  }
  func.func @transform_5(%arg0: i32) -> (i32, i32) {
    %c0_i32 = arith.constant 0 : i32
    %c0_i32_0 = arith.constant 0 : i32
    %c0_i32_1 = arith.constant 0 : i32
    return %c0_i32, %c0_i32_0 : i32, i32
  }
  func.func @transform_6(%arg0: i32) -> (i32, i32) {
    %c0_i32 = arith.constant 0 : i32
    %c0_i32_0 = arith.constant 0 : i32
    return %arg0, %c0_i32 : i32, i32
  }
}

</mosaic_0001>

<bundles_post_ra>
// kernel: tpu_custom_call.1
= control target key start
LH: loop header
LB: loop body
LE: loop exit
PB: predicated region body
PF: predicated region fallthrough
CT: control target
= control target key end

     0   :  { %s4695_s0 = inlined_call_operand.hbm [shape: f32[8,2,256], index: 0, kind: input, shape index: {}]   ;;  %s4696_s1 = inlined_call_operand.hbm [shape: f32[1,64,256], index: 1, kind: input, shape index: {}]   ;;  %s4697_s2 = inlined_call_operand.hbm [shape: f32[2,64,256], index: 2, kind: input, shape index: {}]   ;;  %s4698_s3 = inlined_call_operand.vmem [shape: f32[2,1,256], index: 3, kind: input, shape index: {}]   ;;  %s4699_s4 = inlined_call_operand.vmem [shape: f32[1,64], index: 4, kind: input, shape index: {}]   ;;  %s4700_s5 = inlined_call_operand.<no memory space> [shape: f32[1,1], index: 5, kind: input, shape index: {}]   ;;  %s4701_s6 = inlined_call_operand.vmem [shape: f32[8,2], index: 6, kind: output, shape index: {}]  }
   0x1   :  { %v11_v0 = vstv %s4700_s5 }
   0x2   :  { %12 = vst [vmem:[#allocation5] sm:$0x1] %v11_v0 }
   0x3   :  { %13 = vsyncpa [#allocation7], 0 }
   0x4   :  { %14 = vsyncpa [#allocation9], 0  ;;  %s4021_s23 = smov [#allocation8]   ;;  %s3951_s27 = scalar_lea.hbm %s4696_s1, 2048 }
   0x5   :  { %s32_s24 = sshll.u32 %s4021_s23, 4  ;;  %p3952_p0 = scmp.ne.s32.totalorder %s4696_s1, %s3951_s27  ;;  %s33_s24 = int_to_ptr.vmem [resolvable:$true] %s32_s24 }
   0x6   :  { %p3955_p1 = scmp.lt.u32.totalorder %s3951_s27, %s4696_s1 }
   0x8   :  { %p3957_p2 = pnand %p3955_p1, %p3952_p0 }
   0xa   :  { %3960 = shalt.err (!%p3957_p2)
}
   0xb   :  { %s3961_s5 = scalar_lea.vmem %s33_s24, 2048  ;;  %p3966_p4 = scmp.lt.s32.totalorder %s33_s24, %s33_s24 }
   0xc   :  { %p3962_p3 = scmp.ne.s32.totalorder %s33_s24, %s3961_s5  ;;  %p3967_p5 = scmp.lt.s32.totalorder %s3961_s5, %s3961_s5 }
   0xe   :  { %p3968_p6 = por %p3967_p5, %p3966_p4 }
  0x10   :  { %p3969_p7 = pnand %p3968_p6, %p3962_p3 }
  0x12   :  { %3972 = shalt.err (!%p3969_p7)
}
  0x13   :  { %s4022_s8 = smov 256   ;;  %s4023_s9 = smov 16  }
  0x14   :  { %38 = dma.hbm_to_vmem [thread:$0]  %s4696_s1, 2048, %s33_s24, [#allocation9], %s4022_s8, %s4022_s8, %s4023_s9  }
  0x15   :  { %s4024_s12 = smov [#allocation6]   ;;  %s3973_s16 = scalar_lea.hbm %s4695_s0, 512 }
  0x16   :  { %s20_s13 = sshll.u32 %s4024_s12, 4  ;;  %p3974_p8 = scmp.ne.s32.totalorder %s4695_s0, %s3973_s16  ;;  %s21_s13 = int_to_ptr.vmem [resolvable:$true] %s20_s13 }
  0x17   :  { %p3977_p9 = scmp.lt.u32.totalorder %s3973_s16, %s4695_s0 }
  0x19   :  { %p3979_p10 = pnand %p3977_p9, %p3974_p8 }
  0x1b   :  { %3982 = shalt.err (!%p3979_p10)
}
  0x1c   :  { %s3983_s21 = scalar_lea.vmem %s21_s13, 512  ;;  %p3988_p12 = scmp.lt.s32.totalorder %s21_s13, %s21_s13 }
  0x1d   :  { %p3984_p11 = scmp.ne.s32.totalorder %s21_s13, %s3983_s21  ;;  %p3989_p13 = scmp.lt.s32.totalorder %s3983_s21, %s3983_s21 }
  0x1f   :  { %p3990_p0 = por %p3989_p13, %p3988_p12 }
  0x21   :  { %p3991_p1 = pnand %p3990_p0, %p3984_p11 }
  0x23   :  { %3994 = shalt.err (!%p3991_p1)
}
  0x24   :  { %s4025_s1 = smov 64   ;;  %s4026_s22 = smov 4  }
  0x25   :  { %26 = dma.hbm_to_vmem [thread:$0]  %s4695_s0, 512, %s21_s13, [#allocation7], %s4025_s1, %s4025_s1, %s4026_s22  }
  0x26   :  { %s4027_s25 = smov [#allocation10]   ;;  %s3995_s29 = scalar_lea.hbm %s4697_s2, 4096 }
  0x27   :  { %s44_s26 = sshll.u32 %s4027_s25, 4  ;;  %p3996_p2 = scmp.ne.s32.totalorder %s4697_s2, %s3995_s29  ;;  %s45_s26 = int_to_ptr.vmem [resolvable:$true] %s44_s26 }
  0x28   :  { %p3999_p3 = scmp.lt.u32.totalorder %s3995_s29, %s4697_s2 }
  0x2a   :  { %p4001_p4 = pnand %p3999_p3, %p3996_p2 }
  0x2c   :  { %4004 = shalt.err (!%p4001_p4)
}
  0x2d   :  { %s4005_s11 = scalar_lea.vmem %s45_s26, 4096  ;;  %p4010_p6 = scmp.lt.s32.totalorder %s45_s26, %s45_s26 }
  0x2e   :  { %p4006_p5 = scmp.ne.s32.totalorder %s45_s26, %s4005_s11  ;;  %p4011_p7 = scmp.lt.s32.totalorder %s4005_s11, %s4005_s11 }
  0x30   :  { %p4012_p8 = por %p4011_p7, %p4010_p6 }
  0x32   :  { %p4013_p9 = pnand %p4012_p8, %p4006_p5 }
  0x34   :  { %4016 = shalt.err (!%p4013_p9)
}
  0x35   :  { %50 = dma.hbm_to_vmem [thread:$0]  %s4697_s2, 4096, %s45_s26, [#allocation9], %s4022_s8, %s4022_s8, %s4023_s9  }
  0x36   :  { %4017 = dma.done.wait [#allocation7], 512  }
  0x37   :  { %4018 = vsyncadd [#allocation7], 4294966784 }
  0x38   :  { %4019 = dma.done.wait [#allocation9], 6144  }
  0x39   :  { %4020 = vsyncadd [#allocation9], 4294961152  ;;  %vm70_vm0 = vcmask 517120   ;;  %v4028_v1 = vmov 0.0   ;;  %v79_v2 = vld [vmem:[#allocation10 + $0x8] sm:$0xff]  ;;  %v81_v3 = vld [vmem:[#allocation10 + $0x18] sm:$0xff]  ;;  %v175_v30 = vlaneseq }
  0x3a   :  { %162 = vmatprep.mubr.f32.mxu1 %v4028_v1  ;;  %71 = vst.msk [vmem:[#allocation2] sm:$0x3] %vm70_vm0, %v4028_v1  ;;  %72 = vst.msk [vmem:[#allocation2 + $0x2] sm:$0x3] %vm70_vm0, %v4028_v1  ;;  %555 = vmatprep.mubr.f32.mxu0 %v4028_v1  ;;  %v78_v4 = vld [vmem:[#allocation10] sm:$0xff]  ;;  %v4123_v5 = vpack.c.bf16 %v81_v3, %v79_v2  ;;  %v80_v6 = vld [vmem:[#allocation10 + $0x10] sm:$0xff] }
  0x3b   :  { %73 = vst.msk [vmem:[#allocation3] sm:$0x3] %vm70_vm0, %v4028_v1  ;;  %74 = vst.msk [vmem:[#allocation3 + $0x2] sm:$0x3] %vm70_vm0, %v4028_v1  ;;  %v83_v7 = vld [vmem:[#allocation10 + $0x28] sm:$0xff]  ;;  %v85_v8 = vld [vmem:[#allocation10 + $0x38] sm:$0xff]  ;;  %v4125_v9 = vpack.c.bf16 %v80_v6, %v78_v4 }
  0x3c   :  { %v4127_v10 = vpack.c.bf16 %v85_v8, %v83_v7  ;;  %v82_v11 = vld [vmem:[#allocation10 + $0x20] sm:$0xff]  ;;  %v84_v12 = vld [vmem:[#allocation10 + $0x30] sm:$0xff]  ;;  %v87_v13 = vld [vmem:[#allocation10 + $0x48] sm:$0xff]  ;;  %3396 = vmatprep.subr.bf16.mxu1 %v4123_v5  ;;  %3444 = vmatprep.subr.bf16.mxu0 %v4123_v5  ;;  %vm94_vm1 = vcmask 523264   ;;  %v4029_v28 = vmov 1983009808  }
  0x3d   :  { %v89_v14 = vld [vmem:[#allocation10 + $0x58] sm:$0xff]  ;;  %3398 = vmatpush1.bf16.msra.mxu1 %v4125_v9  ;;  %v4132_v15 = vpack.c.bf16 %v84_v12, %v82_v11  ;;  %3446 = vmatpush1.bf16.msra.mxu0 %v4125_v9  ;;  %v86_v17 = vld [vmem:[#allocation10 + $0x40] sm:$0xff]  ;;  %v88_v18 = vld [vmem:[#allocation10 + $0x50] sm:$0xff]  ;;  %v173_v29 = vunpack.c.l.s4 %v4029_v28  ;;  %v4159_v32 = vshrl.u32 %v175_v30, 7  ;;  %vm3330_vm2 = vcmask 1041409  }
  0x3e   :  { %3400 = vmatprep.subr.bf16.mxu1 %v4127_v10  ;;  %v4136_v16 = vpack.c.bf16 %v89_v14, %v87_v13  ;;  %3448 = vmatprep.subr.bf16.mxu0 %v4127_v10  ;;  %v91_v19 = vld [vmem:[#allocation10 + $0x68] sm:$0xff]  ;;  %v93_v20 = vld [vmem:[#allocation10 + $0x78] sm:$0xff]  ;;  %v4141_v22 = vpack.c.bf16 %v88_v18, %v86_v17  ;;  %v90_v24 = vld [vmem:[#allocation10 + $0x60] sm:$0xff]  ;;  %vm3332_vm3 = vcmask 1042434   ;;  %vm3334_vm4 = vcmask 1043459  }
  0x3f   :  { %v4145_v23 = vpack.c.bf16 %v93_v20, %v91_v19  ;;  %v92_v25 = vld [vmem:[#allocation10 + $0x70] sm:$0xff]  ;;  %v174_v31 = vunpack.c.0.s8 %v173_v29  ;;  %v75_v37 = vld [vmem:[#allocation6] sm:$0xf]  ;;  %v257_v47 = vld [vmem:[#allocation10 + $0x88] sm:$0xff]  ;;  %vm3336_vm5 = vcmask 1044484   ;;  %vm3338_vm6 = vcmask 1045509  }
  0x40   :  { %v4149_v26 = vpack.c.bf16 %v92_v25, %v90_v24  ;;  %v259_v48 = vld [vmem:[#allocation10 + $0x98] sm:$0xff]  ;;  %v256_v49 = vld [vmem:[#allocation10 + $0x80] sm:$0xff]  ;;  %v258_v51 = vld [vmem:[#allocation10 + $0x90] sm:$0xff]  ;;  %vm3340_vm7 = vcmask 1046534   ;;  %vm3342_vm8 = vcmask 1047559   ;;  %vm3345_vm9 = vcmask 15360  }
  0x41   :  { %3402 = vmatpush1.bf16.msra.mxu1 %v4132_v15  ;;  %3450 = vmatpush1.bf16.msra.mxu0 %v4132_v15  ;;  %v76_v27 = vld [vmem:[#allocation2] sm:$0x3]  ;;  %v4162_v34 = vsub.s32 %v174_v31, %v4159_v32  ;;  %v4170_v50 = vpack.c.bf16 %v259_v48, %v257_v47  ;;  %v263_v53 = vld [vmem:[#allocation10 + $0xb8] sm:$0xff]  ;;  %v4172_v54 = vpack.c.bf16 %v258_v51, %v256_v49  ;;  %v262_v57 = vld [vmem:[#allocation10 + $0xb0] sm:$0xff] }
  0x42   :  { %v3354_v21 = vld.sshfl [vmem:[#allocation3] sm:$0x3 pattern:$0x76325410]  ;;  %3404 = vmatprep.subr.bf16.mxu1 %v4136_v16  ;;  %3452 = vmatprep.subr.bf16.mxu0 %v4136_v16  ;;  %v260_v56 = vld [vmem:[#allocation10 + $0xa0] sm:$0xff]  ;;  %v267_v59 = vld [vmem:[#allocation10 + $0xd8] sm:$0xff] }
  0x43   :  { %205 = vrot.lane.b32.xlu0 %v3354_v21, %s4025_s1  ;;  %v261_v52 = vld [vmem:[#allocation10 + $0xa8] sm:$0xff]  ;;  %v4179_v60 = vpack.c.bf16 %v262_v57, %v260_v56  ;;  %v264_v62 = vld [vmem:[#allocation10 + $0xc0] sm:$0xff]  ;;  %v266_v63 = vld [vmem:[#allocation10 + $0xd0] sm:$0xff] }
  0x44   :  { %v4174_v55 = vpack.c.bf16 %v263_v53, %v261_v52  ;;  %v265_v58 = vld [vmem:[#allocation10 + $0xc8] sm:$0xff]  ;;  %v271_v2 = vld [vmem:[#allocation10 + $0xf8] sm:$0xff]  ;;  %v4185_v3 = vpack.c.bf16 %v266_v63, %v264_v62  ;;  %v268_v6 = vld [vmem:[#allocation10 + $0xe0] sm:$0xff] }
  0x45   :  { %3406 = vmatpush1.bf16.msra.mxu1 %v4141_v22  ;;  %3454 = vmatpush1.bf16.msra.mxu0 %v4141_v22  ;;  %v4182_v61 = vpack.c.bf16 %v267_v59, %v265_v58  ;;  %v269_v0 = vld [vmem:[#allocation10 + $0xe8] sm:$0xff]  ;;  %v270_v7 = vld [vmem:[#allocation10 + $0xf0] sm:$0xff]  ;;  %v238_v11 = vld [vmem:[#allocation8 + $0x18] sm:$0xff] }
  0x46   :  { %3408 = vmatprep.subr.bf16.mxu1 %v4145_v23  ;;  %3456 = vmatprep.subr.bf16.mxu0 %v4145_v23  ;;  %v4188_v4 = vpack.c.bf16 %v271_v2, %v269_v0  ;;  %v236_v8 = vld [vmem:[#allocation8 + $0x8] sm:$0xff]  ;;  %v4191_v12 = vpack.c.bf16 %v270_v7, %v268_v6  ;;  %v235_v14 = vld [vmem:[#allocation8] sm:$0xff]  ;;  %v237_v17 = vld [vmem:[#allocation8 + $0x10] sm:$0xff]  ;;  %v4251_v7 = vsub.s32 0, %v4159_v32 }
  0x47   :  { %v4194_v13 = vpack.c.bf16 %v238_v11, %v236_v8  ;;  %v240_v18 = vld [vmem:[#allocation8 + $0x28] sm:$0xff]  ;;  %v242_v19 = vld [vmem:[#allocation8 + $0x38] sm:$0xff]  ;;  %v4197_v21 = vpack.c.bf16 %v237_v17, %v235_v14  ;;  %v239_v25 = vld [vmem:[#allocation8 + $0x20] sm:$0xff]  ;;  %v4258_v14 = vsub.s32 1, %v4159_v32 }
  0x48   :  { %v252_v20 = vld [vmem:[#allocation2 + $0x2] sm:$0x3]  ;;  %v4200_v24 = vpack.c.bf16 %v242_v19, %v240_v18  ;;  %v246_v31 = vld [vmem:[#allocation8 + $0x58] sm:$0xff]  ;;  %v254_v52 = vld [vmem:[#allocation3 + $0x2] sm:$0x3] }
  0x49   :  { %3410 = vmatpush1.bf16.msra.mxu1 %v4149_v26  ;;  %3458 = vmatpush1.bf16.msra.mxu0 %v4149_v26  ;;  %v244_v29 = vld [vmem:[#allocation8 + $0x48] sm:$0xff] }
  0x4a   :  { %3412 = vmatprep.subr.bf16.mxu1 %v4170_v50  ;;  %3460 = vmatprep.subr.bf16.mxu0 %v4170_v50  ;;  %v3357_v8 = vld [vmem:[%s4698_s3 + $0x2] sm:$0x3] }
  0x4b   :  { %v426_v11 = vrot.slane %v3357_v8, %v4251_v7  ;;  %v430_v19 = vrot.slane %v3357_v8, %v4258_v14 }
  0x4c   :  { %3353 = vmatmul.mubr.msk.f32.vlgmr.msra.gmra.mrb[0].mxu1 %vm94_vm1, %v76_v27  ;;  %v241_v27 = vld [vmem:[#allocation8 + $0x30] sm:$0xff] }
  0x4d   :  { %339 = vmatprep.mubr.f32.mxu1 %v4028_v1  ;;  %3414 = vmatpush1.bf16.msra.mxu1 %v4172_v54  ;;  %v4206_v28 = vpack.c.bf16 %v241_v27, %v239_v25 }
  0x4e   :  { %3416 = vmatprep.subr.bf16.mxu1 %v4174_v55 }
  0x51   :  { %3418 = vmatpush1.bf16.msra.mxu1 %v4179_v60 }
  0x52   :  { %3420 = vmatprep.subr.bf16.mxu1 %v4182_v61 }
  0x55   :  { %3422 = vmatpush1.bf16.msra.mxu1 %v4185_v3 }
  0x56   :  { %3424 = vmatprep.subr.bf16.mxu1 %v4188_v4 }
  0x59   :  { %3426 = vmatpush1.bf16.msra.mxu1 %v4191_v12 }
  0x5a   :  { %3428 = vmatprep.subr.bf16.mxu1 %v4194_v13 }
  0x5c   :  { %3355 = vmatmul.mubr.msk.f32.vlgmr.msra.gmra.mrb[2].mxu1 %vm94_vm1, %v252_v20 }
  0x5d   :  { %3430 = vmatpush1.bf16.msra.mxu1 %v4197_v21  ;;  %413 = vmatprep.mubr.f32.mxu1 %v4028_v1 }
  0x5e   :  { %3432 = vmatprep.subr.bf16.mxu1 %v4200_v24 }
  0x61   :  { %3434 = vmatpush1.bf16.msra.mxu1 %v4206_v28 }
 0x11f   :  { %v164_v33 = vpop.f32.mrb[0].mxu1 }
 0x120   :  { %v166_v35 = vpop.f32.mrb[1].mxu1 }
 0x121   :  { %v171_v36 = vcombine.low %v164_v33, %v166_v35  ;;  %v243_v33 = vld [vmem:[#allocation8 + $0x40] sm:$0xff]  ;;  %v4209_v35 = vpack.c.bf16 %v246_v31, %v244_v29 }
 0x123   :  { %v178_v38 = vrot.slane %v171_v36, %v4162_v34  ;;  %v245_v36 = vld [vmem:[#allocation8 + $0x50] sm:$0xff]  ;;  %3436 = vmatprep.subr.bf16.mxu1 %v4209_v35 }
 0x125   :  { %v180_v39 = vadd.f32 %v178_v38, %v75_v37  ;;  %v248_v37 = vld [vmem:[#allocation8 + $0x68] sm:$0xff]  ;;  %v4211_v38 = vpack.c.bf16 %v245_v36, %v243_v33  ;;  %v469_v33 = vld [vmem:[#allocation6 + $0x4] sm:$0xf] }
 0x127   :  { %189 = vrot.lane.b32.xlu1 %v180_v39, %s4025_s1  ;;  %v181_v40 = vmul.f32 0.5, %v180_v39  ;;  %v186_v41 = vrot.slane %v180_v39, 2  ;;  %v250_v39 = vld [vmem:[#allocation8 + $0x78] sm:$0xff]  ;;  %3438 = vmatpush1.bf16.msra.mxu1 %v4211_v38 }
 0x129   :  { %3807 = vtanh.f32 %v181_v40  ;;  %v247_v40 = vld [vmem:[#allocation8 + $0x60] sm:$0xff] }
 0x12a   :  { %3809 = vtanh.f32 %v186_v41  ;;  %v249_v41 = vld [vmem:[#allocation8 + $0x70] sm:$0xff] }
 0x133   :  { %v3808_v42 = vpop.eup %3807 }
 0x134   :  { %v183_v43 = vmul.f32 0.5, %v3808_v42  ;;  %v3810_v45 = vpop.eup %3809  ;;  %v4214_v42 = vpack.c.bf16 %v250_v39, %v248_v37 }
 0x136   :  { %v4166_v44 = vadd.f32 0.5, %v183_v43  ;;  %v206_v43 = vpop.permute.xlu0 %205  ;;  %3440 = vmatprep.subr.bf16.mxu1 %v4214_v42 }
 0x138   :  { %v209_v46 = vmul.f32 %v3810_v45, %v4166_v44  ;;  %v4217_v45 = vpack.c.bf16 %v249_v41, %v247_v40 }
 0x13a   :  { %211 = vrot.lane.b32.xlu0 %v209_v46, %s4025_s1  ;;  %v208_v46 = vmul.f32 %v206_v43, %v4166_v44  ;;  %3442 = vmatpush1.bf16.msra.mxu1 %v4217_v45 }
 0x13b   :  { %3492 = vmatprep.subr.bf16.mxu1 %v4123_v5 }
 0x199   :  { %v190_v53 = vpop.permute.xlu1 %189 }
 0x19a   :  { %v191_v56 = vrot.slane %v190_v53, 2 }
 0x19c   :  { %v193_v44 = vmul.f32 0.5, %v191_v56 }
 0x1ac   :  { %v212_v47 = vpop.permute.xlu0 %211 }
 0x1ad   :  { %v214_v48 = vadd.f32 %v212_v47, %v208_v46 }
 0x1af   :  { %3811 = vtanh.f32 %v214_v48  ;;  %v230_v49 = vrot.slane %v214_v48, %v4162_v34 }
 0x1b0   :  { %3813 = vtanh.f32 %v193_v44 }
 0x1b1   :  { %231 = vrot.lane.b32.xlu0 %v230_v49, %s4025_s1 }
 0x1b9   :  { %v3812_v51 = vpop.eup %3811 }
 0x1ba   :  { %217 = vrot.lane.b32.xlu1 %v3812_v51, %s4025_s1  ;;  %v3814_v58 = vpop.eup %3813 }
 0x1bb   :  { %v195_v59 = vmul.f32 0.5, %v3814_v58 }
 0x1bd   :  { %v196_v63 = vadd.f32 0.5, %v195_v59 }
 0x1be   :  { %445 = vrot.lane.b32.xlu1 %v254_v52, %s4025_s1 }
 0x223   :  { %v232_v57 = vpop.permute.xlu0 %231 }
 0x224   :  { %234 = vst.msk [vmem:[#allocation3] sm:$0x3] %vm70_vm0, %v232_v57 }
 0x22b   :  { %v3359_v62 = vld.sshfl [vmem:[#allocation3] sm:$0x3 pattern:$0x76325410] }
 0x22c   :  { %598 = vrot.lane.b32.xlu1 %v3359_v62, %s4025_s1  ;;  %v218_v0 = vpop.permute.xlu1 %217 }
 0x22d   :  { %v220_v2 = vmul.f32 %v218_v0, %v196_v63 }
 0x22f   :  { %222 = vst.msk [vmem:[#allocation2] sm:$0x3] %vm70_vm0, %v220_v2  ;;  %3356 = vmatmul.mubr.msk.f32.vlgmr.msra.gmra.mrb[2].mxu1 %vm94_vm1, %v220_v2 }
 0x230   :  { %3494 = vmatpush1.bf16.msra.mxu1 %v4125_v9  ;;  %944 = vmatprep.mubr.f32.mxu1 %v4028_v1  ;;  %v446_v57 = vpop.permute.xlu1 %445 }
 0x231   :  { %3496 = vmatprep.subr.bf16.mxu1 %v4127_v10 }
 0x234   :  { %3498 = vmatpush1.bf16.msra.mxu1 %v4132_v15 }
 0x235   :  { %3500 = vmatprep.subr.bf16.mxu1 %v4136_v16 }
 0x236   :  { %v470_v6 = vld [vmem:[#allocation2] sm:$0x3] }
 0x237   :  { %3358 = vmatmul.mubr.msk.f32.vlgmr.msra.gmra.mrb[0].mxu0 %vm94_vm1, %v470_v6 }
 0x238   :  { %3462 = vmatpush1.bf16.msra.mxu0 %v4172_v54  ;;  %728 = vmatprep.mubr.f32.mxu0 %v4028_v1 }
 0x239   :  { %3464 = vmatprep.subr.bf16.mxu0 %v4174_v55  ;;  %3502 = vmatpush1.bf16.msra.mxu1 %v4141_v22 }
 0x23a   :  { %3504 = vmatprep.subr.bf16.mxu1 %v4145_v23 }
 0x23c   :  { %3466 = vmatpush1.bf16.msra.mxu0 %v4179_v60 }
 0x23d   :  { %3468 = vmatprep.subr.bf16.mxu0 %v4182_v61  ;;  %3506 = vmatpush1.bf16.msra.mxu1 %v4149_v26 }
 0x23e   :  { %3508 = vmatprep.subr.bf16.mxu1 %v4170_v50 }
 0x240   :  { %3470 = vmatpush1.bf16.msra.mxu0 %v4185_v3 }
 0x241   :  { %3472 = vmatprep.subr.bf16.mxu0 %v4188_v4 }
 0x244   :  { %3474 = vmatpush1.bf16.msra.mxu0 %v4191_v12 }
 0x245   :  { %3476 = vmatprep.subr.bf16.mxu0 %v4194_v13 }
 0x29e   :  { %v599_v2 = vpop.permute.xlu1 %598 }
 0x302   :  { %v415_v50 = vpop.f32.mrb[2].mxu1 }
 0x303   :  { %v433_v17 = vadd.f32 %v426_v11, %v415_v50  ;;  %v417_v18 = vpop.f32.mrb[3].mxu1 }
 0x304   :  { %v434_v25 = vadd.f32 %v430_v19, %v417_v18 }
 0x305   :  { %v435_v20 = vmul.f32 0.5, %v433_v17 }
 0x306   :  { %v440_v44 = vmul.f32 0.5, %v434_v25 }
 0x307   :  { %3815 = vtanh.f32 %v435_v20 }
 0x308   :  { %3817 = vtanh.f32 %v434_v25 }
 0x30a   :  { %v557_v27 = vpop.f32.mrb[0].mxu0 }
 0x30b   :  { %v559_v29 = vpop.f32.mrb[1].mxu0 }
 0x30c   :  { %v564_v31 = vcombine.low %v557_v27, %v559_v29 }
 0x30e   :  { %v571_v36 = vrot.slane %v564_v31, %v4162_v34 }
 0x310   :  { %v573_v37 = vadd.f32 %v571_v36, %v469_v33 }
 0x311   :  { %v3816_v39 = vpop.eup %3815 }
 0x312   :  { %v437_v40 = vmul.f32 0.5, %v3816_v39  ;;  %v574_v41 = vmul.f32 0.5, %v573_v37  ;;  %v3818_v46 = vpop.eup %3817  ;;  %v579_v47 = vrot.slane %v573_v37, 2 }
 0x314   :  { %v438_v43 = vadd.f32 0.5, %v437_v40  ;;  %3819 = vtanh.f32 %v574_v41 }
 0x315   :  { %3821 = vtanh.f32 %v579_v47 }
 0x316   :  { %v449_v48 = vmul.f32 %v3818_v46, %v438_v43  ;;  %3823 = vtanh.f32 %v440_v44  ;;  %v448_v58 = vmul.f32 %v446_v57, %v438_v43 }
 0x318   :  { %451 = vrot.lane.b32.xlu0 %v449_v48, %s4025_s1 }
 0x31e   :  { %v3820_v49 = vpop.eup %3819 }
 0x31f   :  { %v576_v51 = vmul.f32 0.5, %v3820_v49  ;;  %v3822_v53 = vpop.eup %3821 }
 0x320   :  { %v3824_v63 = vpop.eup %3823 }
 0x321   :  { %v577_v52 = vadd.f32 0.5, %v576_v51  ;;  %v442_v0 = vmul.f32 0.5, %v3824_v63 }
 0x323   :  { %v602_v56 = vmul.f32 %v3822_v53, %v577_v52  ;;  %v443_v6 = vadd.f32 0.5, %v442_v0  ;;  %v601_v11 = vmul.f32 %v599_v2, %v577_v52 }
 0x325   :  { %604 = vrot.lane.b32.xlu0 %v602_v56, %s4025_s1 }
 0x329   :  { %582 = vrot.lane.b32.xlu0 %v573_v37, %s4025_s1 }
 0x38a   :  { %v452_v59 = vpop.permute.xlu0 %451 }
 0x38b   :  { %v454_v62 = vadd.f32 %v452_v59, %v448_v58 }
 0x38d   :  { %3825 = vtanh.f32 %v454_v62  ;;  %463 = vrot.lane.b32.xlu0 %v454_v62, %s4025_s1 }
 0x397   :  { %v3826_v8 = vpop.eup %3825  ;;  %v605_v50 = vpop.permute.xlu0 %604 }
 0x398   :  { %v456_v17 = vmul.f32 %v3826_v8, %v443_v6  ;;  %v607_v18 = vadd.f32 %v605_v50, %v601_v11 }
 0x39a   :  { %458 = vrot.lane.b32.xlu1 %v456_v17, %s4025_s1  ;;  %3827 = vtanh.f32 %v607_v18  ;;  %v622_v20 = vrot.slane %v607_v18, %v4162_v34 }
 0x39b   :  { %v583_v25 = vpop.permute.xlu0 %582 }
 0x39c   :  { %v584_v27 = vrot.slane %v583_v25, 2 }
 0x39e   :  { %v586_v31 = vmul.f32 0.5, %v584_v27 }
 0x3a0   :  { %3829 = vtanh.f32 %v586_v31 }
 0x3a4   :  { %v3828_v19 = vpop.eup %3827 }
 0x3a5   :  { %610 = vrot.lane.b32.xlu1 %v3828_v19, %s4025_s1 }
 0x3a9   :  { %623 = vrot.lane.b32.xlu1 %v622_v20, %s4025_s1 }
 0x3aa   :  { %v3830_v37 = vpop.eup %3829 }
 0x3ab   :  { %v588_v39 = vmul.f32 0.5, %v3830_v37 }
 0x3ad   :  { %v589_v41 = vadd.f32 0.5, %v588_v39 }
 0x3ff   :  { %v464_v29 = vpop.permute.xlu0 %463 }
 0x400   :  { %466 = vst.msk [vmem:[#allocation3 + $0x2] sm:$0x3] %vm70_vm0, %v464_v29 }
 0x407   :  { %v644_v33 = vld [vmem:[#allocation3 + $0x2] sm:$0x3] }
 0x408   :  { %833 = vrot.lane.b32.xlu0 %v644_v33, %s4025_s1 }
 0x40c   :  { %v459_v36 = vpop.permute.xlu1 %458 }
 0x40d   :  { %461 = vst.msk [vmem:[#allocation2 + $0x2] sm:$0x3] %vm70_vm0, %v459_v36  ;;  %467 = vst.msk [vmem:[#allocation4] sm:$0x3] %vm70_vm0, %v459_v36 }
 0x414   :  { %v643_v40 = vld [vmem:[#allocation2 + $0x2] sm:$0x3] }
 0x415   :  { %3360 = vmatmul.mubr.msk.f32.vlgmr.msra.gmra.mrb[2].mxu0 %vm94_vm1, %v643_v40 }
 0x416   :  { %3478 = vmatpush1.bf16.msra.mxu0 %v4197_v21  ;;  %802 = vmatprep.mubr.f32.mxu0 %v4028_v1 }
 0x417   :  { %3480 = vmatprep.subr.bf16.mxu0 %v4200_v24  ;;  %v611_v43 = vpop.permute.xlu1 %610 }
 0x418   :  { %v613_v46 = vmul.f32 %v611_v43, %v589_v41 }
 0x41a   :  { %3482 = vmatpush1.bf16.msra.mxu0 %v4206_v28  ;;  %614 = vst.msk [vmem:[#allocation2] sm:$0x3] %vm70_vm0, %v613_v46 }
 0x41b   :  { %3484 = vmatprep.subr.bf16.mxu0 %v4209_v35  ;;  %v624_v47 = vpop.permute.xlu1 %623 }
 0x41c   :  { %626 = vst.msk [vmem:[#allocation3] sm:$0x3] %vm70_vm0, %v624_v47 }
 0x41e   :  { %3486 = vmatpush1.bf16.msra.mxu0 %v4211_v38 }
 0x41f   :  { %3488 = vmatprep.subr.bf16.mxu0 %v4214_v42 }
 0x421   :  { %v859_v48 = vld [vmem:[#allocation2] sm:$0x3] }
 0x422   :  { %3490 = vmatpush1.bf16.msra.mxu0 %v4217_v45  ;;  %3363 = vmatmul.mubr.msk.f32.vlgmr.msra.gmra.mrb[4].mxu1 %vm94_vm1, %v859_v48 }
 0x423   :  { %3540 = vmatprep.subr.bf16.mxu0 %v4123_v5  ;;  %v3364_v49 = vld.sshfl [vmem:[#allocation3] sm:$0x3 pattern:$0x76325410]  ;;  %3510 = vmatpush1.bf16.msra.mxu1 %v4172_v54  ;;  %v3362_v5 = vld [vmem:[%s4698_s3 + $0x2] sm:$0x3] }
 0x424   :  { %1117 = vmatprep.mubr.f32.mxu1 %v4028_v1  ;;  %987 = vrot.lane.b32.xlu0 %v3364_v49, %s4025_s1 }
 0x425   :  { %3361 = vmatmul.mubr.msk.f32.vlgmr.msra.gmra.mrb[2].mxu0 %vm94_vm1, %v613_v46  ;;  %3512 = vmatprep.subr.bf16.mxu1 %v4174_v55  ;;  %v858_v55 = vld [vmem:[#allocation6 + $0x8] sm:$0xf] }
 0x426   :  { %3542 = vmatpush1.bf16.msra.mxu0 %v4125_v9  ;;  %1333 = vmatprep.mubr.f32.mxu0 %v4028_v1  ;;  %v814_v9 = vrot.slane %v3362_v5, %v4251_v7 }
 0x427   :  { %3544 = vmatprep.subr.bf16.mxu0 %v4127_v10  ;;  %3514 = vmatpush1.bf16.msra.mxu1 %v4179_v60 }
 0x428   :  { %3516 = vmatprep.subr.bf16.mxu1 %v4182_v61 }
 0x42a   :  { %3546 = vmatpush1.bf16.msra.mxu0 %v4132_v15 }
 0x42b   :  { %3548 = vmatprep.subr.bf16.mxu0 %v4136_v16  ;;  %3518 = vmatpush1.bf16.msra.mxu1 %v4185_v3 }
 0x42c   :  { %3520 = vmatprep.subr.bf16.mxu1 %v4188_v4 }
 0x42e   :  { %3550 = vmatpush1.bf16.msra.mxu0 %v4141_v22  ;;  %v818_v22 = vrot.slane %v3362_v5, %v4258_v14 }
 0x42f   :  { %3552 = vmatprep.subr.bf16.mxu0 %v4145_v23  ;;  %3522 = vmatpush1.bf16.msra.mxu1 %v4191_v12 }
 0x430   :  { %3524 = vmatprep.subr.bf16.mxu1 %v4194_v13 }
 0x432   :  { %3554 = vmatpush1.bf16.msra.mxu0 %v4149_v26 }
 0x47a   :  { %v834_v2 = vpop.permute.xlu0 %833 }
 0x496   :  { %v988_v50 = vpop.permute.xlu0 %987 }
 0x4f5   :  { %v946_v10 = vpop.f32.mrb[4].mxu1 }
 0x4f6   :  { %v948_v15 = vpop.f32.mrb[5].mxu1 }
 0x4f7   :  { %v953_v16 = vcombine.low %v946_v10, %v948_v15 }
 0x4f8   :  { %v804_v54 = vpop.f32.mrb[2].mxu0 }
 0x4f9   :  { %v821_v23 = vadd.f32 %v814_v9, %v804_v54  ;;  %v806_v60 = vpop.f32.mrb[3].mxu0  ;;  %v960_v61 = vrot.slane %v953_v16, %v4162_v34 }
 0x4fa   :  { %v822_v26 = vadd.f32 %v818_v22, %v806_v60  ;;  %v1247_v22 = vld [vmem:[#allocation6 + $0xc] sm:$0xf] }
 0x4fb   :  { %v823_v3 = vmul.f32 0.5, %v821_v23  ;;  %v962_v4 = vadd.f32 %v960_v61, %v858_v55  ;;  %v3367_v55 = vld [vmem:[%s4698_s3 + $0x2] sm:$0x3] }
 0x4fc   :  { %v828_v0 = vmul.f32 0.5, %v822_v26 }
 0x4fd   :  { %3831 = vtanh.f32 %v823_v3  ;;  %v963_v12 = vmul.f32 0.5, %v962_v4  ;;  %v968_v13 = vrot.slane %v962_v4, 2  ;;  %v1207_v3 = vrot.slane %v3367_v55, %v4258_v14 }
 0x4fe   :  { %3833 = vtanh.f32 %v822_v26 }
 0x4ff   :  { %3835 = vtanh.f32 %v963_v12 }
 0x500   :  { %3837 = vtanh.f32 %v968_v13 }
 0x501   :  { %3839 = vtanh.f32 %v828_v0  ;;  %v1426_v0 = vld [vmem:[#allocation10 + $0x98] sm:$0xff] }
 0x507   :  { %v3832_v51 = vpop.eup %3831 }
 0x508   :  { %v825_v52 = vmul.f32 0.5, %v3832_v51  ;;  %v3834_v53 = vpop.eup %3833 }
 0x509   :  { %v3836_v44 = vpop.eup %3835 }
 0x50a   :  { %v826_v56 = vadd.f32 0.5, %v825_v52  ;;  %v965_v58 = vmul.f32 0.5, %v3836_v44  ;;  %v3838_v62 = vpop.eup %3837 }
 0x50b   :  { %v3840_v19 = vpop.eup %3839 }
 0x50c   :  { %v837_v57 = vmul.f32 %v3834_v53, %v826_v56  ;;  %v966_v59 = vadd.f32 0.5, %v965_v58  ;;  %v836_v6 = vmul.f32 %v834_v2, %v826_v56  ;;  %v830_v25 = vmul.f32 0.5, %v3840_v19  ;;  %v1423_v2 = vld [vmem:[#allocation10 + $0x80] sm:$0xff] }
 0x50e   :  { %839 = vrot.lane.b32.xlu1 %v837_v57, %s4025_s1  ;;  %v991_v63 = vmul.f32 %v3838_v62, %v966_v59  ;;  %v990_v17 = vmul.f32 %v988_v50, %v966_v59  ;;  %v831_v27 = vadd.f32 0.5, %v830_v25  ;;  %v1428_v50 = vld [vmem:[#allocation10 + $0xa8] sm:$0xff]  ;;  %v1429_v25 = vld [vmem:[#allocation10 + $0xb0] sm:$0xff] }
 0x512   :  { %993 = vrot.lane.b32.xlu1 %v991_v63, %s4025_s1  ;;  %v1424_v63 = vld [vmem:[#allocation10 + $0x88] sm:$0xff] }
 0x516   :  { %971 = vrot.lane.b32.xlu1 %v962_v4, %s4025_s1 }
 0x580   :  { %v840_v8 = vpop.permute.xlu1 %839 }
 0x581   :  { %v842_v11 = vadd.f32 %v840_v8, %v836_v6  ;;  %v4349_v8 = vpack.c.bf16 %v1426_v0, %v1424_v63 }
 0x583   :  { %3841 = vtanh.f32 %v842_v11  ;;  %851 = vrot.lane.b32.xlu1 %v842_v11, %s4025_s1  ;;  %v1425_v11 = vld [vmem:[#allocation10 + $0x90] sm:$0xff]  ;;  %3556 = vmatprep.subr.bf16.mxu0 %v4349_v8 }
 0x584   :  { %v994_v18 = vpop.permute.xlu1 %993 }
 0x585   :  { %v996_v20 = vadd.f32 %v994_v18, %v990_v17  ;;  %v1430_v17 = vld [vmem:[#allocation10 + $0xb8] sm:$0xff]  ;;  %v4351_v18 = vpack.c.bf16 %v1425_v11, %v1423_v2  ;;  %v1651_v2 = vld [vmem:[#allocation10 + $0x60] sm:$0xff]  ;;  %v1653_v11 = vld [vmem:[#allocation10 + $0x70] sm:$0xff] }
 0x586   :  { %v4353_v19 = vpack.c.bf16 %v1430_v17, %v1428_v50  ;;  %v4398_v17 = vpack.c.bf16 %v1653_v11, %v1651_v2 }
 0x587   :  { %3843 = vtanh.f32 %v996_v20  ;;  %v1011_v36 = vrot.slane %v996_v20, %v4162_v34  ;;  %v1427_v20 = vld [vmem:[#allocation10 + $0xa0] sm:$0xff] }
 0x588   :  { %v972_v37 = vpop.permute.xlu1 %971 }
 0x589   :  { %v973_v39 = vrot.slane %v972_v37, 2 }
 0x58b   :  { %v975_v40 = vmul.f32 0.5, %v973_v39 }
 0x58d   :  { %v3842_v29 = vpop.eup %3841  ;;  %3845 = vtanh.f32 %v975_v40  ;;  %v1434_v40 = vld [vmem:[#allocation10 + $0xd8] sm:$0xff] }
 0x58e   :  { %v844_v31 = vmul.f32 %v3842_v29, %v831_v27  ;;  %v4358_v27 = vpack.c.bf16 %v1429_v25, %v1427_v20 }
 0x590   :  { %846 = vrot.lane.b32.xlu0 %v844_v31, %s4025_s1  ;;  %v1640_v31 = vld [vmem:[#allocation10 + $0x8] sm:$0xff] }
 0x591   :  { %v3844_v33 = vpop.eup %3843 }
 0x594   :  { %999 = vrot.lane.b32.xlu0 %v3844_v33, %s4025_s1  ;;  %v1642_v33 = vld [vmem:[#allocation10 + $0x18] sm:$0xff] }
 0x595   :  { %v4361_v39 = vpack.c.bf16 %v1642_v33, %v1640_v31 }
 0x597   :  { %v3846_v46 = vpop.eup %3845 }
 0x598   :  { %1012 = vrot.lane.b32.xlu0 %v1011_v36, %s4025_s1  ;;  %v977_v47 = vmul.f32 0.5, %v3846_v46  ;;  %v1432_v36 = vld [vmem:[#allocation10 + $0xc8] sm:$0xff] }
 0x59a   :  { %v978_v49 = vadd.f32 0.5, %v977_v47  ;;  %v4363_v47 = vpack.c.bf16 %v1434_v40, %v1432_v36 }
 0x5f5   :  { %v852_v41 = vpop.permute.xlu1 %851 }
 0x5f6   :  { %854 = vst.msk [vmem:[#allocation3 + $0x2] sm:$0x3] %vm70_vm0, %v852_v41  ;;  %v1639_v41 = vld [vmem:[#allocation10] sm:$0xff] }
 0x5fd   :  { %v1033_v43 = vld [vmem:[#allocation3 + $0x2] sm:$0x3] }
 0x5fe   :  { %1222 = vrot.lane.b32.xlu1 %v1033_v43, %s4025_s1  ;;  %v1641_v43 = vld [vmem:[#allocation10 + $0x10] sm:$0xff] }
 0x602   :  { %v847_v48 = vpop.permute.xlu0 %846 }
 0x603   :  { %849 = vst.msk [vmem:[#allocation2 + $0x2] sm:$0x3] %vm70_vm0, %v847_v48  ;;  %856 = vst.msk [vmem:[#allocation4 + $0x2] sm:$0x3] %vm70_vm0, %v847_v48  ;;  %v4365_v48 = vpack.c.bf16 %v1641_v43, %v1639_v41 }
 0x606   :  { %v1000_v5 = vpop.permute.xlu0 %999 }
 0x607   :  { %v1002_v9 = vmul.f32 %v1000_v5, %v978_v49  ;;  %v1431_v49 = vld [vmem:[#allocation10 + $0xc0] sm:$0xff]  ;;  %v1433_v5 = vld [vmem:[#allocation10 + $0xd0] sm:$0xff] }
 0x609   :  { %1003 = vst.msk [vmem:[#allocation2] sm:$0x3] %vm70_vm0, %v1002_v9 }
 0x60a   :  { %v1013_v10 = vpop.permute.xlu0 %1012  ;;  %v1032_v15 = vld [vmem:[#allocation2 + $0x2] sm:$0x3] }
 0x60b   :  { %1015 = vst.msk [vmem:[#allocation3] sm:$0x3] %vm70_vm0, %v1013_v10  ;;  %3365 = vmatmul.mubr.msk.f32.vlgmr.msra.gmra.mrb[6].mxu1 %vm94_vm1, %v1032_v15  ;;  %v4368_v10 = vpack.c.bf16 %v1433_v5, %v1431_v49  ;;  %v1405_v49 = vld [vmem:[#allocation8] sm:$0xff]  ;;  %v1407_v5 = vld [vmem:[#allocation8 + $0x10] sm:$0xff] }
 0x60c   :  { %3526 = vmatpush1.bf16.msra.mxu1 %v4197_v21  ;;  %1191 = vmatprep.mubr.f32.mxu1 %v4028_v1 }
 0x60d   :  { %3528 = vmatprep.subr.bf16.mxu1 %v4200_v24 }
 0x610   :  { %3530 = vmatpush1.bf16.msra.mxu1 %v4206_v28  ;;  %v1248_v16 = vld [vmem:[#allocation2] sm:$0x3] }
 0x611   :  { %3368 = vmatmul.mubr.msk.f32.vlgmr.msra.gmra.mrb[4].mxu0 %vm94_vm1, %v1248_v16  ;;  %3532 = vmatprep.subr.bf16.mxu1 %v4209_v35  ;;  %v1644_v16 = vld [vmem:[#allocation10 + $0x28] sm:$0xff] }
 0x612   :  { %v3369_v54 = vld.sshfl [vmem:[#allocation3] sm:$0x3 pattern:$0x76325410]  ;;  %1506 = vmatprep.mubr.f32.mxu0 %v4028_v1  ;;  %3558 = vmatpush1.bf16.msra.mxu0 %v4351_v18 }
 0x613   :  { %1376 = vrot.lane.b32.xlu1 %v3369_v54, %s4025_s1  ;;  %3560 = vmatprep.subr.bf16.mxu0 %v4353_v19  ;;  %v1646_v54 = vld [vmem:[#allocation10 + $0x38] sm:$0xff] }
 0x614   :  { %3534 = vmatpush1.bf16.msra.mxu1 %v4211_v38  ;;  %v1203_v38 = vrot.slane %v3367_v55, %v4251_v7 }
 0x615   :  { %3536 = vmatprep.subr.bf16.mxu1 %v4214_v42 }
 0x616   :  { %3562 = vmatpush1.bf16.msra.mxu0 %v4358_v27 }
 0x617   :  { %3564 = vmatprep.subr.bf16.mxu0 %v4363_v47 }
 0x618   :  { %3538 = vmatpush1.bf16.msra.mxu1 %v4217_v45 }
 0x619   :  { %3588 = vmatprep.subr.bf16.mxu1 %v4361_v39 }
 0x61a   :  { %3566 = vmatpush1.bf16.msra.mxu0 %v4368_v10 }
 0x61b   :  { %3366 = vmatmul.mubr.msk.f32.vlgmr.msra.gmra.mrb[6].mxu1 %vm94_vm1, %v1002_v9 }
 0x61c   :  { %1722 = vmatprep.mubr.f32.mxu1 %v4028_v1  ;;  %3590 = vmatpush1.bf16.msra.mxu1 %v4365_v48 }
 0x670   :  { %v1223_v29 = vpop.permute.xlu1 %1222 }
 0x685   :  { %v1377_v15 = vpop.permute.xlu1 %1376 }
 0x6e4   :  { %v1335_v21 = vpop.f32.mrb[4].mxu0 }
 0x6e5   :  { %v1337_v24 = vpop.f32.mrb[5].mxu0 }
 0x6e6   :  { %v1342_v28 = vcombine.low %v1335_v21, %v1337_v24  ;;  %v4374_v24 = vpack.c.bf16 %v1646_v54, %v1644_v16  ;;  %v1412_v16 = vld [vmem:[#allocation8 + $0x38] sm:$0xff] }
 0x6e8   :  { %v1349_v35 = vrot.slane %v1342_v28, %v4162_v34  ;;  %v1436_v28 = vld [vmem:[#allocation10 + $0xe8] sm:$0xff]  ;;  %3592 = vmatprep.subr.bf16.mxu1 %v4374_v24 }
 0x6ea   :  { %v1351_v23 = vadd.f32 %v1349_v35, %v1247_v22  ;;  %v1438_v22 = vld [vmem:[#allocation10 + $0xf8] sm:$0xff]  ;;  %v1643_v35 = vld [vmem:[#allocation10 + $0x20] sm:$0xff] }
 0x6ec   :  { %v1352_v42 = vmul.f32 0.5, %v1351_v23  ;;  %v1357_v12 = vrot.slane %v1351_v23, 2 }
 0x6ee   :  { %v1193_v60 = vpop.f32.mrb[6].mxu1  ;;  %3847 = vtanh.f32 %v1352_v42  ;;  %v1435_v42 = vld [vmem:[#allocation10 + $0xe0] sm:$0xff] }
 0x6ef   :  { %v1210_v45 = vadd.f32 %v1203_v38, %v1193_v60  ;;  %v1195_v61 = vpop.f32.mrb[7].mxu1  ;;  %v1645_v38 = vld [vmem:[#allocation10 + $0x30] sm:$0xff] }
 0x6f0   :  { %v1211_v26 = vadd.f32 %v1207_v3, %v1195_v61  ;;  %v1437_v60 = vld [vmem:[#allocation10 + $0xf0] sm:$0xff]  ;;  %v4379_v3 = vpack.c.bf16 %v1645_v38, %v1643_v35 }
 0x6f1   :  { %v1212_v4 = vmul.f32 0.5, %v1210_v45  ;;  %v1411_v35 = vld [vmem:[#allocation8 + $0x30] sm:$0xff] }
 0x6f2   :  { %v1217_v6 = vmul.f32 0.5, %v1211_v26  ;;  %3594 = vmatpush1.bf16.msra.mxu1 %v4379_v3 }
 0x6f3   :  { %3849 = vtanh.f32 %v1212_v4  ;;  %v4381_v4 = vpack.c.bf16 %v1437_v60, %v1435_v42  ;;  %v1414_v42 = vld [vmem:[#allocation8 + $0x48] sm:$0xff]  ;;  %v1416_v60 = vld [vmem:[#allocation8 + $0x58] sm:$0xff] }
 0x6f4   :  { %3851 = vtanh.f32 %v1211_v26  ;;  %v1648_v26 = vld [vmem:[#allocation10 + $0x48] sm:$0xff] }
 0x6f5   :  { %3853 = vtanh.f32 %v1357_v12  ;;  %v1650_v12 = vld [vmem:[#allocation10 + $0x58] sm:$0xff] }
 0x6f6   :  { %3855 = vtanh.f32 %v1217_v6 }
 0x6f8   :  { %v3848_v13 = vpop.eup %3847 }
 0x6f9   :  { %v1354_v53 = vmul.f32 0.5, %v3848_v13  ;;  %v4386_v13 = vpack.c.bf16 %v1650_v12, %v1648_v26  ;;  %v1413_v26 = vld [vmem:[#allocation8 + $0x40] sm:$0xff]  ;;  %v1415_v12 = vld [vmem:[#allocation8 + $0x50] sm:$0xff] }
 0x6fb   :  { %v1355_v58 = vadd.f32 0.5, %v1354_v53  ;;  %v1647_v53 = vld [vmem:[#allocation10 + $0x40] sm:$0xff]  ;;  %3596 = vmatprep.subr.bf16.mxu1 %v4386_v13 }
 0x6fd   :  { %v3850_v51 = vpop.eup %3849  ;;  %v1379_v21 = vmul.f32 %v1377_v15, %v1355_v58  ;;  %v1410_v15 = vld [vmem:[#allocation8 + $0x28] sm:$0xff] }
 0x6fe   :  { %v1214_v52 = vmul.f32 0.5, %v3850_v51  ;;  %v3852_v44 = vpop.eup %3851  ;;  %v1406_v51 = vld [vmem:[#allocation8 + $0x8] sm:$0xff] }
 0x6ff   :  { %v3854_v59 = vpop.eup %3853 }
 0x700   :  { %v1215_v56 = vadd.f32 0.5, %v1214_v52  ;;  %v1380_v62 = vmul.f32 %v3854_v59, %v1355_v58  ;;  %v3856_v45 = vpop.eup %3855  ;;  %v1408_v52 = vld [vmem:[#allocation8 + $0x18] sm:$0xff]  ;;  %v1652_v59 = vld [vmem:[#allocation10 + $0x68] sm:$0xff] }
 0x702   :  { %v1226_v57 = vmul.f32 %v3852_v44, %v1215_v56  ;;  %v1225_v37 = vmul.f32 %v1223_v29, %v1215_v56  ;;  %v1219_v56 = vmul.f32 0.5, %v3856_v45  ;;  %v4388_v44 = vpack.c.bf16 %v1408_v52, %v1406_v51  ;;  %v1418_v51 = vld [vmem:[#allocation8 + $0x68] sm:$0xff]  ;;  %v1420_v52 = vld [vmem:[#allocation8 + $0x78] sm:$0xff] }
 0x704   :  { %1228 = vrot.lane.b32.xlu0 %v1226_v57, %s4025_s1  ;;  %v1649_v57 = vld [vmem:[#allocation10 + $0x50] sm:$0xff]  ;;  %v1220_v63 = vadd.f32 0.5, %v1219_v56  ;;  %v4425_v56 = vpack.c.bf16 %v1415_v12, %v1413_v26 }
 0x705   :  { %v4391_v58 = vpack.c.bf16 %v1649_v57, %v1647_v53  ;;  %v4429_v57 = vpack.c.bf16 %v1420_v52, %v1418_v51 }
 0x707   :  { %3598 = vmatpush1.bf16.msra.mxu1 %v4391_v58 }
 0x708   :  { %1382 = vrot.lane.b32.xlu0 %v1380_v62, %s4025_s1  ;;  %v1654_v62 = vld [vmem:[#allocation10 + $0x78] sm:$0xff] }
 0x709   :  { %v4395_v0 = vpack.c.bf16 %v1654_v62, %v1652_v59  ;;  %v1417_v59 = vld [vmem:[#allocation8 + $0x60] sm:$0xff]  ;;  %v1419_v62 = vld [vmem:[#allocation8 + $0x70] sm:$0xff] }
 0x70a   :  { %v4436_v2 = vpack.c.bf16 %v1419_v62, %v1417_v59 }
 0x70b   :  { %3600 = vmatprep.subr.bf16.mxu1 %v4395_v0 }
 0x70c   :  { %1360 = vrot.lane.b32.xlu0 %v1351_v23, %s4025_s1  ;;  %v4376_v23 = vpack.c.bf16 %v1438_v22, %v1436_v28  ;;  %3602 = vmatpush1.bf16.msra.mxu1 %v4398_v17  ;;  %v4413_v28 = vpack.c.bf16 %v1412_v16, %v1410_v15  ;;  %v1409_v22 = vld [vmem:[#allocation8 + $0x20] sm:$0xff] }
 0x70d   :  { %3604 = vmatprep.subr.bf16.mxu1 %v4349_v8  ;;  %v4418_v45 = vpack.c.bf16 %v1411_v35, %v1409_v22 }
 0x70e   :  { %3568 = vmatprep.subr.bf16.mxu0 %v4376_v23 }
 0x70f   :  { %3570 = vmatpush1.bf16.msra.mxu0 %v4381_v4 }
 0x710   :  { %3572 = vmatprep.subr.bf16.mxu0 %v4388_v44 }
 0x776   :  { %v1229_v46 = vpop.permute.xlu0 %1228 }
 0x777   :  { %v1231_v9 = vadd.f32 %v1229_v46, %v1225_v37 }
 0x779   :  { %3857 = vtanh.f32 %v1231_v9  ;;  %1240 = vrot.lane.b32.xlu0 %v1231_v9, %s4025_s1 }
 0x77a   :  { %v1383_v55 = vpop.permute.xlu0 %1382 }
 0x77b   :  { %v1385_v61 = vadd.f32 %v1383_v55, %v1379_v21  ;;  %v4410_v21 = vpack.c.bf16 %v1407_v5, %v1405_v49 }
 0x77d   :  { %3859 = vtanh.f32 %v1385_v61  ;;  %v1400_v25 = vrot.slane %v1385_v61, %v4162_v34  ;;  %v4422_v61 = vpack.c.bf16 %v1416_v60, %v1414_v42 }
 0x77e   :  { %v1361_v29 = vpop.permute.xlu0 %1360 }
 0x77f   :  { %v1362_v31 = vrot.slane %v1361_v29, 2  ;;  %v3372_v29 = vld [vmem:[%s4698_s3 + $0x2] sm:$0x3] }
 0x781   :  { %v1364_v33 = vmul.f32 0.5, %v1362_v31 }
 0x783   :  { %v3858_v6 = vpop.eup %3857  ;;  %3861 = vtanh.f32 %v1364_v33  ;;  %v1592_v33 = vrot.slane %v3372_v29, %v4251_v7 }
 0x784   :  { %v1233_v50 = vmul.f32 %v3858_v6, %v1220_v63 }
 0x786   :  { %1235 = vrot.lane.b32.xlu1 %v1233_v50, %s4025_s1 }
 0x787   :  { %v3860_v20 = vpop.eup %3859 }
 0x78a   :  { %1388 = vrot.lane.b32.xlu1 %v3860_v20, %s4025_s1  ;;  %v1636_v20 = vld [vmem:[#allocation6 + $0x10] sm:$0xf] }
 0x78d   :  { %v3862_v40 = vpop.eup %3861 }
 0x78e   :  { %1401 = vrot.lane.b32.xlu1 %v1400_v25, %s4025_s1  ;;  %v1366_v41 = vmul.f32 0.5, %v3862_v40 }
 0x790   :  { %v1367_v46 = vadd.f32 0.5, %v1366_v41 }
 0x7eb   :  { %v1241_v36 = vpop.permute.xlu0 %1240 }
 0x7ec   :  { %1243 = vst.msk [vmem:[#allocation3 + $0x2] sm:$0x3] %vm70_vm0, %v1241_v36 }
 0x7f3   :  { %v1422_v37 = vld [vmem:[#allocation3 + $0x2] sm:$0x3] }
 0x7f4   :  { %1611 = vrot.lane.b32.xlu0 %v1422_v37, %s4025_s1 }
 0x7f8   :  { %v1236_v43 = vpop.permute.xlu1 %1235 }
 0x7f9   :  { %1238 = vst.msk [vmem:[#allocation2 + $0x2] sm:$0x3] %vm70_vm0, %v1236_v43  ;;  %1245 = vst.msk [vmem:[#allocation4 + $0x4] sm:$0x3] %vm70_vm0, %v1236_v43  ;;  %v1596_v43 = vrot.slane %v3372_v29, %v4258_v14 }
 0x7fc   :  { %v1389_v9 = vpop.permute.xlu1 %1388 }
 0x7fd   :  { %v1391_v54 = vmul.f32 %v1389_v9, %v1367_v46 }
 0x7ff   :  { %1392 = vst.msk [vmem:[#allocation2] sm:$0x3] %vm70_vm0, %v1391_v54 }
 0x800   :  { %v1402_v55 = vpop.permute.xlu1 %1401  ;;  %v1421_v38 = vld [vmem:[#allocation2 + $0x2] sm:$0x3] }
 0x801   :  { %1404 = vst.msk [vmem:[#allocation3] sm:$0x3] %vm70_vm0, %v1402_v55  ;;  %3370 = vmatmul.mubr.msk.f32.vlgmr.msra.gmra.mrb[6].mxu0 %vm94_vm1, %v1421_v38 }
 0x802   :  { %3574 = vmatpush1.bf16.msra.mxu0 %v4410_v21  ;;  %1580 = vmatprep.mubr.f32.mxu0 %v4028_v1 }
 0x803   :  { %3576 = vmatprep.subr.bf16.mxu0 %v4413_v28 }
 0x806   :  { %3578 = vmatpush1.bf16.msra.mxu0 %v4418_v45  ;;  %v1637_v53 = vld [vmem:[#allocation2] sm:$0x3] }
 0x807   :  { %3373 = vmatmul.mubr.msk.f32.vlgmr.msra.gmra.mrb[8].mxu1 %vm94_vm1, %v1637_v53  ;;  %3580 = vmatprep.subr.bf16.mxu0 %v4422_v61 }
 0x808   :  { %v3374_v63 = vld.sshfl [vmem:[#allocation3] sm:$0x3 pattern:$0x76325410]  ;;  %3606 = vmatpush1.bf16.msra.mxu1 %v4351_v18  ;;  %1895 = vmatprep.mubr.f32.mxu1 %v4028_v1 }
 0x809   :  { %1765 = vrot.lane.b32.xlu0 %v3374_v63, %s4025_s1  ;;  %3608 = vmatprep.subr.bf16.mxu1 %v4353_v19 }
 0x80a   :  { %3582 = vmatpush1.bf16.msra.mxu0 %v4425_v56 }
 0x80b   :  { %3584 = vmatprep.subr.bf16.mxu0 %v4429_v57 }
 0x80c   :  { %3610 = vmatpush1.bf16.msra.mxu1 %v4358_v27 }
 0x80d   :  { %3612 = vmatprep.subr.bf16.mxu1 %v4363_v47 }
 0x80e   :  { %3586 = vmatpush1.bf16.msra.mxu0 %v4436_v2 }
 0x80f   :  { %3636 = vmatprep.subr.bf16.mxu0 %v4361_v39 }
 0x810   :  { %3614 = vmatpush1.bf16.msra.mxu1 %v4368_v10 }
 0x811   :  { %3371 = vmatmul.mubr.msk.f32.vlgmr.msra.gmra.mrb[6].mxu0 %vm94_vm1, %v1391_v54  ;;  %3616 = vmatprep.subr.bf16.mxu1 %v4376_v23 }
 0x812   :  { %3638 = vmatpush1.bf16.msra.mxu0 %v4365_v48  ;;  %2111 = vmatprep.mubr.f32.mxu0 %v4028_v1 }
 0x813   :  { %3640 = vmatprep.subr.bf16.mxu0 %v4374_v24 }
 0x814   :  { %3618 = vmatpush1.bf16.msra.mxu1 %v4381_v4 }
 0x815   :  { %3620 = vmatprep.subr.bf16.mxu1 %v4388_v44 }
 0x816   :  { %3642 = vmatpush1.bf16.msra.mxu0 %v4379_v3 }
 0x817   :  { %3644 = vmatprep.subr.bf16.mxu0 %v4386_v13 }
 0x81a   :  { %3646 = vmatpush1.bf16.msra.mxu0 %v4391_v58 }
 0x81b   :  { %3648 = vmatprep.subr.bf16.mxu0 %v4395_v0 }
 0x81e   :  { %3650 = vmatpush1.bf16.msra.mxu0 %v4398_v17 }
 0x81f   :  { %3652 = vmatprep.subr.bf16.mxu0 %v4349_v8 }
 0x866   :  { %v1612_v26 = vpop.permute.xlu0 %1611 }
 0x87b   :  { %v1766_v53 = vpop.permute.xlu0 %1765 }
 0x8da   :  { %v1724_v6 = vpop.f32.mrb[8].mxu1 }
 0x8db   :  { %v1726_v11 = vpop.f32.mrb[9].mxu1 }
 0x8dc   :  { %v1731_v50 = vcombine.low %v1724_v6, %v1726_v11 }
 0x8de   :  { %v1738_v25 = vrot.slane %v1731_v50, %v4162_v34 }
 0x8e0   :  { %v1740_v31 = vadd.f32 %v1738_v25, %v1636_v20 }
 0x8e2   :  { %v1741_v36 = vmul.f32 0.5, %v1740_v31  ;;  %v1746_v49 = vrot.slane %v1740_v31, 2 }
 0x8e4   :  { %v1582_v37 = vpop.f32.mrb[6].mxu0  ;;  %3863 = vtanh.f32 %v1741_v36 }
 0x8e5   :  { %v1599_v40 = vadd.f32 %v1592_v33, %v1582_v37  ;;  %v1584_v41 = vpop.f32.mrb[7].mxu0 }
 0x8e6   :  { %v1600_v46 = vadd.f32 %v1596_v43, %v1584_v41 }
 0x8e7   :  { %v1601_v8 = vmul.f32 0.5, %v1599_v40 }
 0x8e8   :  { %v1606_v60 = vmul.f32 0.5, %v1600_v46 }
 0x8e9   :  { %3865 = vtanh.f32 %v1601_v8 }
 0x8ea   :  { %3867 = vtanh.f32 %v1600_v46 }
 0x8eb   :  { %3869 = vtanh.f32 %v1746_v49 }
 0x8ec   :  { %3871 = vtanh.f32 %v1606_v60 }
 0x8ee   :  { %v3864_v5 = vpop.eup %3863 }
 0x8ef   :  { %v1743_v16 = vmul.f32 0.5, %v3864_v5 }
 0x8f1   :  { %v1744_v55 = vadd.f32 0.5, %v1743_v16 }
 0x8f3   :  { %v3866_v9 = vpop.eup %3865  ;;  %v1768_v59 = vmul.f32 %v1766_v53, %v1744_v55 }
 0x8f4   :  { %v1603_v15 = vmul.f32 0.5, %v3866_v9  ;;  %v3868_v22 = vpop.eup %3867 }
 0x8f5   :  { %v3870_v38 = vpop.eup %3869 }
 0x8f6   :  { %v1604_v54 = vadd.f32 0.5, %v1603_v15  ;;  %v1769_v42 = vmul.f32 %v3870_v38, %v1744_v55  ;;  %v3872_v63 = vpop.eup %3871 }
 0x8f7   :  { %v1608_v11 = vmul.f32 0.5, %v3872_v63 }
 0x8f8   :  { %v1615_v35 = vmul.f32 %v3868_v22, %v1604_v54  ;;  %v1614_v12 = vmul.f32 %v1612_v26, %v1604_v54 }
 0x8f9   :  { %v1609_v50 = vadd.f32 0.5, %v1608_v11 }
 0x8fa   :  { %1617 = vrot.lane.b32.xlu1 %v1615_v35, %s4025_s1 }
 0x8fe   :  { %1771 = vrot.lane.b32.xlu1 %v1769_v42, %s4025_s1 }
 0x902   :  { %1749 = vrot.lane.b32.xlu1 %v1740_v31, %s4025_s1 }
 0x96c   :  { %v1618_v51 = vpop.permute.xlu1 %1617 }
 0x96d   :  { %v1620_v52 = vadd.f32 %v1618_v51, %v1614_v12 }
 0x96f   :  { %3873 = vtanh.f32 %v1620_v52  ;;  %1629 = vrot.lane.b32.xlu1 %v1620_v52, %s4025_s1 }
 0x970   :  { %v1772_v62 = vpop.permute.xlu1 %1771 }
 0x971   :  { %v1774_v6 = vadd.f32 %v1772_v62, %v1768_v59 }
 0x973   :  { %3875 = vtanh.f32 %v1774_v6  ;;  %v1789_v31 = vrot.slane %v1774_v6, %v4162_v34 }
 0x974   :  { %v1750_v33 = vpop.permute.xlu1 %1749 }
 0x975   :  { %v1751_v36 = vrot.slane %v1750_v33, 2 }
 0x977   :  { %v1753_v37 = vmul.f32 0.5, %v1751_v36 }
 0x979   :  { %v3874_v20 = vpop.eup %3873  ;;  %3877 = vtanh.f32 %v1753_v37 }
 0x97a   :  { %v1622_v25 = vmul.f32 %v3874_v20, %v1609_v50 }
 0x97c   :  { %1624 = vrot.lane.b32.xlu0 %v1622_v25, %s4025_s1 }
 0x97d   :  { %v3876_v29 = vpop.eup %3875 }
 0x980   :  { %1777 = vrot.lane.b32.xlu0 %v3876_v29, %s4025_s1 }
 0x983   :  { %v3878_v43 = vpop.eup %3877 }
 0x984   :  { %1790 = vrot.lane.b32.xlu0 %v1789_v31, %s4025_s1  ;;  %v1755_v8 = vmul.f32 0.5, %v3878_v43 }
 0x986   :  { %v1756_v49 = vadd.f32 0.5, %v1755_v8 }
 0x9e1   :  { %v1630_v40 = vpop.permute.xlu1 %1629 }
 0x9e2   :  { %1632 = vst.msk [vmem:[#allocation3 + $0x2] sm:$0x3] %vm70_vm0, %v1630_v40 }
 0x9e9   :  { %v1811_v41 = vld [vmem:[#allocation3 + $0x2] sm:$0x3] }
 0x9ea   :  { %2000 = vrot.lane.b32.xlu1 %v1811_v41, %s4025_s1 }
 0x9ee   :  { %v1625_v46 = vpop.permute.xlu0 %1624 }
 0x9ef   :  { %1627 = vst.msk [vmem:[#allocation2 + $0x2] sm:$0x3] %vm70_vm0, %v1625_v46  ;;  %1634 = vst.msk [vmem:[#allocation4 + $0x6] sm:$0x3] %vm70_vm0, %v1625_v46 }
 0x9f2   :  { %v1778_v5 = vpop.permute.xlu0 %1777 }
 0x9f3   :  { %v1780_v9 = vmul.f32 %v1778_v5, %v1756_v49 }
 0x9f5   :  { %1781 = vst.msk [vmem:[#allocation2] sm:$0x3] %vm70_vm0, %v1780_v9 }
 0x9f6   :  { %v1791_v15 = vpop.permute.xlu0 %1790  ;;  %v1810_v16 = vld [vmem:[#allocation2 + $0x2] sm:$0x3] }
 0x9f7   :  { %1793 = vst.msk [vmem:[#allocation3] sm:$0x3] %vm70_vm0, %v1791_v15  ;;  %3375 = vmatmul.mubr.msk.f32.vlgmr.msra.gmra.mrb[10].mxu1 %vm94_vm1, %v1810_v16 }
 0x9f8   :  { %3622 = vmatpush1.bf16.msra.mxu1 %v4410_v21  ;;  %1969 = vmatprep.mubr.f32.mxu1 %v4028_v1 }
 0x9f9   :  { %3624 = vmatprep.subr.bf16.mxu1 %v4413_v28 }
 0x9fc   :  { %3626 = vmatpush1.bf16.msra.mxu1 %v4418_v45  ;;  %v2026_v54 = vld [vmem:[#allocation2] sm:$0x3] }
 0x9fd   :  { %3378 = vmatmul.mubr.msk.f32.vlgmr.msra.gmra.mrb[8].mxu0 %vm94_vm1, %v2026_v54  ;;  %3628 = vmatprep.subr.bf16.mxu1 %v4422_v61 }
 0x9fe   :  { %v3379_v22 = vld.sshfl [vmem:[#allocation3] sm:$0x3 pattern:$0x76325410]  ;;  %3654 = vmatpush1.bf16.msra.mxu0 %v4351_v18  ;;  %2284 = vmatprep.mubr.f32.mxu0 %v4028_v1 }
 0x9ff   :  { %2154 = vrot.lane.b32.xlu1 %v3379_v22, %s4025_s1  ;;  %3656 = vmatprep.subr.bf16.mxu0 %v4353_v19 }
 0xa00   :  { %3630 = vmatpush1.bf16.msra.mxu1 %v4425_v56 }
 0xa01   :  { %3632 = vmatprep.subr.bf16.mxu1 %v4429_v57 }
 0xa02   :  { %3658 = vmatpush1.bf16.msra.mxu0 %v4358_v27 }
 0xa03   :  { %3660 = vmatprep.subr.bf16.mxu0 %v4363_v47 }
 0xa04   :  { %3634 = vmatpush1.bf16.msra.mxu1 %v4436_v2 }
 0xa05   :  { %3684 = vmatprep.subr.bf16.mxu1 %v4361_v39  ;;  %v2025_v39 = vld [vmem:[#allocation6 + $0x14] sm:$0xf] }
 0xa06   :  { %3662 = vmatpush1.bf16.msra.mxu0 %v4368_v10 }
 0xa07   :  { %3376 = vmatmul.mubr.msk.f32.vlgmr.msra.gmra.mrb[10].mxu1 %vm94_vm1, %v1780_v9  ;;  %3664 = vmatprep.subr.bf16.mxu0 %v4376_v23 }
 0xa08   :  { %3686 = vmatpush1.bf16.msra.mxu1 %v4365_v48  ;;  %2500 = vmatprep.mubr.f32.mxu1 %v4028_v1  ;;  %v3377_v48 = vld [vmem:[%s4698_s3 + $0x2] sm:$0x3] }
 0xa09   :  { %3688 = vmatprep.subr.bf16.mxu1 %v4374_v24  ;;  %v1981_v24 = vrot.slane %v3377_v48, %v4251_v7 }
 0xa0a   :  { %3666 = vmatpush1.bf16.msra.mxu0 %v4381_v4 }
 0xa0b   :  { %3668 = vmatprep.subr.bf16.mxu0 %v4388_v44  ;;  %v1985_v44 = vrot.slane %v3377_v48, %v4258_v14 }
 0xa0c   :  { %3690 = vmatpush1.bf16.msra.mxu1 %v4379_v3 }
 0xa0d   :  { %3692 = vmatprep.subr.bf16.mxu1 %v4386_v13 }
 0xa10   :  { %3694 = vmatpush1.bf16.msra.mxu1 %v4391_v58 }
 0xa11   :  { %3696 = vmatprep.subr.bf16.mxu1 %v4395_v0 }
 0xa14   :  { %3698 = vmatpush1.bf16.msra.mxu1 %v4398_v17 }
 0xa5c   :  { %v2001_v62 = vpop.permute.xlu1 %2000 }
 0xa71   :  { %v2155_v50 = vpop.permute.xlu1 %2154 }
 0xad0   :  { %v2113_v18 = vpop.f32.mrb[8].mxu0 }
 0xad1   :  { %v2115_v19 = vpop.f32.mrb[9].mxu0 }
 0xad2   :  { %v2120_v27 = vcombine.low %v2113_v18, %v2115_v19 }
 0xad4   :  { %v2127_v47 = vrot.slane %v2120_v27, %v4162_v34 }
 0xad6   :  { %v2129_v10 = vadd.f32 %v2127_v47, %v2025_v39 }
 0xad8   :  { %v2130_v23 = vmul.f32 0.5, %v2129_v10  ;;  %v2135_v17 = vrot.slane %v2129_v10, 2 }
 0xada   :  { %v1971_v3 = vpop.f32.mrb[10].mxu1  ;;  %3879 = vtanh.f32 %v2130_v23 }
 0xadb   :  { %v1988_v4 = vadd.f32 %v1981_v24, %v1971_v3  ;;  %v1973_v13 = vpop.f32.mrb[11].mxu1  ;;  %v3382_v24 = vld [vmem:[%s4698_s3 + $0x2] sm:$0x3] }
 0xadc   :  { %v1989_v0 = vadd.f32 %v1985_v44, %v1973_v13  ;;  %v2374_v13 = vrot.slane %v3382_v24, %v4258_v14 }
 0xadd   :  { %v1990_v58 = vmul.f32 0.5, %v1988_v4 }
 0xade   :  { %v1995_v59 = vmul.f32 0.5, %v1989_v0 }
 0xadf   :  { %3881 = vtanh.f32 %v1990_v58 }
 0xae0   :  { %3883 = vtanh.f32 %v1989_v0 }
 0xae1   :  { %3885 = vtanh.f32 %v2135_v17 }
 0xae2   :  { %3887 = vtanh.f32 %v1995_v59  ;;  %v2593_v59 = vld [vmem:[#allocation10 + $0x98] sm:$0xff] }
 0xae4   :  { %v3880_v35 = vpop.eup %3879 }
 0xae5   :  { %v2132_v42 = vmul.f32 0.5, %v3880_v35 }
 0xae7   :  { %v2133_v51 = vadd.f32 0.5, %v2132_v42 }
 0xae9   :  { %v3882_v55 = vpop.eup %3881  ;;  %v2157_v20 = vmul.f32 %v2155_v50, %v2133_v51  ;;  %v2595_v50 = vld [vmem:[#allocation10 + $0xa8] sm:$0xff] }
 0xaea   :  { %v1992_v38 = vmul.f32 0.5, %v3882_v55  ;;  %v3884_v26 = vpop.eup %3883 }
 0xaeb   :  { %v3886_v52 = vpop.eup %3885 }
 0xaec   :  { %v1993_v60 = vadd.f32 0.5, %v1992_v38  ;;  %v2158_v53 = vmul.f32 %v3886_v52, %v2133_v51  ;;  %v3888_v29 = vpop.eup %3887 }
 0xaed   :  { %v1997_v33 = vmul.f32 0.5, %v3888_v29 }
 0xaee   :  { %v2004_v12 = vmul.f32 %v3884_v26, %v1993_v60  ;;  %v2003_v63 = vmul.f32 %v2001_v62, %v1993_v60  ;;  %v2590_v62 = vld [vmem:[#allocation10 + $0x80] sm:$0xff] }
 0xaef   :  { %v1998_v36 = vadd.f32 0.5, %v1997_v33  ;;  %v2596_v33 = vld [vmem:[#allocation10 + $0xb0] sm:$0xff] }
 0xaf0   :  { %2006 = vrot.lane.b32.xlu0 %v2004_v12, %s4025_s1 }
 0xaf4   :  { %2160 = vrot.lane.b32.xlu0 %v2158_v53, %s4025_s1  ;;  %v2591_v53 = vld [vmem:[#allocation10 + $0x88] sm:$0xff] }
 0xaf8   :  { %2138 = vrot.lane.b32.xlu0 %v2129_v10, %s4025_s1  ;;  %v2414_v10 = vld [vmem:[#allocation6 + $0x18] sm:$0xf] }
 0xb62   :  { %v2007_v6 = vpop.permute.xlu0 %2006 }
 0xb63   :  { %v2009_v11 = vadd.f32 %v2007_v6, %v2003_v63  ;;  %v4550_v6 = vpack.c.bf16 %v2593_v59, %v2591_v53 }
 0xb65   :  { %3889 = vtanh.f32 %v2009_v11  ;;  %2018 = vrot.lane.b32.xlu0 %v2009_v11, %s4025_s1  ;;  %v2592_v11 = vld [vmem:[#allocation10 + $0x90] sm:$0xff]  ;;  %3700 = vmatprep.subr.bf16.mxu1 %v4550_v6 }
 0xb66   :  { %v2161_v25 = vpop.permute.xlu0 %2160 }
 0xb67   :  { %v2163_v31 = vadd.f32 %v2161_v25, %v2157_v20  ;;  %v2597_v20 = vld [vmem:[#allocation10 + $0xb8] sm:$0xff]  ;;  %v4552_v25 = vpack.c.bf16 %v2592_v11, %v2590_v62  ;;  %v2818_v62 = vld [vmem:[#allocation10 + $0x60] sm:$0xff]  ;;  %v2820_v11 = vld [vmem:[#allocation10 + $0x70] sm:$0xff] }
 0xb68   :  { %v4554_v29 = vpack.c.bf16 %v2597_v20, %v2595_v50  ;;  %v3745_v20 = vpack.c.bf16 %v2820_v11, %v2818_v62 }
 0xb69   :  { %3891 = vtanh.f32 %v2163_v31  ;;  %v2178_v43 = vrot.slane %v2163_v31, %v4162_v34  ;;  %v2594_v31 = vld [vmem:[#allocation10 + $0xa0] sm:$0xff] }
 0xb6a   :  { %v2139_v8 = vpop.permute.xlu0 %2138 }
 0xb6b   :  { %v2140_v46 = vrot.slane %v2139_v8, 2 }
 0xb6d   :  { %v2142_v49 = vmul.f32 0.5, %v2140_v46 }
 0xb6f   :  { %v3890_v37 = vpop.eup %3889  ;;  %3893 = vtanh.f32 %v2142_v49  ;;  %v2601_v49 = vld [vmem:[#allocation10 + $0xd8] sm:$0xff] }
 0xb70   :  { %v2011_v40 = vmul.f32 %v3890_v37, %v1998_v36  ;;  %v4559_v36 = vpack.c.bf16 %v2596_v33, %v2594_v31 }
 0xb72   :  { %2013 = vrot.lane.b32.xlu1 %v2011_v40, %s4025_s1  ;;  %v2807_v40 = vld [vmem:[#allocation10 + $0x8] sm:$0xff] }
 0xb73   :  { %v3892_v41 = vpop.eup %3891 }
 0xb76   :  { %2166 = vrot.lane.b32.xlu1 %v3892_v41, %s4025_s1  ;;  %v2809_v41 = vld [vmem:[#allocation10 + $0x18] sm:$0xff] }
 0xb77   :  { %v3731_v46 = vpack.c.bf16 %v2809_v41, %v2807_v40 }
 0xb79   :  { %v3894_v15 = vpop.eup %3893 }
 0xb7a   :  { %2179 = vrot.lane.b32.xlu1 %v2178_v43, %s4025_s1  ;;  %v2144_v16 = vmul.f32 0.5, %v3894_v15  ;;  %v2599_v43 = vld [vmem:[#allocation10 + $0xc8] sm:$0xff] }
 0xb7c   :  { %v2145_v22 = vadd.f32 0.5, %v2144_v16  ;;  %v4562_v16 = vpack.c.bf16 %v2601_v49, %v2599_v43 }
 0xbd7   :  { %v2019_v5 = vpop.permute.xlu0 %2018 }
 0xbd8   :  { %2021 = vst.msk [vmem:[#allocation3 + $0x2] sm:$0x3] %vm70_vm0, %v2019_v5  ;;  %v2806_v5 = vld [vmem:[#allocation10] sm:$0xff] }
 0xbdf   :  { %v2200_v9 = vld [vmem:[#allocation3 + $0x2] sm:$0x3] }
 0xbe0   :  { %2389 = vrot.lane.b32.xlu0 %v2200_v9, %s4025_s1  ;;  %v2808_v9 = vld [vmem:[#allocation10 + $0x10] sm:$0xff] }
 0xbe4   :  { %v2014_v54 = vpop.permute.xlu1 %2013 }
 0xbe5   :  { %2016 = vst.msk [vmem:[#allocation2 + $0x2] sm:$0x3] %vm70_vm0, %v2014_v54  ;;  %2023 = vst.msk [vmem:[#allocation4 + $0x8] sm:$0x3] %vm70_vm0, %v2014_v54  ;;  %v3733_v54 = vpack.c.bf16 %v2808_v9, %v2806_v5  ;;  %v2572_v9 = vld [vmem:[#allocation8] sm:$0xff] }
 0xbe8   :  { %v2167_v18 = vpop.permute.xlu1 %2166 }
 0xbe9   :  { %v2169_v19 = vmul.f32 %v2167_v18, %v2145_v22  ;;  %v2598_v22 = vld [vmem:[#allocation10 + $0xc0] sm:$0xff]  ;;  %v2600_v18 = vld [vmem:[#allocation10 + $0xd0] sm:$0xff] }
 0xbeb   :  { %2170 = vst.msk [vmem:[#allocation2] sm:$0x3] %vm70_vm0, %v2169_v19 }
 0xbec   :  { %v2180_v27 = vpop.permute.xlu1 %2179  ;;  %v2199_v39 = vld [vmem:[#allocation2 + $0x2] sm:$0x3] }
 0xbed   :  { %2182 = vst.msk [vmem:[#allocation3] sm:$0x3] %vm70_vm0, %v2180_v27  ;;  %3380 = vmatmul.mubr.msk.f32.vlgmr.msra.gmra.mrb[10].mxu0 %vm94_vm1, %v2199_v39  ;;  %v4564_v27 = vpack.c.bf16 %v2600_v18, %v2598_v22  ;;  %v2577_v22 = vld [vmem:[#allocation8 + $0x28] sm:$0xff]  ;;  %v2579_v18 = vld [vmem:[#allocation8 + $0x38] sm:$0xff] }
 0xbee   :  { %3670 = vmatpush1.bf16.msra.mxu0 %v4410_v21  ;;  %2358 = vmatprep.mubr.f32.mxu0 %v4028_v1 }
 0xbef   :  { %3672 = vmatprep.subr.bf16.mxu0 %v4413_v28 }
 0xbf2   :  { %3674 = vmatpush1.bf16.msra.mxu0 %v4418_v45  ;;  %v2415_v47 = vld [vmem:[#allocation2] sm:$0x3] }
 0xbf3   :  { %3383 = vmatmul.mubr.msk.f32.vlgmr.msra.gmra.mrb[12].mxu1 %vm94_vm1, %v2415_v47  ;;  %3676 = vmatprep.subr.bf16.mxu0 %v4422_v61  ;;  %v2811_v47 = vld [vmem:[#allocation10 + $0x28] sm:$0xff] }
 0xbf4   :  { %v3384_v48 = vld.sshfl [vmem:[#allocation3] sm:$0x3 pattern:$0x76325410]  ;;  %2673 = vmatprep.mubr.f32.mxu1 %v4028_v1  ;;  %3702 = vmatpush1.bf16.msra.mxu1 %v4552_v25 }
 0xbf5   :  { %2543 = vrot.lane.b32.xlu0 %v3384_v48, %s4025_s1  ;;  %3704 = vmatprep.subr.bf16.mxu1 %v4554_v29  ;;  %v2813_v48 = vld [vmem:[#allocation10 + $0x38] sm:$0xff] }
 0xbf6   :  { %3678 = vmatpush1.bf16.msra.mxu0 %v4425_v56  ;;  %v2370_v56 = vrot.slane %v3382_v24, %v4251_v7 }
 0xbf7   :  { %3680 = vmatprep.subr.bf16.mxu0 %v4429_v57 }
 0xbf8   :  { %3706 = vmatpush1.bf16.msra.mxu1 %v4559_v36 }
 0xbf9   :  { %3708 = vmatprep.subr.bf16.mxu1 %v4562_v16 }
 0xbfa   :  { %3682 = vmatpush1.bf16.msra.mxu0 %v4436_v2 }
 0xbfb   :  { %3732 = vmatprep.subr.bf16.mxu0 %v3731_v46 }
 0xbfc   :  { %3710 = vmatpush1.bf16.msra.mxu1 %v4564_v27 }
 0xbfd   :  { %3381 = vmatmul.mubr.msk.f32.vlgmr.msra.gmra.mrb[10].mxu0 %vm94_vm1, %v2169_v19 }
 0xbfe   :  { %2889 = vmatprep.mubr.f32.mxu0 %v4028_v1  ;;  %3734 = vmatpush1.bf16.msra.mxu0 %v3733_v54 }
 0xc52   :  { %v2390_v37 = vpop.permute.xlu0 %2389 }
 0xc67   :  { %v2544_v39 = vpop.permute.xlu0 %2543 }
 0xcc6   :  { %v2502_v21 = vpop.f32.mrb[12].mxu1 }
 0xcc7   :  { %v2504_v28 = vpop.f32.mrb[13].mxu1 }
 0xcc8   :  { %v2509_v45 = vcombine.low %v2502_v21, %v2504_v28  ;;  %v3735_v28 = vpack.c.bf16 %v2813_v48, %v2811_v47  ;;  %v4590_v47 = vpack.c.bf16 %v2579_v18, %v2577_v22  ;;  %v2576_v48 = vld [vmem:[#allocation8 + $0x20] sm:$0xff] }
 0xcca   :  { %v2516_v61 = vrot.slane %v2509_v45, %v4162_v34  ;;  %v2603_v45 = vld [vmem:[#allocation10 + $0xe8] sm:$0xff]  ;;  %3736 = vmatprep.subr.bf16.mxu0 %v3735_v28 }
 0xccc   :  { %v2518_v23 = vadd.f32 %v2516_v61, %v2414_v10  ;;  %v2605_v10 = vld [vmem:[#allocation10 + $0xf8] sm:$0xff]  ;;  %v2810_v61 = vld [vmem:[#allocation10 + $0x20] sm:$0xff] }
 0xcce   :  { %v2519_v57 = vmul.f32 0.5, %v2518_v23  ;;  %v2524_v0 = vrot.slane %v2518_v23, 2 }
 0xcd0   :  { %v2360_v3 = vpop.f32.mrb[10].mxu0  ;;  %3895 = vtanh.f32 %v2519_v57  ;;  %v2602_v57 = vld [vmem:[#allocation10 + $0xe0] sm:$0xff] }
 0xcd1   :  { %v2377_v2 = vadd.f32 %v2370_v56, %v2360_v3  ;;  %v2362_v4 = vpop.f32.mrb[11].mxu0  ;;  %v2812_v56 = vld [vmem:[#allocation10 + $0x30] sm:$0xff] }
 0xcd2   :  { %v2378_v58 = vadd.f32 %v2374_v13, %v2362_v4  ;;  %v2604_v3 = vld [vmem:[#allocation10 + $0xf0] sm:$0xff]  ;;  %v3737_v13 = vpack.c.bf16 %v2812_v56, %v2810_v61  ;;  %v2583_v61 = vld [vmem:[#allocation8 + $0x58] sm:$0xff] }
 0xcd3   :  { %v2379_v44 = vmul.f32 0.5, %v2377_v2 }
 0xcd4   :  { %v2384_v63 = vmul.f32 0.5, %v2378_v58  ;;  %3738 = vmatpush1.bf16.msra.mxu0 %v3737_v13 }
 0xcd5   :  { %3897 = vtanh.f32 %v2379_v44  ;;  %v4571_v44 = vpack.c.bf16 %v2604_v3, %v2602_v57  ;;  %v2580_v57 = vld [vmem:[#allocation8 + $0x40] sm:$0xff]  ;;  %v2582_v3 = vld [vmem:[#allocation8 + $0x50] sm:$0xff] }
 0xcd6   :  { %3899 = vtanh.f32 %v2378_v58  ;;  %v2815_v58 = vld [vmem:[#allocation10 + $0x48] sm:$0xff] }
 0xcd7   :  { %3901 = vtanh.f32 %v2524_v0  ;;  %v2817_v0 = vld [vmem:[#allocation10 + $0x58] sm:$0xff] }
 0xcd8   :  { %3903 = vtanh.f32 %v2384_v63 }
 0xcda   :  { %v3896_v17 = vpop.eup %3895 }
 0xcdb   :  { %v2521_v38 = vmul.f32 0.5, %v3896_v17  ;;  %v3739_v17 = vpack.c.bf16 %v2817_v0, %v2815_v58  ;;  %v4602_v58 = vpack.c.bf16 %v2582_v3, %v2580_v57 }
 0xcdd   :  { %v2522_v12 = vadd.f32 0.5, %v2521_v38  ;;  %v2814_v38 = vld [vmem:[#allocation10 + $0x40] sm:$0xff]  ;;  %3740 = vmatprep.subr.bf16.mxu0 %v3739_v17 }
 0xcde   :  { %v2584_v17 = vld [vmem:[#allocation8 + $0x60] sm:$0xff] }
 0xcdf   :  { %v3898_v35 = vpop.eup %3897  ;;  %v2546_v21 = vmul.f32 %v2544_v39, %v2522_v12 }
 0xce0   :  { %v2381_v55 = vmul.f32 0.5, %v3898_v35  ;;  %v3900_v60 = vpop.eup %3899  ;;  %v2573_v35 = vld [vmem:[#allocation8 + $0x8] sm:$0xff] }
 0xce1   :  { %v3902_v51 = vpop.eup %3901 }
 0xce2   :  { %v2382_v42 = vadd.f32 0.5, %v2381_v55  ;;  %v2547_v52 = vmul.f32 %v3902_v51, %v2522_v12  ;;  %v3904_v2 = vpop.eup %3903  ;;  %v2575_v55 = vld [vmem:[#allocation8 + $0x18] sm:$0xff]  ;;  %v2819_v51 = vld [vmem:[#allocation10 + $0x68] sm:$0xff] }
 0xce4   :  { %v2393_v26 = vmul.f32 %v3900_v60, %v2382_v42  ;;  %v2392_v8 = vmul.f32 %v2390_v37, %v2382_v42  ;;  %v2386_v42 = vmul.f32 0.5, %v3904_v2  ;;  %v4575_v60 = vpack.c.bf16 %v2575_v55, %v2573_v35  ;;  %v2585_v2 = vld [vmem:[#allocation8 + $0x68] sm:$0xff]  ;;  %v2586_v35 = vld [vmem:[#allocation8 + $0x70] sm:$0xff] }
 0xce6   :  { %2395 = vrot.lane.b32.xlu1 %v2393_v26, %s4025_s1  ;;  %v2816_v26 = vld [vmem:[#allocation10 + $0x50] sm:$0xff]  ;;  %v2387_v53 = vadd.f32 0.5, %v2386_v42 }
 0xce7   :  { %v3741_v12 = vpack.c.bf16 %v2816_v26, %v2814_v38  ;;  %v4613_v38 = vpack.c.bf16 %v2586_v35, %v2584_v17  ;;  %v2803_v26 = vld [vmem:[#allocation6 + $0x1c] sm:$0xf] }
 0xce9   :  { %3742 = vmatpush1.bf16.msra.mxu0 %v3741_v12 }
 0xcea   :  { %2549 = vrot.lane.b32.xlu1 %v2547_v52, %s4025_s1  ;;  %v2821_v52 = vld [vmem:[#allocation10 + $0x78] sm:$0xff] }
 0xceb   :  { %v3743_v59 = vpack.c.bf16 %v2821_v52, %v2819_v51 }
 0xced   :  { %3744 = vmatprep.subr.bf16.mxu0 %v3743_v59 }
 0xcee   :  { %2527 = vrot.lane.b32.xlu1 %v2518_v23, %s4025_s1  ;;  %v4569_v23 = vpack.c.bf16 %v2605_v10, %v2603_v45  ;;  %3746 = vmatpush1.bf16.msra.mxu0 %v3745_v20  ;;  %v2581_v10 = vld [vmem:[#allocation8 + $0x48] sm:$0xff] }
 0xcef   :  { %3748 = vmatprep.subr.bf16.mxu0 %v4550_v6  ;;  %v4599_v56 = vpack.c.bf16 %v2583_v61, %v2581_v10 }
 0xcf0   :  { %3712 = vmatprep.subr.bf16.mxu1 %v4569_v23 }
 0xcf1   :  { %3714 = vmatpush1.bf16.msra.mxu1 %v4571_v44 }
 0xcf2   :  { %3716 = vmatprep.subr.bf16.mxu1 %v4575_v60 }
 0xd58   :  { %v2396_v15 = vpop.permute.xlu1 %2395 }
 0xd59   :  { %v2398_v19 = vadd.f32 %v2396_v15, %v2392_v8  ;;  %v2574_v15 = vld [vmem:[#allocation8 + $0x10] sm:$0xff] }
 0xd5a   :  { %v4587_v39 = vpack.c.bf16 %v2574_v15, %v2572_v9 }
 0xd5b   :  { %3905 = vtanh.f32 %v2398_v19  ;;  %2407 = vrot.lane.b32.xlu1 %v2398_v19, %s4025_s1 }
 0xd5c   :  { %v2550_v24 = vpop.permute.xlu1 %2549 }
 0xd5d   :  { %v2552_v4 = vadd.f32 %v2550_v24, %v2546_v21  ;;  %v2578_v21 = vld [vmem:[#allocation8 + $0x30] sm:$0xff] }
 0xd5e   :  { %v4595_v24 = vpack.c.bf16 %v2578_v21, %v2576_v48 }
 0xd5f   :  { %3907 = vtanh.f32 %v2552_v4  ;;  %v2567_v33 = vrot.slane %v2552_v4, %v4162_v34  ;;  %v2587_v4 = vld [vmem:[#allocation8 + $0x78] sm:$0xff] }
 0xd60   :  { %v2528_v37 = vpop.permute.xlu1 %2527  ;;  %v4606_v0 = vpack.c.bf16 %v2587_v4, %v2585_v2 }
 0xd61   :  { %v2529_v40 = vrot.slane %v2528_v37, 2 }
 0xd63   :  { %v2531_v41 = vmul.f32 0.5, %v2529_v40 }
 0xd65   :  { %v3906_v63 = vpop.eup %3905  ;;  %3909 = vtanh.f32 %v2531_v41 }
 0xd66   :  { %v2400_v50 = vmul.f32 %v3906_v63, %v2387_v53 }
 0xd68   :  { %2402 = vrot.lane.b32.xlu0 %v2400_v50, %s4025_s1 }
 0xd69   :  { %v3908_v31 = vpop.eup %3907 }
 0xd6c   :  { %2555 = vrot.lane.b32.xlu0 %v3908_v31, %s4025_s1 }
 0xd6f   :  { %v3910_v46 = vpop.eup %3909 }
 0xd70   :  { %2568 = vrot.lane.b32.xlu0 %v2567_v33, %s4025_s1  ;;  %v2533_v49 = vmul.f32 0.5, %v3910_v46 }
 0xd72   :  { %v2534_v5 = vadd.f32 0.5, %v2533_v49 }
 0xdcd   :  { %v2408_v43 = vpop.permute.xlu1 %2407 }
 0xdce   :  { %2410 = vst.msk [vmem:[#allocation3 + $0x2] sm:$0x3] %vm70_vm0, %v2408_v43 }
 0xdd5   :  { %v2589_v8 = vld [vmem:[#allocation3 + $0x2] sm:$0x3] }
 0xdd6   :  { %2778 = vrot.lane.b32.xlu1 %v2589_v8, %s4025_s1 }
 0xdda   :  { %v2403_v6 = vpop.permute.xlu0 %2402 }
 0xddb   :  { %2405 = vst.msk [vmem:[#allocation2 + $0x2] sm:$0x3] %vm70_vm0, %v2403_v6  ;;  %2412 = vst.msk [vmem:[#allocation4 + $0xa] sm:$0x3] %vm70_vm0, %v2403_v6 }
 0xdde   :  { %v2556_v54 = vpop.permute.xlu0 %2555 }
 0xddf   :  { %v2558_v19 = vmul.f32 %v2556_v54, %v2534_v5 }
 0xde1   :  { %2559 = vst.msk [vmem:[#allocation2] sm:$0x3] %vm70_vm0, %v2558_v19 }
 0xde2   :  { %v2569_v28 = vpop.permute.xlu0 %2568  ;;  %v2588_v45 = vld [vmem:[#allocation2 + $0x2] sm:$0x3] }
 0xde3   :  { %2571 = vst.msk [vmem:[#allocation3] sm:$0x3] %vm70_vm0, %v2569_v28  ;;  %3385 = vmatmul.mubr.msk.f32.vlgmr.msra.gmra.mrb[14].mxu1 %vm94_vm1, %v2588_v45 }
 0xde4   :  { %3718 = vmatpush1.bf16.msra.mxu1 %v4587_v39  ;;  %2747 = vmatprep.mubr.f32.mxu1 %v4028_v1 }
 0xde5   :  { %3720 = vmatprep.subr.bf16.mxu1 %v4590_v47 }
 0xde8   :  { %3722 = vmatpush1.bf16.msra.mxu1 %v4595_v24  ;;  %v2804_v13 = vld [vmem:[#allocation2] sm:$0x3] }
 0xde9   :  { %3388 = vmatmul.mubr.msk.f32.vlgmr.msra.gmra.mrb[12].mxu0 %vm94_vm1, %v2804_v13  ;;  %3724 = vmatprep.subr.bf16.mxu1 %v4599_v56 }
 0xdea   :  { %v3389_v55 = vld.sshfl [vmem:[#allocation3] sm:$0x3 pattern:$0x76325410]  ;;  %3750 = vmatpush1.bf16.msra.mxu0 %v4552_v25  ;;  %3062 = vmatprep.mubr.f32.mxu0 %v4028_v1 }
 0xdeb   :  { %2932 = vrot.lane.b32.xlu1 %v3389_v55, %s4025_s1  ;;  %3752 = vmatprep.subr.bf16.mxu0 %v4554_v29 }
 0xdec   :  { %3726 = vmatpush1.bf16.msra.mxu1 %v4602_v58 }
 0xded   :  { %3728 = vmatprep.subr.bf16.mxu1 %v4606_v0 }
 0xdee   :  { %3754 = vmatpush1.bf16.msra.mxu0 %v4559_v36 }
 0xdef   :  { %3756 = vmatprep.subr.bf16.mxu0 %v4562_v16  ;;  %v3387_v16 = vld [vmem:[%s4698_s3 + $0x2] sm:$0x3] }
 0xdf0   :  { %3730 = vmatpush1.bf16.msra.mxu1 %v4613_v38 }
 0xdf2   :  { %3758 = vmatpush1.bf16.msra.mxu0 %v4564_v27  ;;  %v2759_v27 = vrot.slane %v3387_v16, %v4251_v7 }
 0xdf3   :  { %3386 = vmatmul.mubr.msk.f32.vlgmr.msra.gmra.mrb[14].mxu1 %vm94_vm1, %v2558_v19  ;;  %3760 = vmatprep.subr.bf16.mxu0 %v4569_v23 }
 0xdf6   :  { %3762 = vmatpush1.bf16.msra.mxu0 %v4571_v44  ;;  %v2763_v44 = vrot.slane %v3387_v16, %v4258_v14 }
 0xdf7   :  { %3764 = vmatprep.subr.bf16.mxu0 %v4575_v60 }
 0xe48   :  { %v2779_v46 = vpop.permute.xlu1 %2778 }
 0xe5d   :  { %v2933_v9 = vpop.permute.xlu1 %2932 }
 0xebc   :  { %v2891_v25 = vpop.f32.mrb[12].mxu0 }
 0xebd   :  { %v2893_v29 = vpop.f32.mrb[13].mxu0 }
 0xebe   :  { %v2898_v42 = vcombine.low %v2891_v25, %v2893_v29 }
 0xec0   :  { %v2905_v36 = vrot.slane %v2898_v42, %v4162_v34 }
 0xec2   :  { %v2907_v12 = vadd.f32 %v2905_v36, %v2803_v26 }
 0xec4   :  { %v2908_v51 = vmul.f32 0.5, %v2907_v12  ;;  %v2913_v62 = vrot.slane %v2907_v12, 2 }
 0xec6   :  { %v2749_v52 = vpop.f32.mrb[14].mxu1  ;;  %3911 = vtanh.f32 %v2908_v51 }
 0xec7   :  { %v2766_v23 = vadd.f32 %v2759_v27, %v2749_v52  ;;  %v2751_v53 = vpop.f32.mrb[15].mxu1  ;;  %v3191_v27 = vld [vmem:[#allocation4] sm:$0x3]  ;;  %v3193_v52 = vld [vmem:[#allocation4 + $0x4] sm:$0x3] }
 0xec8   :  { %v2767_v59 = vadd.f32 %v2763_v44, %v2751_v53  ;;  %v3194_v53 = vld [vmem:[#allocation4 + $0x6] sm:$0x3] }
 0xec9   :  { %v2768_v60 = vmul.f32 0.5, %v2766_v23 }
 0xeca   :  { %v2773_v8 = vmul.f32 0.5, %v2767_v59 }
 0xecb   :  { %3913 = vtanh.f32 %v2768_v60 }
 0xecc   :  { %3915 = vtanh.f32 %v2767_v59  ;;  %v3196_v59 = vld [vmem:[#allocation4 + $0xa] sm:$0x3] }
 0xecd   :  { %3917 = vtanh.f32 %v2913_v62 }
 0xece   :  { %3919 = vtanh.f32 %v2773_v8 }
 0xed0   :  { %v3912_v63 = vpop.eup %3911 }
 0xed1   :  { %v2910_v20 = vmul.f32 0.5, %v3912_v63 }
 0xed3   :  { %v2911_v40 = vadd.f32 0.5, %v2910_v20 }
 0xed5   :  { %v3914_v11 = vpop.eup %3913  ;;  %v2935_v15 = vmul.f32 %v2933_v9, %v2911_v40  ;;  %v3195_v9 = vld [vmem:[#allocation4 + $0x8] sm:$0x3] }
 0xed6   :  { %v2770_v50 = vmul.f32 0.5, %v3914_v11  ;;  %v3916_v33 = vpop.eup %3915 }
 0xed7   :  { %v3918_v41 = vpop.eup %3917 }
 0xed8   :  { %v2771_v31 = vadd.f32 0.5, %v2770_v50  ;;  %v2936_v43 = vmul.f32 %v3918_v41, %v2911_v40  ;;  %v3920_v22 = vpop.eup %3919  ;;  %v4030_v50 = vmov 0  }
 0xed9   :  { %v2775_v19 = vmul.f32 0.5, %v3920_v22  ;;  %3805 = vset.pattern.permute.xlu1 %v4030_v50  ;;  %3806 = vset.pattern.permute.xlu0 %v4030_v50 }
 0xeda   :  { %v2782_v37 = vmul.f32 %v3916_v33, %v2771_v31  ;;  %v2781_v49 = vmul.f32 %v2779_v46, %v2771_v31 }
 0xedb   :  { %v2776_v48 = vadd.f32 0.5, %v2775_v19 }
 0xedc   :  { %2784 = vrot.lane.b32.xlu0 %v2782_v37, %s4025_s1 }
 0xee0   :  { %2938 = vrot.lane.b32.xlu0 %v2936_v43, %s4025_s1 }
 0xee4   :  { %2916 = vrot.lane.b32.xlu0 %v2907_v12, %s4025_s1 }
 0xf4e   :  { %v2785_v6 = vpop.permute.xlu0 %2784 }
 0xf4f   :  { %v2787_v5 = vadd.f32 %v2785_v6, %v2781_v49  ;;  %v3192_v6 = vld [vmem:[#allocation4 + $0x2] sm:$0x3] }
 0xf51   :  { %3921 = vtanh.f32 %v2787_v5  ;;  %2796 = vrot.lane.b32.xlu0 %v2787_v5, %s4025_s1 }
 0xf52   :  { %v2939_v54 = vpop.permute.xlu0 %2938 }
 0xf53   :  { %v4634_v18 = vadd.f32 %v2939_v54, %v2935_v15 }
 0xf55   :  { %3923 = vtanh.f32 %v4634_v18 }
 0xf56   :  { %v2917_v10 = vpop.permute.xlu0 %2916 }
 0xf57   :  { %v2918_v61 = vrot.slane %v2917_v10, 2 }
 0xf59   :  { %v2920_v57 = vmul.f32 0.5, %v2918_v61 }
 0xf5b   :  { %v3922_v21 = vpop.eup %3921  ;;  %3925 = vtanh.f32 %v2920_v57 }
 0xf5c   :  { %v2789_v28 = vmul.f32 %v3922_v21, %v2776_v48 }
 0xf5e   :  { %2791 = vrot.lane.b32.xlu1 %v2789_v28, %s4025_s1  ;;  %v3394_v28 = vld [vmem:[#allocation5] ss:$0 sm:$0xff] }
 0xf5f   :  { %v3924_v45 = vpop.eup %3923 }
 0xf62   :  { %2944 = vrot.lane.b32.xlu1 %v3924_v45, %s4025_s1 }
 0xf65   :  { %v3926_v4 = vpop.eup %3925 }
 0xf66   :  { %v2922_v13 = vmul.f32 0.5, %v3926_v4 }
 0xf68   :  { %v2923_v35 = vadd.f32 0.5, %v2922_v13 }
 0xfc3   :  { %v2797_v3 = vpop.permute.xlu0 %2796 }
 0xfc4   :  { %2799 = vst.msk [vmem:[#allocation3 + $0x2] sm:$0x3] %vm70_vm0, %v2797_v3  ;;  %v2956_v3 = vrot.slane %v4634_v18, %v4162_v34 }
 0xfcb   :  { %v2978_v2 = vld [vmem:[#allocation3 + $0x2] sm:$0x3] }
 0xfcc   :  { %3167 = vrot.lane.b32.xlu1 %v2978_v2, %s4025_s1 }
 0xfd0   :  { %v2792_v17 = vpop.permute.xlu1 %2791 }
 0xfd1   :  { %2794 = vst.msk [vmem:[#allocation2 + $0x2] sm:$0x3] %vm70_vm0, %v2792_v17  ;;  %2801 = vst.msk [vmem:[#allocation4 + $0xc] sm:$0x3] %vm70_vm0, %v2792_v17 }
 0xfd4   :  { %v2945_v55 = vpop.permute.xlu1 %2944 }
 0xfd5   :  { %v2947_v25 = vmul.f32 %v2945_v55, %v2923_v35 }
 0xfd7   :  { %2948 = vst.msk [vmem:[#allocation2] sm:$0x3] %vm70_vm0, %v2947_v25 }
 0xfd8   :  { %v2977_v29 = vld [vmem:[#allocation2 + $0x2] sm:$0x3]  ;;  %v3197_v22 = vld [vmem:[#allocation4 + $0xc] sm:$0x3] }
 0xfd9   :  { %3390 = vmatmul.mubr.msk.f32.vlgmr.msra.gmra.mrb[14].mxu0 %vm94_vm1, %v2977_v29 }
 0xfda   :  { %3766 = vmatpush1.bf16.msra.mxu0 %v4587_v39  ;;  %3136 = vmatprep.mubr.f32.mxu0 %v4028_v1  ;;  %v3392_v39 = vld [vmem:[%s4698_s3 + $0x2] sm:$0x3] }
 0xfdb   :  { %3768 = vmatprep.subr.bf16.mxu0 %v4590_v47  ;;  %v3148_v1 = vrot.slane %v3392_v39, %v4251_v7  ;;  %v3393_v7 = vld [vmem:[%s4699_s4] ss:$0 sm:$0xff] }
 0xfdc   :  { %v3206_v51 = vmul.f32 %v3393_v7, %v3191_v27  ;;  %v3208_v23 = vmul.f32 %v3393_v7, %v3193_v52  ;;  %v3209_v60 = vmul.f32 %v3393_v7, %v3194_v53  ;;  %v3211_v63 = vmul.f32 %v3393_v7, %v3196_v59 }
 0xfdd   :  { %v3207_v5 = vmul.f32 %v3393_v7, %v3192_v6  ;;  %v3210_v54 = vmul.f32 %v3393_v7, %v3195_v9  ;;  %v3212_v48 = vmul.f32 %v3393_v7, %v3197_v22  ;;  %v3297_v27 = vand.u32 127, %v175_v30 }
 0xfde   :  { %3770 = vmatpush1.bf16.msra.mxu0 %v4595_v24  ;;  %v3152_v24 = vrot.slane %v3392_v39, %v4258_v14  ;;  %v3214_v14 = vsel %vm70_vm0, %v3206_v51, 0.0  ;;  %v3220_v44 = vsel %vm70_vm0, %v3208_v23, 0.0  ;;  %v3223_v62 = vsel %vm70_vm0, %v3209_v60, 0.0 }
 0xfdf   :  { %3772 = vmatprep.subr.bf16.mxu0 %v4599_v56  ;;  %v3229_v11 = vsel %vm70_vm0, %v3211_v63, 0.0  ;;  %v3217_v15 = vsel %vm70_vm0, %v3207_v5, 0.0  ;;  %v3226_v19 = vsel %vm70_vm0, %v3210_v54, 0.0  ;;  %v3232_v21 = vsel %vm70_vm0, %v3212_v48, 0.0 }
 0xfe0   :  { %v3300_v52 = vsub.s32 %v3297_v27, %v4159_v32 }
 0xfe2   :  { %3774 = vmatpush1.bf16.msra.mxu0 %v4602_v58 }
 0xfe3   :  { %3776 = vmatprep.subr.bf16.mxu0 %v4606_v0 }
 0xfe6   :  { %3778 = vmatpush1.bf16.msra.mxu0 %v4613_v38 }
 0xfe9   :  { %3391 = vmatmul.mubr.msk.f32.vlgmr.msra.gmra.mrb[14].mxu0 %vm94_vm1, %v2947_v25 }
0x103e   :  { %v3168_v31 = vpop.permute.xlu1 %3167 }
0x10bc   :  { %v3138_v42 = vpop.f32.mrb[14].mxu0 }
0x10bd   :  { %v3155_v47 = vadd.f32 %v3148_v1, %v3138_v42  ;;  %v3140_v26 = vpop.f32.mrb[15].mxu0 }
0x10be   :  { %v3156_v58 = vadd.f32 %v3152_v24, %v3140_v26 }
0x10bf   :  { %v3157_v56 = vmul.f32 0.5, %v3155_v47 }
0x10c0   :  { %v3162_v20 = vmul.f32 0.5, %v3156_v58 }
0x10c1   :  { %3927 = vtanh.f32 %v3157_v56 }
0x10c2   :  { %3929 = vtanh.f32 %v3156_v58 }
0x10c3   :  { %3931 = vtanh.f32 %v3162_v20 }
0x10cb   :  { %v3928_v0 = vpop.eup %3927 }
0x10cc   :  { %v3159_v36 = vmul.f32 0.5, %v3928_v0  ;;  %v3930_v16 = vpop.eup %3929 }
0x10cd   :  { %v3932_v41 = vpop.eup %3931 }
0x10ce   :  { %v3160_v38 = vadd.f32 0.5, %v3159_v36  ;;  %v3164_v43 = vmul.f32 0.5, %v3932_v41 }
0x10d0   :  { %v3171_v12 = vmul.f32 %v3930_v16, %v3160_v38  ;;  %v3170_v33 = vmul.f32 %v3168_v31, %v3160_v38  ;;  %v3165_v8 = vadd.f32 0.5, %v3164_v43 }
0x10d2   :  { %3173 = vrot.lane.b32.xlu0 %v3171_v12, %s4025_s1 }
0x10f1   :  { %3215 = vadd.xlane.f32.xlu0 %v3214_v14 }
0x10f5   :  { %3221 = vadd.xlane.f32.xlu0 %v3220_v44 }
0x10f9   :  { %3224 = vadd.xlane.f32.xlu0 %v3223_v62 }
0x10fd   :  { %3230 = vadd.xlane.f32.xlu0 %v3229_v11 }
0x1144   :  { %v3174_v37 = vpop.permute.xlu0 %3173 }
0x1145   :  { %v3176_v40 = vadd.f32 %v3174_v37, %v3170_v33 }
0x1147   :  { %3933 = vtanh.f32 %v3176_v40 }
0x1151   :  { %v3934_v46 = vpop.eup %3933 }
0x1152   :  { %v3178_v49 = vmul.f32 %v3934_v46, %v3165_v8 }
0x1154   :  { %3180 = vrot.lane.b32.xlu1 %v3178_v49, %s4025_s1 }
0x1178   :  { %3218 = vadd.xlane.f32.xlu1 %v3217_v15 }
0x117c   :  { %3227 = vadd.xlane.f32.xlu1 %v3226_v19 }
0x117e   :  { %v3216_v2 = vpop.xlane.xlu0 %3215 }
0x1180   :  { %3233 = vadd.xlane.f32.xlu1 %v3232_v21 }
0x1182   :  { %v3222_v13 = vpop.xlane.xlu0 %3221 }
0x1186   :  { %v3225_v35 = vpop.xlane.xlu0 %3224 }
0x118a   :  { %v3231_v29 = vpop.xlane.xlu0 %3230 }
0x1191   :  { %3245 = vperm.xlu1 %3805, %v3394_v28  }
0x1195   :  { %3185 = vrot.lane.b32.xlu1 %v3176_v40, %s4025_s1 }
0x11c6   :  { %v3181_v45 = vpop.permute.xlu1 %3180 }
0x11c7   :  { %3183 = vst.msk [vmem:[#allocation2 + $0x2] sm:$0x3] %vm70_vm0, %v3181_v45  ;;  %3190 = vst.msk [vmem:[#allocation4 + $0xe] sm:$0x3] %vm70_vm0, %v3181_v45 }
0x11ce   :  { %v3198_v10 = vld [vmem:[#allocation4 + $0xe] sm:$0x3] }
0x11cf   :  { %v3213_v61 = vmul.f32 %v3393_v7, %v3198_v10 }
0x11d1   :  { %v3235_v57 = vsel %vm70_vm0, %v3213_v61, 0.0 }
0x11d2   :  { %3236 = vadd.xlane.f32.xlu0 %v3235_v57 }
0x11e8   :  { %2957 = vrot.lane.b32.xlu0 %v2956_v3, %s4025_s1 }
0x1205   :  { %v3219_v4 = vpop.xlane.xlu1 %3218 }
0x1209   :  { %v3228_v17 = vpop.xlane.xlu1 %3227 }
0x120d   :  { %v3234_v55 = vpop.xlane.xlu1 %3233 }
0x1211   :  { %v4678_v25 = vpop.permute.xlu1 %3245 }
0x1212   :  { %v3248_v39 = vadd.f32 %v4678_v25, %v3216_v2  ;;  %v3249_v1 = vadd.f32 %v4678_v25, %v3219_v4  ;;  %v3250_v42 = vadd.f32 %v4678_v25, %v3222_v13  ;;  %v3251_v47 = vadd.f32 %v4678_v25, %v3225_v35 }
0x1213   :  { %v3252_v34 = vadd.f32 %v4678_v25, %v3228_v17  ;;  %v3253_v18 = vadd.f32 %v4678_v25, %v3231_v29  ;;  %v3254_v26 = vadd.f32 %v4678_v25, %v3234_v55 }
0x1214   :  { %v3256_v24 = vmul.f32 0.5, %v3248_v39  ;;  %v3257_v56 = vmul.f32 0.5, %v3249_v1  ;;  %v3258_v58 = vmul.f32 0.5, %v3250_v42  ;;  %v3259_v0 = vmul.f32 0.5, %v3251_v47 }
0x1215   :  { %v3186_v36 = vpop.permute.xlu1 %3185  ;;  %v3260_v38 = vmul.f32 0.5, %v3252_v34  ;;  %v3261_v16 = vmul.f32 0.5, %v3253_v18  ;;  %v3262_v12 = vmul.f32 0.5, %v3254_v26 }
0x1216   :  { %3935 = vtanh.f32 %v3256_v24  ;;  %3188 = vst.msk [vmem:[#allocation3 + $0x2] sm:$0x3] %vm70_vm0, %v3186_v36 }
0x1217   :  { %3937 = vtanh.f32 %v3257_v56 }
0x1218   :  { %3939 = vtanh.f32 %v3258_v58 }
0x1219   :  { %3941 = vtanh.f32 %v3259_v0 }
0x121a   :  { %3943 = vtanh.f32 %v3260_v38 }
0x121b   :  { %3945 = vtanh.f32 %v3261_v16 }
0x121c   :  { %3947 = vtanh.f32 %v3262_v12 }
0x1220   :  { %v3936_v7 = vpop.eup %3935 }
0x1221   :  { %v3938_v51 = vpop.eup %3937  ;;  %v3272_v14 = vmul.f32 0.5, %v3936_v7 }
0x1222   :  { %v3940_v23 = vpop.eup %3939  ;;  %v3273_v53 = vmul.f32 0.5, %v3938_v51 }
0x1223   :  { %v3942_v44 = vpop.eup %3941  ;;  %v3274_v60 = vmul.f32 0.5, %v3940_v23  ;;  %v3280_v59 = vadd.f32 0.5, %v3272_v14 }
0x1224   :  { %v3944_v62 = vpop.eup %3943  ;;  %v3275_v63 = vmul.f32 0.5, %v3942_v44  ;;  %v3281_v11 = vadd.f32 0.5, %v3273_v53 }
0x1225   :  { %v3946_v50 = vpop.eup %3945  ;;  %v3276_v20 = vmul.f32 0.5, %v3944_v62  ;;  %v3282_v31 = vadd.f32 0.5, %v3274_v60  ;;  %v3301_v33 = vrot.slane %v3280_v59, %v3300_v52 }
0x1226   :  { %v3948_v37 = vpop.eup %3947  ;;  %v3283_v30 = vadd.f32 0.5, %v3275_v63  ;;  %v3305_v40 = vrot.slane %v3281_v11, %v3300_v52  ;;  %v3277_v41 = vmul.f32 0.5, %v3946_v50 }
0x1227   :  { %v3284_v32 = vadd.f32 0.5, %v3276_v20  ;;  %v3309_v43 = vrot.slane %v3282_v31, %v3300_v52  ;;  %v3278_v8 = vmul.f32 0.5, %v3948_v37 }
0x1228   :  { %v3285_v46 = vadd.f32 0.5, %v3277_v41  ;;  %v3313_v49 = vrot.slane %v3283_v30, %v3300_v52  ;;  %v3331_v6 = vsel %vm3330_vm2, %v3305_v40, %v3301_v33 }
0x1229   :  { %v3286_v5 = vadd.f32 0.5, %v3278_v8  ;;  %v3317_v9 = vrot.slane %v3284_v32, %v3300_v52  ;;  %v3333_v15 = vsel %vm3332_vm3, %v3309_v43, %v3331_v6 }
0x122a   :  { %v3321_v54 = vrot.slane %v3285_v46, %v3300_v52  ;;  %v3335_v22 = vsel %vm3334_vm4, %v3313_v49, %v3333_v15 }
0x122b   :  { %v3325_v19 = vrot.slane %v3286_v5, %v3300_v52  ;;  %v3337_v48 = vsel %vm3336_vm5, %v3317_v9, %v3335_v22 }
0x122c   :  { %v3339_v21 = vsel %vm3338_vm6, %v3321_v54, %v3337_v48 }
0x122d   :  { %v3341_v28 = vsel %vm3340_vm7, %v3325_v19, %v3339_v21 }
0x125f   :  { %v3237_v45 = vpop.xlane.xlu0 %3236 }
0x1260   :  { %v3255_v10 = vadd.f32 %v4678_v25, %v3237_v45 }
0x1262   :  { %v3263_v61 = vmul.f32 0.5, %v3255_v10 }
0x1263   :  { %v2958_v57 = vpop.permute.xlu0 %2957 }
0x1264   :  { %3949 = vtanh.f32 %v3263_v61  ;;  %2960 = vst.msk [vmem:[#allocation3] sm:$0x3] %vm70_vm0, %v2958_v57 }
0x126e   :  { %v3950_v3 = vpop.eup %3949 }
0x126f   :  { %v3279_v2 = vmul.f32 0.5, %v3950_v3 }
0x1271   :  { %v3287_v4 = vadd.f32 0.5, %v3279_v2 }
0x1273   :  { %v3329_v13 = vrot.slane %v3287_v4, %v3300_v52 }
0x1275   :  { %v3343_v17 = vsel %vm3342_vm8, %v3329_v13, %v3341_v28 }
0x1276   :  { %3346 = vst.msk [vmem:[%s4701_s6] sm:$0xff] %vm3345_vm9, %v3343_v17 }
0x1277   :  { %3351 = vsyncpa [#allocation7], 1 }
0x1278   :  { %3352 = vsyncpa [#allocation9], 1 }

</bundles_post_ra>
